<compile_context>
chip_gen: v7x
topology: tpu7x:2x2x1
jax: 0.10.0
libtpu: 0.0.40
codegen_flags: <defaults>
</compile_context>

<pallas_src>
import jax
import jax.numpy as jnp
from jax.experimental import pallas as pl
from jax.experimental.pallas import tpu as pltpu


# ------------------------ small layout helpers (traced in-kernel) ------------
def _row_to_plane(row, h, w):
    # (1, h*w) -> (h, w): h lane-offset slices concatenated along sublanes.
    return jnp.concatenate([row[:, i * w:(i + 1) * w] for i in range(h)], axis=0)


def _plane_to_row(plane, h, w):
    # (h, w) -> (1, h*w): h sublane slices concatenated along lanes.
    return jnp.concatenate([plane[i:i + 1, :] for i in range(h)], axis=1)


# ------------------------------- fused kernel --------------------------------
def _cbam_kernel(x_ref, w1_ref, w2_ref, wsp_ref, out_ref, pm_ref):
    # x_ref  : (1, C, HW)     per-batch activation slab (lane-dense)
    # w1_ref : (Cr, C)        fc1 weight (Conv2d C->Cr, 1x1, no bias)
    # w2_ref : (C, Cr)        fc2 weight (Conv2d Cr->C, 1x1, no bias)
    # wsp_ref: (2*7*7,) SMEM  7x7 spatial conv weight, flat [ci*49 + dy*7 + dx]
    # out_ref: (1, C, HW)
    # pm_ref : (2, H+6, W+6)  VMEM scratch: zero-padded [mean_C, max_C] maps
    Hp = pm_ref.shape[1]
    Wp = pm_ref.shape[2]
    H = Hp - 6
    W = Wp - 6
    HW = x_ref.shape[2]

    # ---- channel attention: sigmoid(fc2(relu(fc1([avg, max])))) summed ------
    # HW-mean on the MXU (idle otherwise); 1/HW folded into the ones column.
    ones_col = jnp.full((HW, 1), 1.0 / HW, dtype=jnp.float32)
    avg_c = jnp.dot(x_ref[0], ones_col,
                    preferred_element_type=jnp.float32)            # (C, 1)
    max_c = jnp.max(x_ref[0], axis=1, keepdims=True)               # (C, 1)

    pooled = jnp.concatenate([avg_c, max_c], axis=1)               # (C, 2)
    h_2 = jnp.maximum(
        jnp.dot(w1_ref[...], pooled, preferred_element_type=jnp.float32), 0.0)
    o_2 = jnp.dot(w2_ref[...], h_2, preferred_element_type=jnp.float32)  # (C, 2)
    ca = jax.nn.sigmoid(o_2[:, 0:1] + o_2[:, 1:2])                 # (C, 1)

    # ---- spatial-attention input maps ---------------------------------------
    # Gated slab is short-lived: consumed immediately by the two channel
    # reductions and NOT kept live across the conv / final store.
    y = x_ref[0] * ca                                              # (C, HW)
    avg_sp = jnp.mean(y, axis=0, keepdims=True)                    # (1, HW)
    max_sp = jnp.max(y, axis=0, keepdims=True)                     # (1, HW)

    # Zero-padded maps in VMEM scratch.  Re-zeroed every step on purpose:
    # scratch is per-core/uninitialised, so a program_id==0-only init would
    # leave garbage halos on the second TensorCore of a megacore part.
    pm_ref[...] = jnp.zeros((2, Hp, Wp), jnp.float32)
    pm_ref[0, 3:3 + H, 3:3 + W] = _row_to_plane(avg_sp, H, W)
    pm_ref[1, 3:3 + H, 3:3 + W] = _row_to_plane(max_sp, H, W)

    # ---- 7x7 conv (2 -> 1 channel, "same" padding, no bias) -----------------
    # One aligned full-plane load per channel; dx (lane) and dy (sublane)
    # shifts are in-register static slices (XLU), co-issuing with the FMAs.
    acc = jnp.zeros((H, W), jnp.float32)
    for ci in range(2):
        plane = pm_ref[ci]                              # (Hp, Wp) aligned load
        for dx in range(7):
            col = plane[:, dx:dx + W]                   # (Hp, W) lane shift
            for dy in range(7):
                wv = wsp_ref[ci * 49 + dy * 7 + dx]     # scalar from SMEM
                acc = acc + wv * col[dy:dy + H, :]

    sa = jax.nn.sigmoid(acc)                            # (H, W)
    sa_flat = _plane_to_row(sa, H, W)                   # (1, HW)

    # ---- fused store: x * channel_gate * spatial_gate (lane-dense) ----------
    out_ref[0] = x_ref[0] * ca * sa_flat


# --------------------------------- wrapper ------------------------------------
@jax.jit
def cbam_forward(x, w1c, w2c, wsp):
    """x: (N, C, H, W) f32; w1c: (C//r, C); w2c: (C, C//r); wsp: (2, 7, 7)."""
    N, C, H, W = x.shape
    Cr = w1c.shape[0]
    HW = H * W

    xf = x.reshape(N, C, HW)           # contiguous reshape: free in XLA
    wflat = wsp.reshape(-1)            # (98,)

    # Generation-aware-ish VMEM budget: double-buffered in/out slabs + conv
    # scratch + live temporaries, capped at 40 MiB to keep headroom under
    # v7x's 64 MiB physical VMEM (v5e/v6e have 128 MiB, so the cap is safe).
    slab_bytes = C * HW * 4
    pm_bytes = 2 * (H + 6) * (W + 6) * 4
    vmem_budget = 4 * slab_bytes + 3 * slab_bytes + pm_bytes + (2 << 20)
    vmem_limit = int(min(max(vmem_budget, 8 << 20), 40 << 20))

    cost = pl.CostEstimate(
        flops=N * (2 * C * HW            # MXU mean matvec
                   + 8 * C * Cr          # fused channel MLP
                   + 4 * C * HW          # gate applies + channel reductions
                   + 2 * 2 * 49 * H * W),  # 7x7 conv FMAs
        transcendentals=N * (C + H * W),   # sigmoids
        bytes_accessed=2 * N * C * HW * 4 + (2 * C * Cr + 98) * 4,
    )

    # NOTE: with N == 1 on a 2-TensorCore part, a batch-only parallel grid
    # leaves one core idle; split the gate-apply/store over an HW tile axis if
    # that case matters.
    outf = pl.pallas_call(
        _cbam_kernel,
        out_shape=jax.ShapeDtypeStruct((N, C, HW), jnp.float32),
        grid=(N,),
        in_specs=[
            pl.BlockSpec((1, C, HW), lambda n: (n, 0, 0)),
            pl.BlockSpec((Cr, C), lambda n: (0, 0)),
            pl.BlockSpec((C, Cr), lambda n: (0, 0)),
            pl.BlockSpec(memory_space=pltpu.MemorySpace.SMEM),
        ],
        out_specs=pl.BlockSpec((1, C, HW), lambda n: (n, 0, 0)),
        scratch_shapes=[pltpu.VMEM((2, H + 6, W + 6), jnp.float32)],
        compiler_params=pltpu.CompilerParams(
            dimension_semantics=("parallel",),
            vmem_limit_bytes=vmem_limit,
        ),
        cost_estimate=cost,
    )(xf, w1c, w2c, wflat)
    return outf.reshape(N, C, H, W)


# ----------------------------- pure-JAX reference ------------------------------
def cbam_ref(x, w1c, w2c, wsp):
    avg = jnp.mean(x, axis=(2, 3))                      # (N, C)
    mx = jnp.max(x, axis=(2, 3))                        # (N, C)

    def fc(p):
        h = jax.nn.relu(p @ w1c.T)                      # (N, Cr)
        return h @ w2c.T                                # (N, C)

    ca = jax.nn.sigmoid(fc(avg) + fc(mx))[:, :, None, None]
    x1 = x * ca
    avg_sp = jnp.mean(x1, axis=1, keepdims=True)
    max_sp = jnp.max(x1, axis=1, keepdims=True)
    sm = jnp.concatenate([avg_sp, max_sp], axis=1)      # (N, 2, H, W)
    conv = jax.lax.conv_general_dilated(
        sm, wsp[None], window_strides=(1, 1), padding=[(3, 3), (3, 3)],
        dimension_numbers=("NCHW", "OIHW", "NCHW"))
    sa = jax.nn.sigmoid(conv)
    return x1 * sa


if __name__ == "__main__":
    key = jax.random.PRNGKey(0)
    k1, k2, k3, k4 = jax.random.split(key, 4)

    N, C, H, W = 2, 16, 16, 16
    ratio = 8
    Cr = C // ratio

    x = jax.random.normal(k1, (N, C, H, W), jnp.float32)
    # fc1: Conv2d(C, C//ratio, 1, bias=False)  -> weight (Cr, C)
    w1c = 0.1 * jax.random.normal(k2, (Cr, C), jnp.float32)
    # fc2: Conv2d(C//ratio, C, 1, bias=False)  -> weight (C, Cr)
    w2c = 0.1 * jax.random.normal(k3, (C, Cr), jnp.float32)
    # spatial conv: Conv2d(2, 1, 7, padding=3, bias=False) -> weight (2, 7, 7)
    wsp = 0.1 * jax.random.normal(k4, (2, 7, 7), jnp.float32)

    out = cbam_forward(x, w1c, w2c, wsp)
    out = jax.block_until_ready(out)

    ref = cbam_ref(x, w1c, w2c, wsp)
    err = float(jnp.max(jnp.abs(out - ref)))
    assert out.shape == (N, C, H, W)
    assert err < 1e-4, f"max abs error {err}"
    print("KERNEL_OK")
</pallas_src>

<mosaic_0001>
module attributes {stable_mosaic.version = 11 : i64} {
  func.func @_cbam_kernel(%arg0: i32, %arg1: memref<1x16x256xf32, #tpu.memory_space<vmem>>, %arg2: memref<2x16xf32, #tpu.memory_space<vmem>>, %arg3: memref<16x2xf32, #tpu.memory_space<vmem>>, %arg4: memref<98xf32, #tpu.memory_space<smem>>, %arg5: memref<1x16x256xf32, #tpu.memory_space<vmem>>, %arg6: memref<2x22x22xf32, #tpu.memory_space<vmem>>) attributes {dimension_semantics = [#tpu.dimension_semantics<parallel>], iteration_bounds = array<i64: 2>, scalar_prefetch = 0 : i64, scratch_operands = 1 : i64, tpu.core_type = #tpu.core_type<tc>, window_params = [{transform_indices = @transform_0, window_bounds = array<i64: 1, 16, 256>}, {pipeline_mode = #tpu.pipeline_mode<synchronous>, transform_indices = @transform_1, window_bounds = array<i64: 2, 16>}, {pipeline_mode = #tpu.pipeline_mode<synchronous>, transform_indices = @transform_2, window_bounds = array<i64: 16, 2>}, {transform_indices = @transform_3, window_bounds = array<i64: 98>}, {transform_indices = @transform_4, window_bounds = array<i64: 1, 16, 256>}]} {
    %cst = arith.constant 3.906250e-03 : f32
    %0 = vector.broadcast %cst : f32 to vector<256x1xf32>
    %c0 = arith.constant 0 : index
    %c0_0 = arith.constant 0 : index
    %c0_1 = arith.constant 0 : index
    %1 = vector.load %arg1[%c0, %c0_0, %c0_1] : memref<1x16x256xf32, #tpu.memory_space<vmem>>, vector<1x16x256xf32>
    %2 = vector.shape_cast %1 : vector<1x16x256xf32> to vector<16x256xf32>
    %cst_2 = arith.constant dense<0.000000e+00> : vector<16x1xf32>
    %3 = tpu.matmul %2, %0, %cst_2 {dimension_numbers = #tpu.dot_dimension_numbers<[1], [0], [0], [1], [0, 0, 1, 1], [], []>} : vector<16x256xf32>, vector<256x1xf32>, vector<16x1xf32> -> vector<16x1xf32>
    %c0_3 = arith.constant 0 : index
    %c0_4 = arith.constant 0 : index
    %c0_5 = arith.constant 0 : index
    %4 = vector.load %arg1[%c0_3, %c0_4, %c0_5] : memref<1x16x256xf32, #tpu.memory_space<vmem>>, vector<1x16x256xf32>
    %5 = vector.shape_cast %4 : vector<1x16x256xf32> to vector<16x256xf32>
    %cst_6 = arith.constant dense<0xFF800000> : vector<16xf32>
    %6 = vector.multi_reduction <maximumf>, %5, %cst_6 [1] : vector<16x256xf32> to vector<16xf32>
    %7 = vector.shape_cast %6 : vector<16xf32> to vector<16x1xf32>
    %8 = tpu.concatenate %3, %7 in 1 : vector<16x1xf32>, vector<16x1xf32> -> vector<16x2xf32>
    %c0_7 = arith.constant 0 : index
    %c0_8 = arith.constant 0 : index
    %9 = vector.load %arg2[%c0_7, %c0_8] : memref<2x16xf32, #tpu.memory_space<vmem>>, vector<2x16xf32>
    %cst_9 = arith.constant dense<0.000000e+00> : vector<2x2xf32>
    %10 = tpu.matmul %9, %8, %cst_9 {dimension_numbers = #tpu.dot_dimension_numbers<[1], [0], [0], [1], [0, 0, 1, 1], [], []>} : vector<2x16xf32>, vector<16x2xf32>, vector<2x2xf32> -> vector<2x2xf32>
    %cst_10 = arith.constant 0.000000e+00 : f32
    %11 = vector.broadcast %cst_10 : f32 to vector<2x2xf32>
    %12 = arith.maximumf %10, %11 : vector<2x2xf32>
    %c0_11 = arith.constant 0 : index
    %c0_12 = arith.constant 0 : index
    %13 = vector.load %arg3[%c0_11, %c0_12] : memref<16x2xf32, #tpu.memory_space<vmem>>, vector<16x2xf32>
    %cst_13 = arith.constant dense<0.000000e+00> : vector<16x2xf32>
    %14 = tpu.matmul %13, %12, %cst_13 {dimension_numbers = #tpu.dot_dimension_numbers<[1], [0], [0], [1], [0, 0, 1, 1], [], []>} : vector<16x2xf32>, vector<2x2xf32>, vector<16x2xf32> -> vector<16x2xf32>
    %15 = vector.extract_strided_slice %14 {offsets = [0, 0], sizes = [16, 1], strides = [1, 1]} : vector<16x2xf32> to vector<16x1xf32>
    %16 = vector.extract_strided_slice %14 {offsets = [0, 1], sizes = [16, 1], strides = [1, 1]} : vector<16x2xf32> to vector<16x1xf32>
    %17 = arith.addf %15, %16 : vector<16x1xf32>
    %18 = arith.negf %17 : vector<16x1xf32>
    %19 = math.exp %18 : vector<16x1xf32>
    %cst_14 = arith.constant 1.000000e+00 : f32
    %20 = vector.broadcast %cst_14 : f32 to vector<16x1xf32>
    %21 = arith.addf %20, %19 : vector<16x1xf32>
    %22 = arith.divf %20, %21 : vector<16x1xf32>
    %c0_15 = arith.constant 0 : index
    %c0_16 = arith.constant 0 : index
    %c0_17 = arith.constant 0 : index
    %23 = vector.load %arg1[%c0_15, %c0_16, %c0_17] : memref<1x16x256xf32, #tpu.memory_space<vmem>>, vector<1x16x256xf32>
    %24 = vector.shape_cast %23 : vector<1x16x256xf32> to vector<16x256xf32>
    %25 = vector.broadcast %22 : vector<16x1xf32> to vector<16x256xf32>
    %26 = arith.mulf %24, %25 : vector<16x256xf32>
    %cst_18 = arith.constant dense<0.000000e+00> : vector<256xf32>
    %27 = vector.multi_reduction <add>, %26, %cst_18 [0] : vector<16x256xf32> to vector<256xf32>
    %28 = vector.shape_cast %27 : vector<256xf32> to vector<1x256xf32>
    %cst_19 = arith.constant 1.600000e+01 : f32
    %29 = vector.broadcast %cst_19 : f32 to vector<1x256xf32>
    %30 = arith.divf %28, %29 : vector<1x256xf32>
    %cst_20 = arith.constant dense<0xFF800000> : vector<256xf32>
    %31 = vector.multi_reduction <maximumf>, %26, %cst_20 [0] : vector<16x256xf32> to vector<256xf32>
    %32 = vector.shape_cast %31 : vector<256xf32> to vector<1x256xf32>
    %cst_21 = arith.constant 0.000000e+00 : f32
    %33 = vector.broadcast %cst_21 : f32 to vector<2x22x22xf32>
    %c0_22 = arith.constant 0 : index
    %c0_23 = arith.constant 0 : index
    %c0_24 = arith.constant 0 : index
    %34 = vector.load %arg6[%c0_22, %c0_23, %c0_24] : memref<2x22x22xf32, #tpu.memory_space<vmem>>, vector<2x22x22xf32>
    tpu.vector_store %arg6[%c0_22, %c0_23, %c0_24], %33 {strides = array<i32>} : memref<2x22x22xf32, #tpu.memory_space<vmem>>, vector<2x22x22xf32>,
    %35 = vector.extract_strided_slice %30 {offsets = [0, 0], sizes = [1, 16], strides = [1, 1]} : vector<1x256xf32> to vector<1x16xf32>
    %36 = vector.extract_strided_slice %30 {offsets = [0, 16], sizes = [1, 16], strides = [1, 1]} : vector<1x256xf32> to vector<1x16xf32>
    %37 = vector.extract_strided_slice %30 {offsets = [0, 32], sizes = [1, 16], strides = [1, 1]} : vector<1x256xf32> to vector<1x16xf32>
    %38 = vector.extract_strided_slice %30 {offsets = [0, 48], sizes = [1, 16], strides = [1, 1]} : vector<1x256xf32> to vector<1x16xf32>
    %39 = vector.extract_strided_slice %30 {offsets = [0, 64], sizes = [1, 16], strides = [1, 1]} : vector<1x256xf32> to vector<1x16xf32>
    %40 = vector.extract_strided_slice %30 {offsets = [0, 80], sizes = [1, 16], strides = [1, 1]} : vector<1x256xf32> to vector<1x16xf32>
    %41 = vector.extract_strided_slice %30 {offsets = [0, 96], sizes = [1, 16], strides = [1, 1]} : vector<1x256xf32> to vector<1x16xf32>
    %42 = vector.extract_strided_slice %30 {offsets = [0, 112], sizes = [1, 16], strides = [1, 1]} : vector<1x256xf32> to vector<1x16xf32>
    %43 = vector.extract_strided_slice %30 {offsets = [0, 128], sizes = [1, 16], strides = [1, 1]} : vector<1x256xf32> to vector<1x16xf32>
    %44 = vector.extract_strided_slice %30 {offsets = [0, 144], sizes = [1, 16], strides = [1, 1]} : vector<1x256xf32> to vector<1x16xf32>
    %45 = vector.extract_strided_slice %30 {offsets = [0, 160], sizes = [1, 16], strides = [1, 1]} : vector<1x256xf32> to vector<1x16xf32>
    %46 = vector.extract_strided_slice %30 {offsets = [0, 176], sizes = [1, 16], strides = [1, 1]} : vector<1x256xf32> to vector<1x16xf32>
    %47 = vector.extract_strided_slice %30 {offsets = [0, 192], sizes = [1, 16], strides = [1, 1]} : vector<1x256xf32> to vector<1x16xf32>
    %48 = vector.extract_strided_slice %30 {offsets = [0, 208], sizes = [1, 16], strides = [1, 1]} : vector<1x256xf32> to vector<1x16xf32>
    %49 = vector.extract_strided_slice %30 {offsets = [0, 224], sizes = [1, 16], strides = [1, 1]} : vector<1x256xf32> to vector<1x16xf32>
    %50 = vector.extract_strided_slice %30 {offsets = [0, 240], sizes = [1, 16], strides = [1, 1]} : vector<1x256xf32> to vector<1x16xf32>
    %51 = tpu.concatenate %35, %36, %37, %38, %39, %40, %41, %42, %43, %44, %45, %46, %47, %48, %49, %50 in 0 : vector<1x16xf32>, vector<1x16xf32>, vector<1x16xf32>, vector<1x16xf32>, vector<1x16xf32>, vector<1x16xf32>, vector<1x16xf32>, vector<1x16xf32>, vector<1x16xf32>, vector<1x16xf32>, vector<1x16xf32>, vector<1x16xf32>, vector<1x16xf32>, vector<1x16xf32>, vector<1x16xf32>, vector<1x16xf32> -> vector<16x16xf32>
    %c0_25 = arith.constant 0 : index
    %c3 = arith.constant 3 : index
    %c3_26 = arith.constant 3 : index
    %52 = vector.load %arg6[%c0_25, %c3, %c3_26] : memref<2x22x22xf32, #tpu.memory_space<vmem>>, vector<1x16x16xf32>
    %53 = vector.shape_cast %52 : vector<1x16x16xf32> to vector<16x16xf32>
    %54 = vector.shape_cast %51 : vector<16x16xf32> to vector<1x16x16xf32>
    tpu.vector_store %arg6[%c0_25, %c3, %c3_26], %54 {strides = array<i32>} : memref<2x22x22xf32, #tpu.memory_space<vmem>>, vector<1x16x16xf32>,
    %55 = vector.extract_strided_slice %32 {offsets = [0, 0], sizes = [1, 16], strides = [1, 1]} : vector<1x256xf32> to vector<1x16xf32>
    %56 = vector.extract_strided_slice %32 {offsets = [0, 16], sizes = [1, 16], strides = [1, 1]} : vector<1x256xf32> to vector<1x16xf32>
    %57 = vector.extract_strided_slice %32 {offsets = [0, 32], sizes = [1, 16], strides = [1, 1]} : vector<1x256xf32> to vector<1x16xf32>
    %58 = vector.extract_strided_slice %32 {offsets = [0, 48], sizes = [1, 16], strides = [1, 1]} : vector<1x256xf32> to vector<1x16xf32>
    %59 = vector.extract_strided_slice %32 {offsets = [0, 64], sizes = [1, 16], strides = [1, 1]} : vector<1x256xf32> to vector<1x16xf32>
    %60 = vector.extract_strided_slice %32 {offsets = [0, 80], sizes = [1, 16], strides = [1, 1]} : vector<1x256xf32> to vector<1x16xf32>
    %61 = vector.extract_strided_slice %32 {offsets = [0, 96], sizes = [1, 16], strides = [1, 1]} : vector<1x256xf32> to vector<1x16xf32>
    %62 = vector.extract_strided_slice %32 {offsets = [0, 112], sizes = [1, 16], strides = [1, 1]} : vector<1x256xf32> to vector<1x16xf32>
    %63 = vector.extract_strided_slice %32 {offsets = [0, 128], sizes = [1, 16], strides = [1, 1]} : vector<1x256xf32> to vector<1x16xf32>
    %64 = vector.extract_strided_slice %32 {offsets = [0, 144], sizes = [1, 16], strides = [1, 1]} : vector<1x256xf32> to vector<1x16xf32>
    %65 = vector.extract_strided_slice %32 {offsets = [0, 160], sizes = [1, 16], strides = [1, 1]} : vector<1x256xf32> to vector<1x16xf32>
    %66 = vector.extract_strided_slice %32 {offsets = [0, 176], sizes = [1, 16], strides = [1, 1]} : vector<1x256xf32> to vector<1x16xf32>
    %67 = vector.extract_strided_slice %32 {offsets = [0, 192], sizes = [1, 16], strides = [1, 1]} : vector<1x256xf32> to vector<1x16xf32>
    %68 = vector.extract_strided_slice %32 {offsets = [0, 208], sizes = [1, 16], strides = [1, 1]} : vector<1x256xf32> to vector<1x16xf32>
    %69 = vector.extract_strided_slice %32 {offsets = [0, 224], sizes = [1, 16], strides = [1, 1]} : vector<1x256xf32> to vector<1x16xf32>
    %70 = vector.extract_strided_slice %32 {offsets = [0, 240], sizes = [1, 16], strides = [1, 1]} : vector<1x256xf32> to vector<1x16xf32>
    %71 = tpu.concatenate %55, %56, %57, %58, %59, %60, %61, %62, %63, %64, %65, %66, %67, %68, %69, %70 in 0 : vector<1x16xf32>, vector<1x16xf32>, vector<1x16xf32>, vector<1x16xf32>, vector<1x16xf32>, vector<1x16xf32>, vector<1x16xf32>, vector<1x16xf32>, vector<1x16xf32>, vector<1x16xf32>, vector<1x16xf32>, vector<1x16xf32>, vector<1x16xf32>, vector<1x16xf32>, vector<1x16xf32>, vector<1x16xf32> -> vector<16x16xf32>
    %c1 = arith.constant 1 : index
    %c3_27 = arith.constant 3 : index
    %c3_28 = arith.constant 3 : index
    %72 = vector.load %arg6[%c1, %c3_27, %c3_28] : memref<2x22x22xf32, #tpu.memory_space<vmem>>, vector<1x16x16xf32>
    %73 = vector.shape_cast %72 : vector<1x16x16xf32> to vector<16x16xf32>
    %74 = vector.shape_cast %71 : vector<16x16xf32> to vector<1x16x16xf32>
    tpu.vector_store %arg6[%c1, %c3_27, %c3_28], %74 {strides = array<i32>} : memref<2x22x22xf32, #tpu.memory_space<vmem>>, vector<1x16x16xf32>,
    %cst_29 = arith.constant 0.000000e+00 : f32
    %75 = vector.broadcast %cst_29 : f32 to vector<16x16xf32>
    %c0_30 = arith.constant 0 : index
    %c0_31 = arith.constant 0 : index
    %c0_32 = arith.constant 0 : index
    %76 = vector.load %arg6[%c0_30, %c0_31, %c0_32] : memref<2x22x22xf32, #tpu.memory_space<vmem>>, vector<1x22x22xf32>
    %77 = vector.shape_cast %76 : vector<1x22x22xf32> to vector<22x22xf32>
    %78 = vector.extract_strided_slice %77 {offsets = [0, 0], sizes = [22, 16], strides = [1, 1]} : vector<22x22xf32> to vector<22x16xf32>
    %c0_33 = arith.constant 0 : index
    %79 = memref.load %arg4[%c0_33] : memref<98xf32, #tpu.memory_space<smem>>
    %80 = vector.extract_strided_slice %78 {offsets = [0, 0], sizes = [16, 16], strides = [1, 1]} : vector<22x16xf32> to vector<16x16xf32>
    %81 = vector.broadcast %79 : f32 to vector<16x16xf32>
    %82 = arith.mulf %81, %80 : vector<16x16xf32>
    %83 = arith.addf %75, %82 : vector<16x16xf32>
    %c7 = arith.constant 7 : index
    %84 = memref.load %arg4[%c7] : memref<98xf32, #tpu.memory_space<smem>>
    %85 = vector.extract_strided_slice %78 {offsets = [1, 0], sizes = [16, 16], strides = [1, 1]} : vector<22x16xf32> to vector<16x16xf32>
    %86 = vector.broadcast %84 : f32 to vector<16x16xf32>
    %87 = arith.mulf %86, %85 : vector<16x16xf32>
    %88 = arith.addf %83, %87 : vector<16x16xf32>
    %c14 = arith.constant 14 : index
    %89 = memref.load %arg4[%c14] : memref<98xf32, #tpu.memory_space<smem>>
    %90 = vector.extract_strided_slice %78 {offsets = [2, 0], sizes = [16, 16], strides = [1, 1]} : vector<22x16xf32> to vector<16x16xf32>
    %91 = vector.broadcast %89 : f32 to vector<16x16xf32>
    %92 = arith.mulf %91, %90 : vector<16x16xf32>
    %93 = arith.addf %88, %92 : vector<16x16xf32>
    %c21 = arith.constant 21 : index
    %94 = memref.load %arg4[%c21] : memref<98xf32, #tpu.memory_space<smem>>
    %95 = vector.extract_strided_slice %78 {offsets = [3, 0], sizes = [16, 16], strides = [1, 1]} : vector<22x16xf32> to vector<16x16xf32>
    %96 = vector.broadcast %94 : f32 to vector<16x16xf32>
    %97 = arith.mulf %96, %95 : vector<16x16xf32>
    %98 = arith.addf %93, %97 : vector<16x16xf32>
    %c28 = arith.constant 28 : index
    %99 = memref.load %arg4[%c28] : memref<98xf32, #tpu.memory_space<smem>>
    %100 = vector.extract_strided_slice %78 {offsets = [4, 0], sizes = [16, 16], strides = [1, 1]} : vector<22x16xf32> to vector<16x16xf32>
    %101 = vector.broadcast %99 : f32 to vector<16x16xf32>
    %102 = arith.mulf %101, %100 : vector<16x16xf32>
    %103 = arith.addf %98, %102 : vector<16x16xf32>
    %c35 = arith.constant 35 : index
    %104 = memref.load %arg4[%c35] : memref<98xf32, #tpu.memory_space<smem>>
    %105 = vector.extract_strided_slice %78 {offsets = [5, 0], sizes = [16, 16], strides = [1, 1]} : vector<22x16xf32> to vector<16x16xf32>
    %106 = vector.broadcast %104 : f32 to vector<16x16xf32>
    %107 = arith.mulf %106, %105 : vector<16x16xf32>
    %108 = arith.addf %103, %107 : vector<16x16xf32>
    %c42 = arith.constant 42 : index
    %109 = memref.load %arg4[%c42] : memref<98xf32, #tpu.memory_space<smem>>
    %110 = vector.extract_strided_slice %78 {offsets = [6, 0], sizes = [16, 16], strides = [1, 1]} : vector<22x16xf32> to vector<16x16xf32>
    %111 = vector.broadcast %109 : f32 to vector<16x16xf32>
    %112 = arith.mulf %111, %110 : vector<16x16xf32>
    %113 = arith.addf %108, %112 : vector<16x16xf32>
    %114 = vector.extract_strided_slice %77 {offsets = [0, 1], sizes = [22, 16], strides = [1, 1]} : vector<22x22xf32> to vector<22x16xf32>
    %c1_34 = arith.constant 1 : index
    %115 = memref.load %arg4[%c1_34] : memref<98xf32, #tpu.memory_space<smem>>
    %116 = vector.extract_strided_slice %114 {offsets = [0, 0], sizes = [16, 16], strides = [1, 1]} : vector<22x16xf32> to vector<16x16xf32>
    %117 = vector.broadcast %115 : f32 to vector<16x16xf32>
    %118 = arith.mulf %117, %116 : vector<16x16xf32>
    %119 = arith.addf %113, %118 : vector<16x16xf32>
    %c8 = arith.constant 8 : index
    %120 = memref.load %arg4[%c8] : memref<98xf32, #tpu.memory_space<smem>>
    %121 = vector.extract_strided_slice %114 {offsets = [1, 0], sizes = [16, 16], strides = [1, 1]} : vector<22x16xf32> to vector<16x16xf32>
    %122 = vector.broadcast %120 : f32 to vector<16x16xf32>
    %123 = arith.mulf %122, %121 : vector<16x16xf32>
    %124 = arith.addf %119, %123 : vector<16x16xf32>
    %c15 = arith.constant 15 : index
    %125 = memref.load %arg4[%c15] : memref<98xf32, #tpu.memory_space<smem>>
    %126 = vector.extract_strided_slice %114 {offsets = [2, 0], sizes = [16, 16], strides = [1, 1]} : vector<22x16xf32> to vector<16x16xf32>
    %127 = vector.broadcast %125 : f32 to vector<16x16xf32>
    %128 = arith.mulf %127, %126 : vector<16x16xf32>
    %129 = arith.addf %124, %128 : vector<16x16xf32>
    %c22 = arith.constant 22 : index
    %130 = memref.load %arg4[%c22] : memref<98xf32, #tpu.memory_space<smem>>
    %131 = vector.extract_strided_slice %114 {offsets = [3, 0], sizes = [16, 16], strides = [1, 1]} : vector<22x16xf32> to vector<16x16xf32>
    %132 = vector.broadcast %130 : f32 to vector<16x16xf32>
    %133 = arith.mulf %132, %131 : vector<16x16xf32>
    %134 = arith.addf %129, %133 : vector<16x16xf32>
    %c29 = arith.constant 29 : index
    %135 = memref.load %arg4[%c29] : memref<98xf32, #tpu.memory_space<smem>>
    %136 = vector.extract_strided_slice %114 {offsets = [4, 0], sizes = [16, 16], strides = [1, 1]} : vector<22x16xf32> to vector<16x16xf32>
    %137 = vector.broadcast %135 : f32 to vector<16x16xf32>
    %138 = arith.mulf %137, %136 : vector<16x16xf32>
    %139 = arith.addf %134, %138 : vector<16x16xf32>
    %c36 = arith.constant 36 : index
    %140 = memref.load %arg4[%c36] : memref<98xf32, #tpu.memory_space<smem>>
    %141 = vector.extract_strided_slice %114 {offsets = [5, 0], sizes = [16, 16], strides = [1, 1]} : vector<22x16xf32> to vector<16x16xf32>
    %142 = vector.broadcast %140 : f32 to vector<16x16xf32>
    %143 = arith.mulf %142, %141 : vector<16x16xf32>
    %144 = arith.addf %139, %143 : vector<16x16xf32>
    %c43 = arith.constant 43 : index
    %145 = memref.load %arg4[%c43] : memref<98xf32, #tpu.memory_space<smem>>
    %146 = vector.extract_strided_slice %114 {offsets = [6, 0], sizes = [16, 16], strides = [1, 1]} : vector<22x16xf32> to vector<16x16xf32>
    %147 = vector.broadcast %145 : f32 to vector<16x16xf32>
    %148 = arith.mulf %147, %146 : vector<16x16xf32>
    %149 = arith.addf %144, %148 : vector<16x16xf32>
    %150 = vector.extract_strided_slice %77 {offsets = [0, 2], sizes = [22, 16], strides = [1, 1]} : vector<22x22xf32> to vector<22x16xf32>
    %c2 = arith.constant 2 : index
    %151 = memref.load %arg4[%c2] : memref<98xf32, #tpu.memory_space<smem>>
    %152 = vector.extract_strided_slice %150 {offsets = [0, 0], sizes = [16, 16], strides = [1, 1]} : vector<22x16xf32> to vector<16x16xf32>
    %153 = vector.broadcast %151 : f32 to vector<16x16xf32>
    %154 = arith.mulf %153, %152 : vector<16x16xf32>
    %155 = arith.addf %149, %154 : vector<16x16xf32>
    %c9 = arith.constant 9 : index
    %156 = memref.load %arg4[%c9] : memref<98xf32, #tpu.memory_space<smem>>
    %157 = vector.extract_strided_slice %150 {offsets = [1, 0], sizes = [16, 16], strides = [1, 1]} : vector<22x16xf32> to vector<16x16xf32>
    %158 = vector.broadcast %156 : f32 to vector<16x16xf32>
    %159 = arith.mulf %158, %157 : vector<16x16xf32>
    %160 = arith.addf %155, %159 : vector<16x16xf32>
    %c16 = arith.constant 16 : index
    %161 = memref.load %arg4[%c16] : memref<98xf32, #tpu.memory_space<smem>>
    %162 = vector.extract_strided_slice %150 {offsets = [2, 0], sizes = [16, 16], strides = [1, 1]} : vector<22x16xf32> to vector<16x16xf32>
    %163 = vector.broadcast %161 : f32 to vector<16x16xf32>
    %164 = arith.mulf %163, %162 : vector<16x16xf32>
    %165 = arith.addf %160, %164 : vector<16x16xf32>
    %c23 = arith.constant 23 : index
    %166 = memref.load %arg4[%c23] : memref<98xf32, #tpu.memory_space<smem>>
    %167 = vector.extract_strided_slice %150 {offsets = [3, 0], sizes = [16, 16], strides = [1, 1]} : vector<22x16xf32> to vector<16x16xf32>
    %168 = vector.broadcast %166 : f32 to vector<16x16xf32>
    %169 = arith.mulf %168, %167 : vector<16x16xf32>
    %170 = arith.addf %165, %169 : vector<16x16xf32>
    %c30 = arith.constant 30 : index
    %171 = memref.load %arg4[%c30] : memref<98xf32, #tpu.memory_space<smem>>
    %172 = vector.extract_strided_slice %150 {offsets = [4, 0], sizes = [16, 16], strides = [1, 1]} : vector<22x16xf32> to vector<16x16xf32>
    %173 = vector.broadcast %171 : f32 to vector<16x16xf32>
    %174 = arith.mulf %173, %172 : vector<16x16xf32>
    %175 = arith.addf %170, %174 : vector<16x16xf32>
    %c37 = arith.constant 37 : index
    %176 = memref.load %arg4[%c37] : memref<98xf32, #tpu.memory_space<smem>>
    %177 = vector.extract_strided_slice %150 {offsets = [5, 0], sizes = [16, 16], strides = [1, 1]} : vector<22x16xf32> to vector<16x16xf32>
    %178 = vector.broadcast %176 : f32 to vector<16x16xf32>
    %179 = arith.mulf %178, %177 : vector<16x16xf32>
    %180 = arith.addf %175, %179 : vector<16x16xf32>
    %c44 = arith.constant 44 : index
    %181 = memref.load %arg4[%c44] : memref<98xf32, #tpu.memory_space<smem>>
    %182 = vector.extract_strided_slice %150 {offsets = [6, 0], sizes = [16, 16], strides = [1, 1]} : vector<22x16xf32> to vector<16x16xf32>
    %183 = vector.broadcast %181 : f32 to vector<16x16xf32>
    %184 = arith.mulf %183, %182 : vector<16x16xf32>
    %185 = arith.addf %180, %184 : vector<16x16xf32>
    %186 = vector.extract_strided_slice %77 {offsets = [0, 3], sizes = [22, 16], strides = [1, 1]} : vector<22x22xf32> to vector<22x16xf32>
    %c3_35 = arith.constant 3 : index
    %187 = memref.load %arg4[%c3_35] : memref<98xf32, #tpu.memory_space<smem>>
    %188 = vector.extract_strided_slice %186 {offsets = [0, 0], sizes = [16, 16], strides = [1, 1]} : vector<22x16xf32> to vector<16x16xf32>
    %189 = vector.broadcast %187 : f32 to vector<16x16xf32>
    %190 = arith.mulf %189, %188 : vector<16x16xf32>
    %191 = arith.addf %185, %190 : vector<16x16xf32>
    %c10 = arith.constant 10 : index
    %192 = memref.load %arg4[%c10] : memref<98xf32, #tpu.memory_space<smem>>
    %193 = vector.extract_strided_slice %186 {offsets = [1, 0], sizes = [16, 16], strides = [1, 1]} : vector<22x16xf32> to vector<16x16xf32>
    %194 = vector.broadcast %192 : f32 to vector<16x16xf32>
    %195 = arith.mulf %194, %193 : vector<16x16xf32>
    %196 = arith.addf %191, %195 : vector<16x16xf32>
    %c17 = arith.constant 17 : index
    %197 = memref.load %arg4[%c17] : memref<98xf32, #tpu.memory_space<smem>>
    %198 = vector.extract_strided_slice %186 {offsets = [2, 0], sizes = [16, 16], strides = [1, 1]} : vector<22x16xf32> to vector<16x16xf32>
    %199 = vector.broadcast %197 : f32 to vector<16x16xf32>
    %200 = arith.mulf %199, %198 : vector<16x16xf32>
    %201 = arith.addf %196, %200 : vector<16x16xf32>
    %c24 = arith.constant 24 : index
    %202 = memref.load %arg4[%c24] : memref<98xf32, #tpu.memory_space<smem>>
    %203 = vector.extract_strided_slice %186 {offsets = [3, 0], sizes = [16, 16], strides = [1, 1]} : vector<22x16xf32> to vector<16x16xf32>
    %204 = vector.broadcast %202 : f32 to vector<16x16xf32>
    %205 = arith.mulf %204, %203 : vector<16x16xf32>
    %206 = arith.addf %201, %205 : vector<16x16xf32>
    %c31 = arith.constant 31 : index
    %207 = memref.load %arg4[%c31] : memref<98xf32, #tpu.memory_space<smem>>
    %208 = vector.extract_strided_slice %186 {offsets = [4, 0], sizes = [16, 16], strides = [1, 1]} : vector<22x16xf32> to vector<16x16xf32>
    %209 = vector.broadcast %207 : f32 to vector<16x16xf32>
    %210 = arith.mulf %209, %208 : vector<16x16xf32>
    %211 = arith.addf %206, %210 : vector<16x16xf32>
    %c38 = arith.constant 38 : index
    %212 = memref.load %arg4[%c38] : memref<98xf32, #tpu.memory_space<smem>>
    %213 = vector.extract_strided_slice %186 {offsets = [5, 0], sizes = [16, 16], strides = [1, 1]} : vector<22x16xf32> to vector<16x16xf32>
    %214 = vector.broadcast %212 : f32 to vector<16x16xf32>
    %215 = arith.mulf %214, %213 : vector<16x16xf32>
    %216 = arith.addf %211, %215 : vector<16x16xf32>
    %c45 = arith.constant 45 : index
    %217 = memref.load %arg4[%c45] : memref<98xf32, #tpu.memory_space<smem>>
    %218 = vector.extract_strided_slice %186 {offsets = [6, 0], sizes = [16, 16], strides = [1, 1]} : vector<22x16xf32> to vector<16x16xf32>
    %219 = vector.broadcast %217 : f32 to vector<16x16xf32>
    %220 = arith.mulf %219, %218 : vector<16x16xf32>
    %221 = arith.addf %216, %220 : vector<16x16xf32>
    %222 = vector.extract_strided_slice %77 {offsets = [0, 4], sizes = [22, 16], strides = [1, 1]} : vector<22x22xf32> to vector<22x16xf32>
    %c4 = arith.constant 4 : index
    %223 = memref.load %arg4[%c4] : memref<98xf32, #tpu.memory_space<smem>>
    %224 = vector.extract_strided_slice %222 {offsets = [0, 0], sizes = [16, 16], strides = [1, 1]} : vector<22x16xf32> to vector<16x16xf32>
    %225 = vector.broadcast %223 : f32 to vector<16x16xf32>
    %226 = arith.mulf %225, %224 : vector<16x16xf32>
    %227 = arith.addf %221, %226 : vector<16x16xf32>
    %c11 = arith.constant 11 : index
    %228 = memref.load %arg4[%c11] : memref<98xf32, #tpu.memory_space<smem>>
    %229 = vector.extract_strided_slice %222 {offsets = [1, 0], sizes = [16, 16], strides = [1, 1]} : vector<22x16xf32> to vector<16x16xf32>
    %230 = vector.broadcast %228 : f32 to vector<16x16xf32>
    %231 = arith.mulf %230, %229 : vector<16x16xf32>
    %232 = arith.addf %227, %231 : vector<16x16xf32>
    %c18 = arith.constant 18 : index
    %233 = memref.load %arg4[%c18] : memref<98xf32, #tpu.memory_space<smem>>
    %234 = vector.extract_strided_slice %222 {offsets = [2, 0], sizes = [16, 16], strides = [1, 1]} : vector<22x16xf32> to vector<16x16xf32>
    %235 = vector.broadcast %233 : f32 to vector<16x16xf32>
    %236 = arith.mulf %235, %234 : vector<16x16xf32>
    %237 = arith.addf %232, %236 : vector<16x16xf32>
    %c25 = arith.constant 25 : index
    %238 = memref.load %arg4[%c25] : memref<98xf32, #tpu.memory_space<smem>>
    %239 = vector.extract_strided_slice %222 {offsets = [3, 0], sizes = [16, 16], strides = [1, 1]} : vector<22x16xf32> to vector<16x16xf32>
    %240 = vector.broadcast %238 : f32 to vector<16x16xf32>
    %241 = arith.mulf %240, %239 : vector<16x16xf32>
    %242 = arith.addf %237, %241 : vector<16x16xf32>
    %c32 = arith.constant 32 : index
    %243 = memref.load %arg4[%c32] : memref<98xf32, #tpu.memory_space<smem>>
    %244 = vector.extract_strided_slice %222 {offsets = [4, 0], sizes = [16, 16], strides = [1, 1]} : vector<22x16xf32> to vector<16x16xf32>
    %245 = vector.broadcast %243 : f32 to vector<16x16xf32>
    %246 = arith.mulf %245, %244 : vector<16x16xf32>
    %247 = arith.addf %242, %246 : vector<16x16xf32>
    %c39 = arith.constant 39 : index
    %248 = memref.load %arg4[%c39] : memref<98xf32, #tpu.memory_space<smem>>
    %249 = vector.extract_strided_slice %222 {offsets = [5, 0], sizes = [16, 16], strides = [1, 1]} : vector<22x16xf32> to vector<16x16xf32>
    %250 = vector.broadcast %248 : f32 to vector<16x16xf32>
    %251 = arith.mulf %250, %249 : vector<16x16xf32>
    %252 = arith.addf %247, %251 : vector<16x16xf32>
    %c46 = arith.constant 46 : index
    %253 = memref.load %arg4[%c46] : memref<98xf32, #tpu.memory_space<smem>>
    %254 = vector.extract_strided_slice %222 {offsets = [6, 0], sizes = [16, 16], strides = [1, 1]} : vector<22x16xf32> to vector<16x16xf32>
    %255 = vector.broadcast %253 : f32 to vector<16x16xf32>
    %256 = arith.mulf %255, %254 : vector<16x16xf32>
    %257 = arith.addf %252, %256 : vector<16x16xf32>
    %258 = vector.extract_strided_slice %77 {offsets = [0, 5], sizes = [22, 16], strides = [1, 1]} : vector<22x22xf32> to vector<22x16xf32>
    %c5 = arith.constant 5 : index
    %259 = memref.load %arg4[%c5] : memref<98xf32, #tpu.memory_space<smem>>
    %260 = vector.extract_strided_slice %258 {offsets = [0, 0], sizes = [16, 16], strides = [1, 1]} : vector<22x16xf32> to vector<16x16xf32>
    %261 = vector.broadcast %259 : f32 to vector<16x16xf32>
    %262 = arith.mulf %261, %260 : vector<16x16xf32>
    %263 = arith.addf %257, %262 : vector<16x16xf32>
    %c12 = arith.constant 12 : index
    %264 = memref.load %arg4[%c12] : memref<98xf32, #tpu.memory_space<smem>>
    %265 = vector.extract_strided_slice %258 {offsets = [1, 0], sizes = [16, 16], strides = [1, 1]} : vector<22x16xf32> to vector<16x16xf32>
    %266 = vector.broadcast %264 : f32 to vector<16x16xf32>
    %267 = arith.mulf %266, %265 : vector<16x16xf32>
    %268 = arith.addf %263, %267 : vector<16x16xf32>
    %c19 = arith.constant 19 : index
    %269 = memref.load %arg4[%c19] : memref<98xf32, #tpu.memory_space<smem>>
    %270 = vector.extract_strided_slice %258 {offsets = [2, 0], sizes = [16, 16], strides = [1, 1]} : vector<22x16xf32> to vector<16x16xf32>
    %271 = vector.broadcast %269 : f32 to vector<16x16xf32>
    %272 = arith.mulf %271, %270 : vector<16x16xf32>
    %273 = arith.addf %268, %272 : vector<16x16xf32>
    %c26 = arith.constant 26 : index
    %274 = memref.load %arg4[%c26] : memref<98xf32, #tpu.memory_space<smem>>
    %275 = vector.extract_strided_slice %258 {offsets = [3, 0], sizes = [16, 16], strides = [1, 1]} : vector<22x16xf32> to vector<16x16xf32>
    %276 = vector.broadcast %274 : f32 to vector<16x16xf32>
    %277 = arith.mulf %276, %275 : vector<16x16xf32>
    %278 = arith.addf %273, %277 : vector<16x16xf32>
    %c33 = arith.constant 33 : index
    %279 = memref.load %arg4[%c33] : memref<98xf32, #tpu.memory_space<smem>>
    %280 = vector.extract_strided_slice %258 {offsets = [4, 0], sizes = [16, 16], strides = [1, 1]} : vector<22x16xf32> to vector<16x16xf32>
    %281 = vector.broadcast %279 : f32 to vector<16x16xf32>
    %282 = arith.mulf %281, %280 : vector<16x16xf32>
    %283 = arith.addf %278, %282 : vector<16x16xf32>
    %c40 = arith.constant 40 : index
    %284 = memref.load %arg4[%c40] : memref<98xf32, #tpu.memory_space<smem>>
    %285 = vector.extract_strided_slice %258 {offsets = [5, 0], sizes = [16, 16], strides = [1, 1]} : vector<22x16xf32> to vector<16x16xf32>
    %286 = vector.broadcast %284 : f32 to vector<16x16xf32>
    %287 = arith.mulf %286, %285 : vector<16x16xf32>
    %288 = arith.addf %283, %287 : vector<16x16xf32>
    %c47 = arith.constant 47 : index
    %289 = memref.load %arg4[%c47] : memref<98xf32, #tpu.memory_space<smem>>
    %290 = vector.extract_strided_slice %258 {offsets = [6, 0], sizes = [16, 16], strides = [1, 1]} : vector<22x16xf32> to vector<16x16xf32>
    %291 = vector.broadcast %289 : f32 to vector<16x16xf32>
    %292 = arith.mulf %291, %290 : vector<16x16xf32>
    %293 = arith.addf %288, %292 : vector<16x16xf32>
    %294 = vector.extract_strided_slice %77 {offsets = [0, 6], sizes = [22, 16], strides = [1, 1]} : vector<22x22xf32> to vector<22x16xf32>
    %c6 = arith.constant 6 : index
    %295 = memref.load %arg4[%c6] : memref<98xf32, #tpu.memory_space<smem>>
    %296 = vector.extract_strided_slice %294 {offsets = [0, 0], sizes = [16, 16], strides = [1, 1]} : vector<22x16xf32> to vector<16x16xf32>
    %297 = vector.broadcast %295 : f32 to vector<16x16xf32>
    %298 = arith.mulf %297, %296 : vector<16x16xf32>
    %299 = arith.addf %293, %298 : vector<16x16xf32>
    %c13 = arith.constant 13 : index
    %300 = memref.load %arg4[%c13] : memref<98xf32, #tpu.memory_space<smem>>
    %301 = vector.extract_strided_slice %294 {offsets = [1, 0], sizes = [16, 16], strides = [1, 1]} : vector<22x16xf32> to vector<16x16xf32>
    %302 = vector.broadcast %300 : f32 to vector<16x16xf32>
    %303 = arith.mulf %302, %301 : vector<16x16xf32>
    %304 = arith.addf %299, %303 : vector<16x16xf32>
    %c20 = arith.constant 20 : index
    %305 = memref.load %arg4[%c20] : memref<98xf32, #tpu.memory_space<smem>>
    %306 = vector.extract_strided_slice %294 {offsets = [2, 0], sizes = [16, 16], strides = [1, 1]} : vector<22x16xf32> to vector<16x16xf32>
    %307 = vector.broadcast %305 : f32 to vector<16x16xf32>
    %308 = arith.mulf %307, %306 : vector<16x16xf32>
    %309 = arith.addf %304, %308 : vector<16x16xf32>
    %c27 = arith.constant 27 : index
    %310 = memref.load %arg4[%c27] : memref<98xf32, #tpu.memory_space<smem>>
    %311 = vector.extract_strided_slice %294 {offsets = [3, 0], sizes = [16, 16], strides = [1, 1]} : vector<22x16xf32> to vector<16x16xf32>
    %312 = vector.broadcast %310 : f32 to vector<16x16xf32>
    %313 = arith.mulf %312, %311 : vector<16x16xf32>
    %314 = arith.addf %309, %313 : vector<16x16xf32>
    %c34 = arith.constant 34 : index
    %315 = memref.load %arg4[%c34] : memref<98xf32, #tpu.memory_space<smem>>
    %316 = vector.extract_strided_slice %294 {offsets = [4, 0], sizes = [16, 16], strides = [1, 1]} : vector<22x16xf32> to vector<16x16xf32>
    %317 = vector.broadcast %315 : f32 to vector<16x16xf32>
    %318 = arith.mulf %317, %316 : vector<16x16xf32>
    %319 = arith.addf %314, %318 : vector<16x16xf32>
    %c41 = arith.constant 41 : index
    %320 = memref.load %arg4[%c41] : memref<98xf32, #tpu.memory_space<smem>>
    %321 = vector.extract_strided_slice %294 {offsets = [5, 0], sizes = [16, 16], strides = [1, 1]} : vector<22x16xf32> to vector<16x16xf32>
    %322 = vector.broadcast %320 : f32 to vector<16x16xf32>
    %323 = arith.mulf %322, %321 : vector<16x16xf32>
    %324 = arith.addf %319, %323 : vector<16x16xf32>
    %c48 = arith.constant 48 : index
    %325 = memref.load %arg4[%c48] : memref<98xf32, #tpu.memory_space<smem>>
    %326 = vector.extract_strided_slice %294 {offsets = [6, 0], sizes = [16, 16], strides = [1, 1]} : vector<22x16xf32> to vector<16x16xf32>
    %327 = vector.broadcast %325 : f32 to vector<16x16xf32>
    %328 = arith.mulf %327, %326 : vector<16x16xf32>
    %329 = arith.addf %324, %328 : vector<16x16xf32>
    %c1_36 = arith.constant 1 : index
    %c0_37 = arith.constant 0 : index
    %c0_38 = arith.constant 0 : index
    %330 = vector.load %arg6[%c1_36, %c0_37, %c0_38] : memref<2x22x22xf32, #tpu.memory_space<vmem>>, vector<1x22x22xf32>
    %331 = vector.shape_cast %330 : vector<1x22x22xf32> to vector<22x22xf32>
    %332 = vector.extract_strided_slice %331 {offsets = [0, 0], sizes = [22, 16], strides = [1, 1]} : vector<22x22xf32> to vector<22x16xf32>
    %c49 = arith.constant 49 : index
    %333 = memref.load %arg4[%c49] : memref<98xf32, #tpu.memory_space<smem>>
    %334 = vector.extract_strided_slice %332 {offsets = [0, 0], sizes = [16, 16], strides = [1, 1]} : vector<22x16xf32> to vector<16x16xf32>
    %335 = vector.broadcast %333 : f32 to vector<16x16xf32>
    %336 = arith.mulf %335, %334 : vector<16x16xf32>
    %337 = arith.addf %329, %336 : vector<16x16xf32>
    %c56 = arith.constant 56 : index
    %338 = memref.load %arg4[%c56] : memref<98xf32, #tpu.memory_space<smem>>
    %339 = vector.extract_strided_slice %332 {offsets = [1, 0], sizes = [16, 16], strides = [1, 1]} : vector<22x16xf32> to vector<16x16xf32>
    %340 = vector.broadcast %338 : f32 to vector<16x16xf32>
    %341 = arith.mulf %340, %339 : vector<16x16xf32>
    %342 = arith.addf %337, %341 : vector<16x16xf32>
    %c63 = arith.constant 63 : index
    %343 = memref.load %arg4[%c63] : memref<98xf32, #tpu.memory_space<smem>>
    %344 = vector.extract_strided_slice %332 {offsets = [2, 0], sizes = [16, 16], strides = [1, 1]} : vector<22x16xf32> to vector<16x16xf32>
    %345 = vector.broadcast %343 : f32 to vector<16x16xf32>
    %346 = arith.mulf %345, %344 : vector<16x16xf32>
    %347 = arith.addf %342, %346 : vector<16x16xf32>
    %c70 = arith.constant 70 : index
    %348 = memref.load %arg4[%c70] : memref<98xf32, #tpu.memory_space<smem>>
    %349 = vector.extract_strided_slice %332 {offsets = [3, 0], sizes = [16, 16], strides = [1, 1]} : vector<22x16xf32> to vector<16x16xf32>
    %350 = vector.broadcast %348 : f32 to vector<16x16xf32>
    %351 = arith.mulf %350, %349 : vector<16x16xf32>
    %352 = arith.addf %347, %351 : vector<16x16xf32>
    %c77 = arith.constant 77 : index
    %353 = memref.load %arg4[%c77] : memref<98xf32, #tpu.memory_space<smem>>
    %354 = vector.extract_strided_slice %332 {offsets = [4, 0], sizes = [16, 16], strides = [1, 1]} : vector<22x16xf32> to vector<16x16xf32>
    %355 = vector.broadcast %353 : f32 to vector<16x16xf32>
    %356 = arith.mulf %355, %354 : vector<16x16xf32>
    %357 = arith.addf %352, %356 : vector<16x16xf32>
    %c84 = arith.constant 84 : index
    %358 = memref.load %arg4[%c84] : memref<98xf32, #tpu.memory_space<smem>>
    %359 = vector.extract_strided_slice %332 {offsets = [5, 0], sizes = [16, 16], strides = [1, 1]} : vector<22x16xf32> to vector<16x16xf32>
    %360 = vector.broadcast %358 : f32 to vector<16x16xf32>
    %361 = arith.mulf %360, %359 : vector<16x16xf32>
    %362 = arith.addf %357, %361 : vector<16x16xf32>
    %c91 = arith.constant 91 : index
    %363 = memref.load %arg4[%c91] : memref<98xf32, #tpu.memory_space<smem>>
    %364 = vector.extract_strided_slice %332 {offsets = [6, 0], sizes = [16, 16], strides = [1, 1]} : vector<22x16xf32> to vector<16x16xf32>
    %365 = vector.broadcast %363 : f32 to vector<16x16xf32>
    %366 = arith.mulf %365, %364 : vector<16x16xf32>
    %367 = arith.addf %362, %366 : vector<16x16xf32>
    %368 = vector.extract_strided_slice %331 {offsets = [0, 1], sizes = [22, 16], strides = [1, 1]} : vector<22x22xf32> to vector<22x16xf32>
    %c50 = arith.constant 50 : index
    %369 = memref.load %arg4[%c50] : memref<98xf32, #tpu.memory_space<smem>>
    %370 = vector.extract_strided_slice %368 {offsets = [0, 0], sizes = [16, 16], strides = [1, 1]} : vector<22x16xf32> to vector<16x16xf32>
    %371 = vector.broadcast %369 : f32 to vector<16x16xf32>
    %372 = arith.mulf %371, %370 : vector<16x16xf32>
    %373 = arith.addf %367, %372 : vector<16x16xf32>
    %c57 = arith.constant 57 : index
    %374 = memref.load %arg4[%c57] : memref<98xf32, #tpu.memory_space<smem>>
    %375 = vector.extract_strided_slice %368 {offsets = [1, 0], sizes = [16, 16], strides = [1, 1]} : vector<22x16xf32> to vector<16x16xf32>
    %376 = vector.broadcast %374 : f32 to vector<16x16xf32>
    %377 = arith.mulf %376, %375 : vector<16x16xf32>
    %378 = arith.addf %373, %377 : vector<16x16xf32>
    %c64 = arith.constant 64 : index
    %379 = memref.load %arg4[%c64] : memref<98xf32, #tpu.memory_space<smem>>
    %380 = vector.extract_strided_slice %368 {offsets = [2, 0], sizes = [16, 16], strides = [1, 1]} : vector<22x16xf32> to vector<16x16xf32>
    %381 = vector.broadcast %379 : f32 to vector<16x16xf32>
    %382 = arith.mulf %381, %380 : vector<16x16xf32>
    %383 = arith.addf %378, %382 : vector<16x16xf32>
    %c71 = arith.constant 71 : index
    %384 = memref.load %arg4[%c71] : memref<98xf32, #tpu.memory_space<smem>>
    %385 = vector.extract_strided_slice %368 {offsets = [3, 0], sizes = [16, 16], strides = [1, 1]} : vector<22x16xf32> to vector<16x16xf32>
    %386 = vector.broadcast %384 : f32 to vector<16x16xf32>
    %387 = arith.mulf %386, %385 : vector<16x16xf32>
    %388 = arith.addf %383, %387 : vector<16x16xf32>
    %c78 = arith.constant 78 : index
    %389 = memref.load %arg4[%c78] : memref<98xf32, #tpu.memory_space<smem>>
    %390 = vector.extract_strided_slice %368 {offsets = [4, 0], sizes = [16, 16], strides = [1, 1]} : vector<22x16xf32> to vector<16x16xf32>
    %391 = vector.broadcast %389 : f32 to vector<16x16xf32>
    %392 = arith.mulf %391, %390 : vector<16x16xf32>
    %393 = arith.addf %388, %392 : vector<16x16xf32>
    %c85 = arith.constant 85 : index
    %394 = memref.load %arg4[%c85] : memref<98xf32, #tpu.memory_space<smem>>
    %395 = vector.extract_strided_slice %368 {offsets = [5, 0], sizes = [16, 16], strides = [1, 1]} : vector<22x16xf32> to vector<16x16xf32>
    %396 = vector.broadcast %394 : f32 to vector<16x16xf32>
    %397 = arith.mulf %396, %395 : vector<16x16xf32>
    %398 = arith.addf %393, %397 : vector<16x16xf32>
    %c92 = arith.constant 92 : index
    %399 = memref.load %arg4[%c92] : memref<98xf32, #tpu.memory_space<smem>>
    %400 = vector.extract_strided_slice %368 {offsets = [6, 0], sizes = [16, 16], strides = [1, 1]} : vector<22x16xf32> to vector<16x16xf32>
    %401 = vector.broadcast %399 : f32 to vector<16x16xf32>
    %402 = arith.mulf %401, %400 : vector<16x16xf32>
    %403 = arith.addf %398, %402 : vector<16x16xf32>
    %404 = vector.extract_strided_slice %331 {offsets = [0, 2], sizes = [22, 16], strides = [1, 1]} : vector<22x22xf32> to vector<22x16xf32>
    %c51 = arith.constant 51 : index
    %405 = memref.load %arg4[%c51] : memref<98xf32, #tpu.memory_space<smem>>
    %406 = vector.extract_strided_slice %404 {offsets = [0, 0], sizes = [16, 16], strides = [1, 1]} : vector<22x16xf32> to vector<16x16xf32>
    %407 = vector.broadcast %405 : f32 to vector<16x16xf32>
    %408 = arith.mulf %407, %406 : vector<16x16xf32>
    %409 = arith.addf %403, %408 : vector<16x16xf32>
    %c58 = arith.constant 58 : index
    %410 = memref.load %arg4[%c58] : memref<98xf32, #tpu.memory_space<smem>>
    %411 = vector.extract_strided_slice %404 {offsets = [1, 0], sizes = [16, 16], strides = [1, 1]} : vector<22x16xf32> to vector<16x16xf32>
    %412 = vector.broadcast %410 : f32 to vector<16x16xf32>
    %413 = arith.mulf %412, %411 : vector<16x16xf32>
    %414 = arith.addf %409, %413 : vector<16x16xf32>
    %c65 = arith.constant 65 : index
    %415 = memref.load %arg4[%c65] : memref<98xf32, #tpu.memory_space<smem>>
    %416 = vector.extract_strided_slice %404 {offsets = [2, 0], sizes = [16, 16], strides = [1, 1]} : vector<22x16xf32> to vector<16x16xf32>
    %417 = vector.broadcast %415 : f32 to vector<16x16xf32>
    %418 = arith.mulf %417, %416 : vector<16x16xf32>
    %419 = arith.addf %414, %418 : vector<16x16xf32>
    %c72 = arith.constant 72 : index
    %420 = memref.load %arg4[%c72] : memref<98xf32, #tpu.memory_space<smem>>
    %421 = vector.extract_strided_slice %404 {offsets = [3, 0], sizes = [16, 16], strides = [1, 1]} : vector<22x16xf32> to vector<16x16xf32>
    %422 = vector.broadcast %420 : f32 to vector<16x16xf32>
    %423 = arith.mulf %422, %421 : vector<16x16xf32>
    %424 = arith.addf %419, %423 : vector<16x16xf32>
    %c79 = arith.constant 79 : index
    %425 = memref.load %arg4[%c79] : memref<98xf32, #tpu.memory_space<smem>>
    %426 = vector.extract_strided_slice %404 {offsets = [4, 0], sizes = [16, 16], strides = [1, 1]} : vector<22x16xf32> to vector<16x16xf32>
    %427 = vector.broadcast %425 : f32 to vector<16x16xf32>
    %428 = arith.mulf %427, %426 : vector<16x16xf32>
    %429 = arith.addf %424, %428 : vector<16x16xf32>
    %c86 = arith.constant 86 : index
    %430 = memref.load %arg4[%c86] : memref<98xf32, #tpu.memory_space<smem>>
    %431 = vector.extract_strided_slice %404 {offsets = [5, 0], sizes = [16, 16], strides = [1, 1]} : vector<22x16xf32> to vector<16x16xf32>
    %432 = vector.broadcast %430 : f32 to vector<16x16xf32>
    %433 = arith.mulf %432, %431 : vector<16x16xf32>
    %434 = arith.addf %429, %433 : vector<16x16xf32>
    %c93 = arith.constant 93 : index
    %435 = memref.load %arg4[%c93] : memref<98xf32, #tpu.memory_space<smem>>
    %436 = vector.extract_strided_slice %404 {offsets = [6, 0], sizes = [16, 16], strides = [1, 1]} : vector<22x16xf32> to vector<16x16xf32>
    %437 = vector.broadcast %435 : f32 to vector<16x16xf32>
    %438 = arith.mulf %437, %436 : vector<16x16xf32>
    %439 = arith.addf %434, %438 : vector<16x16xf32>
    %440 = vector.extract_strided_slice %331 {offsets = [0, 3], sizes = [22, 16], strides = [1, 1]} : vector<22x22xf32> to vector<22x16xf32>
    %c52 = arith.constant 52 : index
    %441 = memref.load %arg4[%c52] : memref<98xf32, #tpu.memory_space<smem>>
    %442 = vector.extract_strided_slice %440 {offsets = [0, 0], sizes = [16, 16], strides = [1, 1]} : vector<22x16xf32> to vector<16x16xf32>
    %443 = vector.broadcast %441 : f32 to vector<16x16xf32>
    %444 = arith.mulf %443, %442 : vector<16x16xf32>
    %445 = arith.addf %439, %444 : vector<16x16xf32>
    %c59 = arith.constant 59 : index
    %446 = memref.load %arg4[%c59] : memref<98xf32, #tpu.memory_space<smem>>
    %447 = vector.extract_strided_slice %440 {offsets = [1, 0], sizes = [16, 16], strides = [1, 1]} : vector<22x16xf32> to vector<16x16xf32>
    %448 = vector.broadcast %446 : f32 to vector<16x16xf32>
    %449 = arith.mulf %448, %447 : vector<16x16xf32>
    %450 = arith.addf %445, %449 : vector<16x16xf32>
    %c66 = arith.constant 66 : index
    %451 = memref.load %arg4[%c66] : memref<98xf32, #tpu.memory_space<smem>>
    %452 = vector.extract_strided_slice %440 {offsets = [2, 0], sizes = [16, 16], strides = [1, 1]} : vector<22x16xf32> to vector<16x16xf32>
    %453 = vector.broadcast %451 : f32 to vector<16x16xf32>
    %454 = arith.mulf %453, %452 : vector<16x16xf32>
    %455 = arith.addf %450, %454 : vector<16x16xf32>
    %c73 = arith.constant 73 : index
    %456 = memref.load %arg4[%c73] : memref<98xf32, #tpu.memory_space<smem>>
    %457 = vector.extract_strided_slice %440 {offsets = [3, 0], sizes = [16, 16], strides = [1, 1]} : vector<22x16xf32> to vector<16x16xf32>
    %458 = vector.broadcast %456 : f32 to vector<16x16xf32>
    %459 = arith.mulf %458, %457 : vector<16x16xf32>
    %460 = arith.addf %455, %459 : vector<16x16xf32>
    %c80 = arith.constant 80 : index
    %461 = memref.load %arg4[%c80] : memref<98xf32, #tpu.memory_space<smem>>
    %462 = vector.extract_strided_slice %440 {offsets = [4, 0], sizes = [16, 16], strides = [1, 1]} : vector<22x16xf32> to vector<16x16xf32>
    %463 = vector.broadcast %461 : f32 to vector<16x16xf32>
    %464 = arith.mulf %463, %462 : vector<16x16xf32>
    %465 = arith.addf %460, %464 : vector<16x16xf32>
    %c87 = arith.constant 87 : index
    %466 = memref.load %arg4[%c87] : memref<98xf32, #tpu.memory_space<smem>>
    %467 = vector.extract_strided_slice %440 {offsets = [5, 0], sizes = [16, 16], strides = [1, 1]} : vector<22x16xf32> to vector<16x16xf32>
    %468 = vector.broadcast %466 : f32 to vector<16x16xf32>
    %469 = arith.mulf %468, %467 : vector<16x16xf32>
    %470 = arith.addf %465, %469 : vector<16x16xf32>
    %c94 = arith.constant 94 : index
    %471 = memref.load %arg4[%c94] : memref<98xf32, #tpu.memory_space<smem>>
    %472 = vector.extract_strided_slice %440 {offsets = [6, 0], sizes = [16, 16], strides = [1, 1]} : vector<22x16xf32> to vector<16x16xf32>
    %473 = vector.broadcast %471 : f32 to vector<16x16xf32>
    %474 = arith.mulf %473, %472 : vector<16x16xf32>
    %475 = arith.addf %470, %474 : vector<16x16xf32>
    %476 = vector.extract_strided_slice %331 {offsets = [0, 4], sizes = [22, 16], strides = [1, 1]} : vector<22x22xf32> to vector<22x16xf32>
    %c53 = arith.constant 53 : index
    %477 = memref.load %arg4[%c53] : memref<98xf32, #tpu.memory_space<smem>>
    %478 = vector.extract_strided_slice %476 {offsets = [0, 0], sizes = [16, 16], strides = [1, 1]} : vector<22x16xf32> to vector<16x16xf32>
    %479 = vector.broadcast %477 : f32 to vector<16x16xf32>
    %480 = arith.mulf %479, %478 : vector<16x16xf32>
    %481 = arith.addf %475, %480 : vector<16x16xf32>
    %c60 = arith.constant 60 : index
    %482 = memref.load %arg4[%c60] : memref<98xf32, #tpu.memory_space<smem>>
    %483 = vector.extract_strided_slice %476 {offsets = [1, 0], sizes = [16, 16], strides = [1, 1]} : vector<22x16xf32> to vector<16x16xf32>
    %484 = vector.broadcast %482 : f32 to vector<16x16xf32>
    %485 = arith.mulf %484, %483 : vector<16x16xf32>
    %486 = arith.addf %481, %485 : vector<16x16xf32>
    %c67 = arith.constant 67 : index
    %487 = memref.load %arg4[%c67] : memref<98xf32, #tpu.memory_space<smem>>
    %488 = vector.extract_strided_slice %476 {offsets = [2, 0], sizes = [16, 16], strides = [1, 1]} : vector<22x16xf32> to vector<16x16xf32>
    %489 = vector.broadcast %487 : f32 to vector<16x16xf32>
    %490 = arith.mulf %489, %488 : vector<16x16xf32>
    %491 = arith.addf %486, %490 : vector<16x16xf32>
    %c74 = arith.constant 74 : index
    %492 = memref.load %arg4[%c74] : memref<98xf32, #tpu.memory_space<smem>>
    %493 = vector.extract_strided_slice %476 {offsets = [3, 0], sizes = [16, 16], strides = [1, 1]} : vector<22x16xf32> to vector<16x16xf32>
    %494 = vector.broadcast %492 : f32 to vector<16x16xf32>
    %495 = arith.mulf %494, %493 : vector<16x16xf32>
    %496 = arith.addf %491, %495 : vector<16x16xf32>
    %c81 = arith.constant 81 : index
    %497 = memref.load %arg4[%c81] : memref<98xf32, #tpu.memory_space<smem>>
    %498 = vector.extract_strided_slice %476 {offsets = [4, 0], sizes = [16, 16], strides = [1, 1]} : vector<22x16xf32> to vector<16x16xf32>
    %499 = vector.broadcast %497 : f32 to vector<16x16xf32>
    %500 = arith.mulf %499, %498 : vector<16x16xf32>
    %501 = arith.addf %496, %500 : vector<16x16xf32>
    %c88 = arith.constant 88 : index
    %502 = memref.load %arg4[%c88] : memref<98xf32, #tpu.memory_space<smem>>
    %503 = vector.extract_strided_slice %476 {offsets = [5, 0], sizes = [16, 16], strides = [1, 1]} : vector<22x16xf32> to vector<16x16xf32>
    %504 = vector.broadcast %502 : f32 to vector<16x16xf32>
    %505 = arith.mulf %504, %503 : vector<16x16xf32>
    %506 = arith.addf %501, %505 : vector<16x16xf32>
    %c95 = arith.constant 95 : index
    %507 = memref.load %arg4[%c95] : memref<98xf32, #tpu.memory_space<smem>>
    %508 = vector.extract_strided_slice %476 {offsets = [6, 0], sizes = [16, 16], strides = [1, 1]} : vector<22x16xf32> to vector<16x16xf32>
    %509 = vector.broadcast %507 : f32 to vector<16x16xf32>
    %510 = arith.mulf %509, %508 : vector<16x16xf32>
    %511 = arith.addf %506, %510 : vector<16x16xf32>
    %512 = vector.extract_strided_slice %331 {offsets = [0, 5], sizes = [22, 16], strides = [1, 1]} : vector<22x22xf32> to vector<22x16xf32>
    %c54 = arith.constant 54 : index
    %513 = memref.load %arg4[%c54] : memref<98xf32, #tpu.memory_space<smem>>
    %514 = vector.extract_strided_slice %512 {offsets = [0, 0], sizes = [16, 16], strides = [1, 1]} : vector<22x16xf32> to vector<16x16xf32>
    %515 = vector.broadcast %513 : f32 to vector<16x16xf32>
    %516 = arith.mulf %515, %514 : vector<16x16xf32>
    %517 = arith.addf %511, %516 : vector<16x16xf32>
    %c61 = arith.constant 61 : index
    %518 = memref.load %arg4[%c61] : memref<98xf32, #tpu.memory_space<smem>>
    %519 = vector.extract_strided_slice %512 {offsets = [1, 0], sizes = [16, 16], strides = [1, 1]} : vector<22x16xf32> to vector<16x16xf32>
    %520 = vector.broadcast %518 : f32 to vector<16x16xf32>
    %521 = arith.mulf %520, %519 : vector<16x16xf32>
    %522 = arith.addf %517, %521 : vector<16x16xf32>
    %c68 = arith.constant 68 : index
    %523 = memref.load %arg4[%c68] : memref<98xf32, #tpu.memory_space<smem>>
    %524 = vector.extract_strided_slice %512 {offsets = [2, 0], sizes = [16, 16], strides = [1, 1]} : vector<22x16xf32> to vector<16x16xf32>
    %525 = vector.broadcast %523 : f32 to vector<16x16xf32>
    %526 = arith.mulf %525, %524 : vector<16x16xf32>
    %527 = arith.addf %522, %526 : vector<16x16xf32>
    %c75 = arith.constant 75 : index
    %528 = memref.load %arg4[%c75] : memref<98xf32, #tpu.memory_space<smem>>
    %529 = vector.extract_strided_slice %512 {offsets = [3, 0], sizes = [16, 16], strides = [1, 1]} : vector<22x16xf32> to vector<16x16xf32>
    %530 = vector.broadcast %528 : f32 to vector<16x16xf32>
    %531 = arith.mulf %530, %529 : vector<16x16xf32>
    %532 = arith.addf %527, %531 : vector<16x16xf32>
    %c82 = arith.constant 82 : index
    %533 = memref.load %arg4[%c82] : memref<98xf32, #tpu.memory_space<smem>>
    %534 = vector.extract_strided_slice %512 {offsets = [4, 0], sizes = [16, 16], strides = [1, 1]} : vector<22x16xf32> to vector<16x16xf32>
    %535 = vector.broadcast %533 : f32 to vector<16x16xf32>
    %536 = arith.mulf %535, %534 : vector<16x16xf32>
    %537 = arith.addf %532, %536 : vector<16x16xf32>
    %c89 = arith.constant 89 : index
    %538 = memref.load %arg4[%c89] : memref<98xf32, #tpu.memory_space<smem>>
    %539 = vector.extract_strided_slice %512 {offsets = [5, 0], sizes = [16, 16], strides = [1, 1]} : vector<22x16xf32> to vector<16x16xf32>
    %540 = vector.broadcast %538 : f32 to vector<16x16xf32>
    %541 = arith.mulf %540, %539 : vector<16x16xf32>
    %542 = arith.addf %537, %541 : vector<16x16xf32>
    %c96 = arith.constant 96 : index
    %543 = memref.load %arg4[%c96] : memref<98xf32, #tpu.memory_space<smem>>
    %544 = vector.extract_strided_slice %512 {offsets = [6, 0], sizes = [16, 16], strides = [1, 1]} : vector<22x16xf32> to vector<16x16xf32>
    %545 = vector.broadcast %543 : f32 to vector<16x16xf32>
    %546 = arith.mulf %545, %544 : vector<16x16xf32>
    %547 = arith.addf %542, %546 : vector<16x16xf32>
    %548 = vector.extract_strided_slice %331 {offsets = [0, 6], sizes = [22, 16], strides = [1, 1]} : vector<22x22xf32> to vector<22x16xf32>
    %c55 = arith.constant 55 : index
    %549 = memref.load %arg4[%c55] : memref<98xf32, #tpu.memory_space<smem>>
    %550 = vector.extract_strided_slice %548 {offsets = [0, 0], sizes = [16, 16], strides = [1, 1]} : vector<22x16xf32> to vector<16x16xf32>
    %551 = vector.broadcast %549 : f32 to vector<16x16xf32>
    %552 = arith.mulf %551, %550 : vector<16x16xf32>
    %553 = arith.addf %547, %552 : vector<16x16xf32>
    %c62 = arith.constant 62 : index
    %554 = memref.load %arg4[%c62] : memref<98xf32, #tpu.memory_space<smem>>
    %555 = vector.extract_strided_slice %548 {offsets = [1, 0], sizes = [16, 16], strides = [1, 1]} : vector<22x16xf32> to vector<16x16xf32>
    %556 = vector.broadcast %554 : f32 to vector<16x16xf32>
    %557 = arith.mulf %556, %555 : vector<16x16xf32>
    %558 = arith.addf %553, %557 : vector<16x16xf32>
    %c69 = arith.constant 69 : index
    %559 = memref.load %arg4[%c69] : memref<98xf32, #tpu.memory_space<smem>>
    %560 = vector.extract_strided_slice %548 {offsets = [2, 0], sizes = [16, 16], strides = [1, 1]} : vector<22x16xf32> to vector<16x16xf32>
    %561 = vector.broadcast %559 : f32 to vector<16x16xf32>
    %562 = arith.mulf %561, %560 : vector<16x16xf32>
    %563 = arith.addf %558, %562 : vector<16x16xf32>
    %c76 = arith.constant 76 : index
    %564 = memref.load %arg4[%c76] : memref<98xf32, #tpu.memory_space<smem>>
    %565 = vector.extract_strided_slice %548 {offsets = [3, 0], sizes = [16, 16], strides = [1, 1]} : vector<22x16xf32> to vector<16x16xf32>
    %566 = vector.broadcast %564 : f32 to vector<16x16xf32>
    %567 = arith.mulf %566, %565 : vector<16x16xf32>
    %568 = arith.addf %563, %567 : vector<16x16xf32>
    %c83 = arith.constant 83 : index
    %569 = memref.load %arg4[%c83] : memref<98xf32, #tpu.memory_space<smem>>
    %570 = vector.extract_strided_slice %548 {offsets = [4, 0], sizes = [16, 16], strides = [1, 1]} : vector<22x16xf32> to vector<16x16xf32>
    %571 = vector.broadcast %569 : f32 to vector<16x16xf32>
    %572 = arith.mulf %571, %570 : vector<16x16xf32>
    %573 = arith.addf %568, %572 : vector<16x16xf32>
    %c90 = arith.constant 90 : index
    %574 = memref.load %arg4[%c90] : memref<98xf32, #tpu.memory_space<smem>>
    %575 = vector.extract_strided_slice %548 {offsets = [5, 0], sizes = [16, 16], strides = [1, 1]} : vector<22x16xf32> to vector<16x16xf32>
    %576 = vector.broadcast %574 : f32 to vector<16x16xf32>
    %577 = arith.mulf %576, %575 : vector<16x16xf32>
    %578 = arith.addf %573, %577 : vector<16x16xf32>
    %c97 = arith.constant 97 : index
    %579 = memref.load %arg4[%c97] : memref<98xf32, #tpu.memory_space<smem>>
    %580 = vector.extract_strided_slice %548 {offsets = [6, 0], sizes = [16, 16], strides = [1, 1]} : vector<22x16xf32> to vector<16x16xf32>
    %581 = vector.broadcast %579 : f32 to vector<16x16xf32>
    %582 = arith.mulf %581, %580 : vector<16x16xf32>
    %583 = arith.addf %578, %582 : vector<16x16xf32>
    %584 = arith.negf %583 : vector<16x16xf32>
    %585 = math.exp %584 : vector<16x16xf32>
    %cst_39 = arith.constant 1.000000e+00 : f32
    %586 = vector.broadcast %cst_39 : f32 to vector<16x16xf32>
    %587 = arith.addf %586, %585 : vector<16x16xf32>
    %588 = arith.divf %586, %587 : vector<16x16xf32>
    %589 = vector.extract_strided_slice %588 {offsets = [0, 0], sizes = [1, 16], strides = [1, 1]} : vector<16x16xf32> to vector<1x16xf32>
    %590 = vector.extract_strided_slice %588 {offsets = [1, 0], sizes = [1, 16], strides = [1, 1]} : vector<16x16xf32> to vector<1x16xf32>
    %591 = vector.extract_strided_slice %588 {offsets = [2, 0], sizes = [1, 16], strides = [1, 1]} : vector<16x16xf32> to vector<1x16xf32>
    %592 = vector.extract_strided_slice %588 {offsets = [3, 0], sizes = [1, 16], strides = [1, 1]} : vector<16x16xf32> to vector<1x16xf32>
    %593 = vector.extract_strided_slice %588 {offsets = [4, 0], sizes = [1, 16], strides = [1, 1]} : vector<16x16xf32> to vector<1x16xf32>
    %594 = vector.extract_strided_slice %588 {offsets = [5, 0], sizes = [1, 16], strides = [1, 1]} : vector<16x16xf32> to vector<1x16xf32>
    %595 = vector.extract_strided_slice %588 {offsets = [6, 0], sizes = [1, 16], strides = [1, 1]} : vector<16x16xf32> to vector<1x16xf32>
    %596 = vector.extract_strided_slice %588 {offsets = [7, 0], sizes = [1, 16], strides = [1, 1]} : vector<16x16xf32> to vector<1x16xf32>
    %597 = vector.extract_strided_slice %588 {offsets = [8, 0], sizes = [1, 16], strides = [1, 1]} : vector<16x16xf32> to vector<1x16xf32>
    %598 = vector.extract_strided_slice %588 {offsets = [9, 0], sizes = [1, 16], strides = [1, 1]} : vector<16x16xf32> to vector<1x16xf32>
    %599 = vector.extract_strided_slice %588 {offsets = [10, 0], sizes = [1, 16], strides = [1, 1]} : vector<16x16xf32> to vector<1x16xf32>
    %600 = vector.extract_strided_slice %588 {offsets = [11, 0], sizes = [1, 16], strides = [1, 1]} : vector<16x16xf32> to vector<1x16xf32>
    %601 = vector.extract_strided_slice %588 {offsets = [12, 0], sizes = [1, 16], strides = [1, 1]} : vector<16x16xf32> to vector<1x16xf32>
    %602 = vector.extract_strided_slice %588 {offsets = [13, 0], sizes = [1, 16], strides = [1, 1]} : vector<16x16xf32> to vector<1x16xf32>
    %603 = vector.extract_strided_slice %588 {offsets = [14, 0], sizes = [1, 16], strides = [1, 1]} : vector<16x16xf32> to vector<1x16xf32>
    %604 = vector.extract_strided_slice %588 {offsets = [15, 0], sizes = [1, 16], strides = [1, 1]} : vector<16x16xf32> to vector<1x16xf32>
    %605 = tpu.concatenate %589, %590, %591, %592, %593, %594, %595, %596, %597, %598, %599, %600, %601, %602, %603, %604 in 1 : vector<1x16xf32>, vector<1x16xf32>, vector<1x16xf32>, vector<1x16xf32>, vector<1x16xf32>, vector<1x16xf32>, vector<1x16xf32>, vector<1x16xf32>, vector<1x16xf32>, vector<1x16xf32>, vector<1x16xf32>, vector<1x16xf32>, vector<1x16xf32>, vector<1x16xf32>, vector<1x16xf32>, vector<1x16xf32> -> vector<1x256xf32>
    %c0_40 = arith.constant 0 : index
    %c0_41 = arith.constant 0 : index
    %c0_42 = arith.constant 0 : index
    %606 = vector.load %arg1[%c0_40, %c0_41, %c0_42] : memref<1x16x256xf32, #tpu.memory_space<vmem>>, vector<1x16x256xf32>
    %607 = vector.shape_cast %606 : vector<1x16x256xf32> to vector<16x256xf32>
    %608 = vector.broadcast %22 : vector<16x1xf32> to vector<16x256xf32>
    %609 = arith.mulf %607, %608 : vector<16x256xf32>
    %610 = vector.broadcast %605 : vector<1x256xf32> to vector<16x256xf32>
    %611 = arith.mulf %609, %610 : vector<16x256xf32>
    %c0_43 = arith.constant 0 : index
    %c0_44 = arith.constant 0 : index
    %c0_45 = arith.constant 0 : index
    %612 = vector.load %arg5[%c0_43, %c0_44, %c0_45] : memref<1x16x256xf32, #tpu.memory_space<vmem>>, vector<1x16x256xf32>
    %613 = vector.shape_cast %612 : vector<1x16x256xf32> to vector<16x256xf32>
    %614 = vector.shape_cast %611 : vector<16x256xf32> to vector<1x16x256xf32>
    tpu.vector_store %arg5[%c0_43, %c0_44, %c0_45], %614 {strides = array<i32>} : memref<1x16x256xf32, #tpu.memory_space<vmem>>, vector<1x16x256xf32>,
    return
  }
  func.func @transform_0(%arg0: i32) -> (i32, i32, i32) {
    %c0_i32 = arith.constant 0 : i32
    %c0_i32_0 = arith.constant 0 : i32
    %c0_i32_1 = arith.constant 0 : i32
    return %arg0, %c0_i32, %c0_i32_0 : i32, i32, i32
  }
  func.func @transform_1(%arg0: i32) -> (i32, i32) {
    %c0_i32 = arith.constant 0 : i32
    %c0_i32_0 = arith.constant 0 : i32
    %c0_i32_1 = arith.constant 0 : i32
    return %c0_i32, %c0_i32_0 : i32, i32
  }
  func.func @transform_2(%arg0: i32) -> (i32, i32) {
    %c0_i32 = arith.constant 0 : i32
    %c0_i32_0 = arith.constant 0 : i32
    %c0_i32_1 = arith.constant 0 : i32
    return %c0_i32, %c0_i32_0 : i32, i32
  }
  func.func @transform_3(%arg0: i32) -> i32 {
    %c0_i32 = arith.constant 0 : i32
    %c0_i32_0 = arith.constant 0 : i32
    return %c0_i32 : i32
  }
  func.func @transform_4(%arg0: i32) -> (i32, i32, i32) {
    %c0_i32 = arith.constant 0 : i32
    %c0_i32_0 = arith.constant 0 : i32
    %c0_i32_1 = arith.constant 0 : i32
    return %arg0, %c0_i32, %c0_i32_0 : i32, i32, i32
  }
}

</mosaic_0001>

<bundles_post_ra>
// kernel: cbam_forward.1
= control target key start
LH: loop header
LB: loop body
LE: loop exit
PB: predicated region body
PF: predicated region fallthrough
CT: control target
= control target key end

     0   :  { %9 = vsyncpa [#allocation4], 0  ;;  %s3097_s15 = smov 0   ;;  %s4703_s0 = inlined_call_operand.vmem [shape: f32[2,16,256], index: 0, kind: input, shape index: {}]   ;;  %s4704_s1 = inlined_call_operand.vmem [shape: f32[2,16], index: 1, kind: input, shape index: {}]   ;;  %s4705_s2 = inlined_call_operand.vmem [shape: f32[16,2], index: 2, kind: input, shape index: {}]   ;;  %s4706_s3 = inlined_call_operand.vmem [shape: f32[98], index: 3, kind: input, shape index: {}]   ;;  %s4707_s4 = inlined_call_operand.vmem [shape: f32[2,16,256], index: 4, kind: output, shape index: {}]  }
   0x1 LB: > { %s2766_s16 = sadd.s32 4294967295, %s3050_s15   ;;  %p2768_p0 = scmp.ge.s32.totalorder %s3050_s15, 1  ;;  %s3050_s15 = sphi %s3097_s15, %s15_s15  }
   0x2   : > { %p135_p1 = scmp.lt.s32.totalorder %s3050_s15, 3  ;;  %s154_s19 = sshll.u32 %s4706_s3, 4  ;;  %s155_s19 = int_to_ptr.vmem [resolvable:$true] %s154_s19 }
   0x3   : > { %p2969_p3 = scmp.eq.s32.totalorder %s2766_s16, 0  ;;  %s3025_s21 = scalar_lea.vmem %s155_s19, 16 }
   0x4   : > { %p3108_p2 = pnand %p2768_p0, %p135_p1  ;;  %p3026_p6 = scmp.ne.s32.totalorder %s155_s19, %s3025_s21 }
   0x5   : > { %p3033_p10 = scmp.lt.s32.totalorder %s155_s19, %s155_s19  ;;  %p3034_p11 = scmp.lt.s32.totalorder %s3025_s21, %s3025_s21 }
   0x6   : > { %p2965_p4 = pneg %p3108_p2 }
   0x7   : > { %p3035_p12 = por %p3034_p11, %p3033_p10 }
   0x8   : > { %p2966_p5 = pnand %p2969_p3, %p2965_p4 }
   0xa   : > { %p3027_p7 = pneg %p2966_p5 }
   0xc   : > { %p3028_p8 = pnand %p3027_p7, %p3026_p6 }
   0xe   : > { %p3029_p9 = pneg %p3028_p8 }
  0x10   : > { %p3036_p13 = pnand %p3035_p12, %p3029_p9 }
  0x12   : > { %3039 = shalt.err (!%p3036_p13)
}
  0x13   : > { %s3052_s22 = smov [#allocation3]   ;;  %175 = sbr.rel (%p3108_p2) target bundleno = 1930 (0x78a), region = 36 }
  0x14   : > { %2968 = dma.vmem_to_smem (!%p2966_p5), %s155_s19, 16, %s3052_s22, [#allocation4]  }
  0x1a   : > { %3045 = dma.done.wait (%p2969_p3), [#allocation4], 16  }
  0x1b   : > { %3047 = vsyncadd (%p2969_p3), [#allocation4], 4294967280 }
  0x1c   : > { %181 = sfence }
  0x1d   : > { %p202_p0 = scmp.lt.s32.totalorder %s2766_s16, 1  ;;  %v3053_v0 = vmov 0.00390625|0.00390625   ;;  %v3054_v7 = vmov 0.0|0.0   ;;  %vm3055_vm0 = vmmov 0   ;;  %v3056_v8 = vmov 0.0  }
  0x1e   : > { %2942 = vmatprep.subr.bf16.mxu0 %v3053_v0  ;;  %2958 = vmatprep.subr.bf16.mxu1 %v3054_v7  ;;  %vm297_vm1 = vcmask 7168   ;;  %v300_v20 = vld [vmem:[%s4704_s1] sm:$0x3]  ;;  %vm301_vm2 = vcmask 130048   ;;  %vm378_vm3 = vcmask 15360   ;;  %vm385_vm4 = vcmask 1041408  }
  0x1f   : > { %2943 = vmatpush3.bf16.msra.mxu0 %v3053_v0  ;;  %s4838_s16 = smov (!%p202_p0, %s2766_s16), 1  ;;  %2934 = vmatprep.mubr.msk.f32.mxu1 %vm3055_vm0, %v3056_v8  ;;  %v376_v21 = vld [vmem:[%s4705_s2] sm:$0xff]  ;;  %v377_v25 = vld [vmem:[%s4705_s2 + $0x8] sm:$0xff]  ;;  %s3057_s7 = smov 127   ;;  %v3058_v28 = vmov 0   ;;  %vm531_vm5 = vcmask 179200  }
  0x20   : > { %2944 = vmatprep.subr.bf16.mxu0 %v3053_v0  ;;  %s4714_s23 = sshll.u32 %s4838_s16, 5  ;;  %2999 = vset.pattern.permute.xlu0 %v3058_v28  ;;  %s4717_s8 = smov 96   ;;  %536 = vst.msk [vmem:[#allocation2 + $0x18] sm:$0xff] %vm531_vm5, %v3056_v8  ;;  %537 = vst.msk [vmem:[#allocation2 + $0x20] sm:$0xff] %vm531_vm5, %v3056_v8  ;;  %vm583_vm6 = vcmask 1040384   ;;  %vm586_vm7 = vcmask 1042432  }
  0x21   : > { %s3127_s26 = scalar_lea.vmem %s4703_s0, %s4714_s23  ;;  %3000 = vset.pattern.permute.xlu1 %v3058_v28  ;;  %s4715_s9 = smov 112   ;;  %532 = vst.msk [vmem:[#allocation2] sm:$0xff] %vm531_vm5, %v3056_v8  ;;  %533 = vst.msk [vmem:[#allocation2 + $0x8] sm:$0xff] %vm531_vm5, %v3056_v8  ;;  %vm588_vm8 = vcmask 1043456   ;;  %vm590_vm9 = vcmask 1044480   ;;  %vm592_vm10 = vcmask 1045504  }
  0x22   : > { %v3130_v1 = vld [vmem:[%s3127_s26 + $0x8] sm:$0xff]  ;;  %v3133_v2 = vld [vmem:[%s3127_s26] sm:$0xff]  ;;  %v3139_v4 = vld [vmem:[%s3127_s26 + $0x18] sm:$0xff]  ;;  %s3061_s10 = smov 64   ;;  %s4719_s11 = smov 80   ;;  %vm594_vm11 = vcmask 1046528  }
  0x23   : > { %2945 = vmatpush3.bf16.msra.mxu0 %v3053_v0  ;;  %280 = vmatprep.mubr.f32.mxu0 %v3130_v1  ;;  %v291_v3 = vmax.f32 %v3133_v2, %v3130_v1  ;;  %v3142_v5 = vld [vmem:[%s3127_s26 + $0x10] sm:$0xff]  ;;  %s3063_s12 = smov 32   ;;  %s3064_s13 = smov 48   ;;  %vm534_vm12 = vcmask 177152   ;;  %vm611_vm13 = vcmask 154648   ;;  %vm2656_vm14 = vcmask 261120  }
  0x24   : > { %2946 = vmatprep.subr.bf16.mxu0 %v3053_v0  ;;  %v294_v6 = vmax.f32 %v3142_v5, %v3139_v4  ;;  %s3065_s14 = smov 16   ;;  %538 = vst.msk [vmem:[#allocation2 + $0x28] sm:$0x3f] %vm534_vm12, %v3056_v8  ;;  %535 = vst.msk [vmem:[#allocation2 + $0x10] sm:$0x3f] %vm534_vm12, %v3056_v8  ;;  %s3066_s17 = smov 3  }
  0x25   : > { %292 = vmax.xlane.f32.xlu0 %v291_v3  ;;  %s2838_s18 = sld [smem:[#allocation3 + $0x32]]  ;;  %s2845_s19 = sld [smem:[#allocation3 + $0x33]]  ;;  %vm2658_vm15 = vcmask 392192   ;;  %vm2660_vm0 = vcmask 523264  }
  0x26   : > { %s2852_s20 = sld [smem:[#allocation3 + $0x34]]  ;;  %s3067_s21 = smov 126  }
  0x27   : > { %2947 = vmatpush3.bf16.msra.mxu0 %v3053_v0  ;;  %s3068_s22 = smov 125   ;;  %s2789_s24 = sld [smem:[#allocation3 + $0x1]] }
  0x28   : > { %2948 = vmatprep.subr.bf16.mxu0 %v3053_v0  ;;  %s2796_s25 = sld [smem:[#allocation3 + $0x2]]  ;;  %s3301_s27 = sld [smem:[#allocation3 + $0x3]] }
  0x29   : > { %295 = vmax.xlane.f32.xlu0 %v294_v6  ;;  %s3306_s28 = sld [smem:[#allocation3 + $0x4]]  ;;  %s3312_s29 = sld [smem:[#allocation3 + $0x5]] }
  0x2a   : > { %s2839_s30 = sld [smem:[#allocation3 + $0x39]]  ;;  %s3319_s5 = sld [smem:[#allocation3 + $0x6]] }
  0x2b   : > { %2949 = vmatpush3.bf16.msra.mxu0 %v3053_v0  ;;  %s2840_s6 = sld [smem:[#allocation3 + $0x40]]  ;;  %s3822_s23 = sld [smem:[#allocation3 + $0x22]] }
  0x2c   : > { %2950 = vmatprep.subr.bf16.mxu0 %v3053_v0 }
  0x2f   : > { %2951 = vmatpush3.bf16.msra.mxu0 %v3053_v0 }
  0x30   : > { %2952 = vmatprep.subr.bf16.mxu0 %v3053_v0 }
  0x33   : > { %2953 = vmatpush3.bf16.msra.mxu0 %v3053_v0 }
  0x34   : > { %2954 = vmatprep.subr.bf16.mxu0 %v3053_v0 }
  0x37   : > { %2955 = vmatpush3.bf16.msra.mxu0 %v3053_v0 }
  0x38   : > { %2956 = vmatprep.subr.bf16.mxu0 %v3053_v0 }
  0x3b   : > { %2957 = vmatpush3.bf16.msra.mxu0 %v3053_v0 }
  0x3e   : > { %281 = vmatmul.mubr.f32.vlgmr.msra.gmra.mrb[0].mxu0 %v3133_v2 }
  0x3f   : > { %285 = vmatprep.mubr.f32.mxu0 %v3139_v4 }
  0x42   : > { %286 = vmatmul.mubr.f32.gmra.mrb[2].mxu0 %v3142_v5 }
  0xb2   : > { %v293_v9 = vpop.xlane.xlu0 %292 }
  0xb6   : > { %v296_v15 = vpop.xlane.xlu0 %295 }
 0x111   : > { %v2918_v10 = vpop.f32.mrb[0].mxu0 }
 0x112   : > { %v2919_v11 = vpop.f32.mrb[1].mxu0 }
 0x113   : > { %v2920_v12 = vadd.f32 %v2919_v11, %v2918_v10 }
 0x115   : > { %v2921_v13 = vpop.f32.mrb[2].mxu0  ;;  %v298_v17 = vsel %vm297_vm1, %v2920_v12, %v293_v9 }
 0x116   : > { %v2922_v14 = vpop.f32.mrb[3].mxu0 }
 0x117   : > { %v2923_v16 = vadd.f32 %v2922_v14, %v2921_v13 }
 0x119   : > { %v299_v18 = vsel %vm297_vm1, %v2923_v16, %v296_v15  ;;  %vm2662_vm1 = vcmask 654336  }
 0x11a   : > { %v2959_v19 = vpack.c.bf16 %v299_v18, %v298_v17 }
 0x11c   : > { %2960 = vmatpush3.bf16.msra.mxu1 %v2959_v19 }
 0x11f   : > { %2935 = vmatmul.mubr.msk.f32.vlgmr.msra.gmra.mrb[0].mxu1 %vm301_vm2, %v300_v20 }
 0x120   : > { %2939 = vmatprep.mubr.msk.f32.mxu1 %vm378_vm3, %v376_v21 }
 0x1f2   : > { %v371_v22 = vpop.f32.mrb[0].mxu1 }
 0x1f3   : > { %v375_v23 = vmax.f32 %v371_v22, 0.0  ;;  %v2936_v24 = vpop.f32.mrb[1].mxu1 }
 0x1f5   : > { %2937 = vmatprep.subr.msk.mxu1 %vm385_vm4, %v375_v23 }
 0x1f6   : > { %2938 = vmatpush3.msk.msra.mxu1 %vm385_vm4, %v375_v23 }
 0x1f7   : > { %2940 = vmatmul.mubr.msk.f32.vlgmr.msra.gmra.mrb[2].mxu1 %vm378_vm3, %v377_v25  ;;  %vm2664_vm3 = vcmask 785408  }
 0x2ca   : > { %v2941_v26 = vpop.f32.mrb[2].mxu1 }
 0x2cb   : > { %v455_v27 = vpop.f32.mrb[3].mxu1 }
 0x2cc   : > { %466 = vrot.lane.b32.xlu1 %v455_v27, %s3057_s7 }
 0x2d0   : > { %468 = vrot.lane.b32.xlu1 %v2941_v26, %s3057_s7 }
 0x33e   : > { %v467_v29 = vpop.permute.xlu1 %466 }
 0x33f   : > { %v472_v30 = vadd.f32 %v467_v29, %v455_v27 }
 0x341   : > { %v2781_v31 = vmul.f32 -1.442695, %v472_v30 }
 0x342   : > { %v469_v32 = vpop.permute.xlu1 %468 }
 0x343   : > { %3001 = vpow2.f32 %v2781_v31  ;;  %v473_v33 = vadd.f32 %v2941_v26, %v469_v32 }
 0x345   : > { %v2782_v34 = vmul.f32 -1.442695, %v473_v33 }
 0x347   : > { %3003 = vpow2.f32 %v2782_v34 }
 0x34d   : > { %v3002_v35 = vpop.eup %3001 }
 0x34e   : > { %v480_v36 = vadd.f32 1.0, %v3002_v35 }
 0x350   : > { %3005 = vrcp.f32 %v480_v36 }
 0x351   : > { %v3004_v37 = vpop.eup %3003 }
 0x352   : > { %v481_v38 = vadd.f32 1.0, %v3004_v37 }
 0x354   : > { %3007 = vrcp.f32 %v481_v38 }
 0x35a   : > { %v3006_v39 = vpop.eup %3005 }
 0x35b   : > { %488 = vperm.xlu0 %2999, %v3006_v39  }
 0x35e   : > { %v3008_v40 = vpop.eup %3007 }
 0x35f   : > { %493 = vperm.xlu1 %3000, %v3008_v40  }
 0x3da   : > { %v3164_v41 = vpop.permute.xlu0 %488 }
 0x3db   : > { %4722 = vst [vmem:[#allocation6_spill] sm:$0xff] %v3164_v41  ;;  %v496_v43 = vmul.f32 %v3164_v41, %v3133_v2  ;;  %v497_v44 = vmul.f32 %v3164_v41, %v3130_v1 }
 0x3de   : > { %v3166_v42 = vpop.permute.xlu1 %493 }
 0x3df   : > { %4723 = vst [vmem:[#allocation7_spill] sm:$0xff] %v3166_v42  ;;  %v498_v45 = vmul.f32 %v3166_v42, %v3142_v5  ;;  %v499_v46 = vmul.f32 %v3166_v42, %v3139_v4 }
 0x3e1   : > { %v517_v47 = vmax.f32 %v496_v43, %v498_v45  ;;  %v524_v48 = vmax.f32 %v497_v44, %v499_v46  ;;  %v500_v56 = vadd.f32 %v498_v45, %v496_v43  ;;  %v507_v60 = vadd.f32 %v499_v46, %v497_v44 }
 0x3e3   : > { %v518_v49 = vrot.slane %v517_v47, 4  ;;  %v525_v51 = vrot.slane %v524_v48, 4  ;;  %v501_v59 = vrot.slane %v500_v56, 4  ;;  %v508_v63 = vrot.slane %v507_v60, 4 }
 0x3e5   : > { %v519_v50 = vmax.f32 %v517_v47, %v518_v49  ;;  %v526_v54 = vmax.f32 %v524_v48, %v525_v51  ;;  %v502_v62 = vadd.f32 %v501_v59, %v500_v56  ;;  %v509_v2 = vadd.f32 %v508_v63, %v507_v60 }
 0x3e7   : > { %v520_v52 = vrot.slane %v519_v50, 2  ;;  %v527_v58 = vrot.slane %v526_v54, 2  ;;  %v503_v1 = vrot.slane %v502_v62, 2  ;;  %v510_v5 = vrot.slane %v509_v2, 2 }
 0x3e9   : > { %v521_v53 = vmax.f32 %v519_v50, %v520_v52  ;;  %v528_v61 = vmax.f32 %v526_v54, %v527_v58  ;;  %v504_v4 = vadd.f32 %v503_v1, %v502_v62  ;;  %v511_v7 = vadd.f32 %v510_v5, %v509_v2 }
 0x3eb   : > { %v522_v55 = vrot.slane %v521_v53, 1  ;;  %v529_v0 = vrot.slane %v528_v61, 1  ;;  %v505_v6 = vrot.slane %v504_v4, 1  ;;  %v512_v10 = vrot.slane %v511_v7, 1 }
 0x3ed   : > { %v3176_v57 = vmax.f32 %v521_v53, %v522_v55  ;;  %v3190_v3 = vmax.f32 %v528_v61, %v529_v0  ;;  %v506_v9 = vadd.f32 %v505_v6, %v504_v4  ;;  %v513_v11 = vadd.f32 %v512_v10, %v511_v7 }
 0x3ef   : > { %618 = vrot.lane.b32.xlu1 %v3176_v57, %s4717_s8  ;;  %615 = vrot.lane.b32.xlu0 %v3176_v57, %s4715_s9  ;;  %v3208_v12 = vmul.f32 0.0625, %v506_v9  ;;  %v3214_v13 = vmul.f32 0.0625, %v513_v11  ;;  %v1746_v9 = vstv %s2838_s18  ;;  %s2841_s18 = sld [smem:[#allocation3 + $0x47]] }
 0x3f3   : > { %624 = vrot.lane.b32.xlu1 %v3176_v57, %s3061_s10  ;;  %621 = vrot.lane.b32.xlu0 %v3176_v57, %s4719_s11 }
 0x3f7   : > { %630 = vrot.lane.b32.xlu1 %v3176_v57, %s3063_s12  ;;  %627 = vrot.lane.b32.xlu0 %v3176_v57, %s3064_s13 }
 0x3fb   : > { %637 = vrot.lane.b32.xlu1 %v3190_v3, %s4715_s9  ;;  %633 = vrot.lane.b32.xlu0 %v3176_v57, %s3065_s14 }
 0x3ff   : > { %643 = vrot.lane.b32.xlu1 %v3190_v3, %s4719_s11  ;;  %640 = vrot.lane.b32.xlu0 %v3190_v3, %s4717_s8 }
 0x403   : > { %649 = vrot.lane.b32.xlu1 %v3190_v3, %s3064_s13  ;;  %646 = vrot.lane.b32.xlu0 %v3190_v3, %s3061_s10 }
 0x407   : > { %655 = vrot.lane.b32.xlu1 %v3190_v3, %s3065_s14  ;;  %652 = vrot.lane.b32.xlu0 %v3190_v3, %s3063_s12 }
 0x40b   : > { %555 = vrot.lane.b32.xlu0 %v3208_v12, %s3063_s12  ;;  %540 = vrot.lane.b32.xlu1 %v3208_v12, %s4715_s9 }
 0x40f   : > { %558 = vrot.lane.b32.xlu0 %v3208_v12, %s3065_s14  ;;  %562 = vrot.lane.b32.xlu1 %v3214_v13, %s4715_s9  ;;  %s3824_s9 = sld [smem:[#allocation3 + $0x57]] }
 0x413   : > { %543 = vrot.lane.b32.xlu1 %v3208_v12, %s4717_s8 }
 0x417   : > { %565 = vrot.lane.b32.xlu1 %v3214_v13, %s4717_s8  ;;  %s3833_s8 = sld [smem:[#allocation3 + $0x5e]] }
 0x41b   : > { %546 = vrot.lane.b32.xlu1 %v3208_v12, %s4719_s11 }
 0x41f   : > { %568 = vrot.lane.b32.xlu1 %v3214_v13, %s4719_s11  ;;  %s3847_s11 = sld [smem:[#allocation3 + $0x30]] }
 0x423   : > { %549 = vrot.lane.b32.xlu1 %v3208_v12, %s3061_s10 }
 0x427   : > { %571 = vrot.lane.b32.xlu1 %v3214_v13, %s3061_s10 }
 0x42b   : > { %552 = vrot.lane.b32.xlu1 %v3208_v12, %s3064_s13 }
 0x42f   : > { %574 = vrot.lane.b32.xlu1 %v3214_v13, %s3064_s13 }
 0x433   : > { %577 = vrot.lane.b32.xlu1 %v3214_v13, %s3063_s12 }
 0x437   : > { %580 = vrot.lane.b32.xlu1 %v3214_v13, %s3065_s14 }
 0x461   : > { %v619_v14 = vpop.permute.xlu1 %618  ;;  %v616_v15 = vpop.permute.xlu0 %615 }
 0x462   : > { %v658_v16 = vsel %vm583_vm6, %v3176_v57, %v616_v15  ;;  %v2026_v15 = vstv %s2852_s20  ;;  %s2842_s20 = sld [smem:[#allocation3 + $0x4e]] }
 0x463   : > { %v659_v18 = vsel %vm385_vm4, %v658_v16, %v619_v14 }
 0x465   : > { %v625_v17 = vpop.permute.xlu1 %624  ;;  %v622_v19 = vpop.permute.xlu0 %621 }
 0x466   : > { %v660_v20 = vsel %vm586_vm7, %v659_v18, %v622_v19 }
 0x467   : > { %v661_v22 = vsel %vm588_vm8, %v660_v20, %v625_v17 }
 0x469   : > { %v631_v21 = vpop.permute.xlu1 %630  ;;  %v628_v23 = vpop.permute.xlu0 %627 }
 0x46a   : > { %v662_v24 = vsel %vm590_vm9, %v661_v22, %v628_v23  ;;  %v795_v22 = vstv %s2789_s24  ;;  %s3071_s24 = smov 122  }
 0x46b   : > { %v663_v27 = vsel %vm592_vm10, %v662_v24, %v631_v21 }
 0x46d   : > { %v638_v25 = vpop.permute.xlu1 %637  ;;  %v634_v26 = vpop.permute.xlu0 %633 }
 0x46e   : > { %v664_v28 = vsel %vm594_vm11, %v663_v27, %v634_v26  ;;  %v665_v29 = vsel %vm583_vm6, %v3190_v3, %v638_v25  ;;  %v935_v26 = vstv %s2796_s25  ;;  %s2843_s25 = sld [smem:[#allocation3 + $0x55]] }
 0x46f   : > { %674 = vrot.lane.b32.xlu0 %v664_v28, %s3066_s17  ;;  %v1075_v28 = vstv %s3301_s27  ;;  %s2844_s27 = sld [smem:[#allocation3 + $0x5c]] }
 0x471   : > { %v644_v30 = vpop.permute.xlu1 %643  ;;  %v641_v31 = vpop.permute.xlu0 %640 }
 0x472   : > { %v666_v32 = vsel %vm385_vm4, %v665_v29, %v641_v31  ;;  %v1215_v31 = vstv %s3306_s28  ;;  %s2846_s28 = sld [smem:[#allocation3 + $0x3a]] }
 0x473   : > { %v667_v34 = vsel %vm586_vm7, %v666_v32, %v644_v30 }
 0x475   : > { %v650_v33 = vpop.permute.xlu1 %649  ;;  %v647_v35 = vpop.permute.xlu0 %646 }
 0x476   : > { %v668_v36 = vsel %vm588_vm8, %v667_v34, %v647_v35  ;;  %v1355_v34 = vstv %s3312_s29  ;;  %s2847_s29 = sld [smem:[#allocation3 + $0x41]] }
 0x477   : > { %v669_v8 = vsel %vm590_vm9, %v668_v36, %v650_v33 }
 0x479   : > { %v656_v37 = vpop.permute.xlu1 %655  ;;  %v653_v38 = vpop.permute.xlu0 %652 }
 0x47a   : > { %v670_v39 = vsel %vm592_vm10, %v669_v8, %v653_v38  ;;  %v1495_v8 = vstv %s3319_s5  ;;  %s2849_s5 = sld [smem:[#allocation3 + $0x4f]] }
 0x47b   : > { %v671_v40 = vsel %vm594_vm11, %v670_v39, %v656_v37  ;;  %v1760_v37 = vstv %s2839_s30  ;;  %s2848_s30 = sld [smem:[#allocation3 + $0x48]] }
 0x47c   : > { %676 = vrot.lane.b32.xlu1 %v671_v40, %s3066_s17 }
 0x47d   : > { %v541_v43 = vpop.permute.xlu1 %540  ;;  %v556_v50 = vpop.permute.xlu0 %555 }
 0x47e   : > { %v584_v52 = vsel %vm583_vm6, %v3208_v12, %v541_v43  ;;  %v1886_v12 = vstv %s2845_s19  ;;  %s3070_s19 = smov 123  }
 0x481   : > { %v563_v44 = vpop.permute.xlu1 %562  ;;  %v559_v58 = vpop.permute.xlu0 %558 }
 0x482   : > { %v596_v62 = vsel %vm583_vm6, %v3214_v13, %v563_v44  ;;  %v1781_v44 = vstv %s2840_s6  ;;  %s2850_s6 = sld [smem:[#allocation3 + $0x56]] }
 0x485   : > { %v544_v45 = vpop.permute.xlu1 %543 }
 0x486   : > { %v585_v53 = vsel %vm385_vm4, %v584_v52, %v544_v45 }
 0x489   : > { %v566_v46 = vpop.permute.xlu1 %565 }
 0x48a   : > { %v597_v63 = vsel %vm385_vm4, %v596_v62, %v566_v46 }
 0x48d   : > { %v547_v47 = vpop.permute.xlu1 %546 }
 0x48e   : > { %v587_v54 = vsel %vm586_vm7, %v585_v53, %v547_v47 }
 0x491   : > { %v569_v48 = vpop.permute.xlu1 %568 }
 0x492   : > { %v598_v1 = vsel %vm586_vm7, %v597_v63, %v569_v48 }
 0x495   : > { %v550_v49 = vpop.permute.xlu1 %549 }
 0x496   : > { %v589_v55 = vsel %vm588_vm8, %v587_v54, %v550_v49 }
 0x499   : > { %v572_v51 = vpop.permute.xlu1 %571 }
 0x49a   : > { %v599_v2 = vsel %vm588_vm8, %v598_v1, %v572_v51  ;;  %v1802_v51 = vstv %s2841_s18  ;;  %s2851_s18 = sld [smem:[#allocation3 + $0x5d]] }
 0x49d   : > { %v553_v56 = vpop.permute.xlu1 %552 }
 0x49e   : > { %v591_v57 = vsel %vm590_vm9, %v589_v55, %v553_v56 }
 0x49f   : > { %v593_v59 = vsel %vm592_vm10, %v591_v57, %v556_v50 }
 0x4a0   : > { %v595_v60 = vsel %vm594_vm11, %v593_v59, %v559_v58  ;;  %v1823_v59 = vstv %s2842_s20  ;;  %s2853_s20 = sld [smem:[#allocation3 + $0x3b]] }
 0x4a1   : > { %605 = vrot.lane.b32.xlu0 %v595_v60, %s3066_s17  ;;  %v575_v61 = vpop.permute.xlu1 %574 }
 0x4a2   : > { %v600_v3 = vsel %vm590_vm9, %v599_v2, %v575_v61 }
 0x4a5   : > { %v578_v0 = vpop.permute.xlu1 %577 }
 0x4a6   : > { %v601_v4 = vsel %vm592_vm10, %v600_v3, %v578_v0  ;;  %v1844_v0 = vstv %s2843_s25  ;;  %s2854_s25 = sld [smem:[#allocation3 + $0x42]] }
 0x4a9   : > { %v581_v5 = vpop.permute.xlu1 %580 }
 0x4aa   : > { %v602_v6 = vsel %vm594_vm11, %v601_v4, %v581_v5 }
 0x4ab   : > { %607 = vrot.lane.b32.xlu1 %v602_v6, %s3066_s17  ;;  %s3069_s17 = smov 124  }
 0x4e1   : > { %v675_v7 = vpop.permute.xlu0 %674 }
 0x4e2   : > { %681 = vst.msk [vmem:[#allocation2 + $0x1b] sm:$0xff] %vm611_vm13, %v675_v7 }
 0x4e9   : > { %v3283_v10 = vld [vmem:[#allocation2 + $0x18] sm:$0xff] }
 0x4ea   : > { %v1747_v11 = vmul.f32 %v1746_v9, %v3283_v10  ;;  %v1887_v14 = vmul.f32 %v1886_v12, %v3283_v10  ;;  %v2027_v16 = vmul.f32 %v2026_v15, %v3283_v10  ;;  %v1761_v40 = vmul.f32 %v1760_v37, %v3283_v10 }
 0x4eb   : > { %v1782_v49 = vmul.f32 %v1781_v44, %v3283_v10  ;;  %v1803_v57 = vmul.f32 %v1802_v51, %v3283_v10  ;;  %v1824_v3 = vmul.f32 %v1823_v59, %v3283_v10 }
 0x4ec   : > { %1751 = vrot.lane.b32.xlu0 %v1747_v11, %s3057_s7  ;;  %v1767_v48 = vrot.slane %v1761_v40, 1  ;;  %v1865_v11 = vstv %s2844_s27  ;;  %s2790_s27 = sld [smem:[#allocation3 + $0x8]] }
 0x4ed   : > { %v1788_v56 = vrot.slane %v1782_v49, 2  ;;  %v1809_v1 = vrot.slane %v1803_v57, 3 }
 0x4ee   : > { %v677_v13 = vpop.permute.xlu1 %676 }
 0x4ef   : > { %682 = vst.msk [vmem:[#allocation2 + $0x23] sm:$0xff] %vm611_vm13, %v677_v13  ;;  %v1830_v13 = vrot.slane %v1824_v3, 4 }
 0x4f0   : > { %1891 = vrot.lane.b32.xlu0 %v1887_v14, %s3067_s21 }
 0x4f4   : > { %2031 = vrot.lane.b32.xlu0 %v2027_v16, %s3068_s22 }
 0x4f6   : > { %v3292_v17 = vld [vmem:[#allocation2 + $0x20] sm:$0xff]  ;;  %v3341_v50 = vld [vmem:[#allocation2 + $0x28] sm:$0x3f] }
 0x4f7   : > { %v1748_v18 = vmul.f32 %v1746_v9, %v3292_v17  ;;  %v1888_v19 = vmul.f32 %v1886_v12, %v3292_v17  ;;  %v2028_v20 = vmul.f32 %v2026_v15, %v3292_v17  ;;  %v1762_v38 = vmul.f32 %v1760_v37, %v3292_v17 }
 0x4f8   : > { %v1783_v46 = vmul.f32 %v1781_v44, %v3292_v17  ;;  %v1804_v54 = vmul.f32 %v1802_v51, %v3292_v17  ;;  %v1763_v58 = vmul.f32 %v1760_v37, %v3341_v50  ;;  %v1825_v62 = vmul.f32 %v1823_v59, %v3292_v17 }
 0x4f9   : > { %1753 = vrot.lane.b32.xlu1 %v1748_v18, %s3057_s7  ;;  %v1768_v45 = vrot.slane %v1762_v38, 1  ;;  %v1784_v4 = vmul.f32 %v1781_v44, %v3341_v50  ;;  %v1846_v7 = vmul.f32 %v1844_v0, %v3292_v17  ;;  %v1845_v9 = vmul.f32 %v1844_v0, %v3283_v10 }
 0x4fa   : > { %v1789_v53 = vrot.slane %v1783_v46, 2  ;;  %v1810_v61 = vrot.slane %v1804_v54, 3  ;;  %v1770_v2 = vrot.slane %v1763_v58, 1  ;;  %v1831_v6 = vrot.slane %v1825_v62, 4 }
 0x4fb   : > { %v1769_v52 = vsel %vm594_vm11, %v1767_v48, %v1768_v45  ;;  %v1791_v14 = vrot.slane %v1784_v4, 2  ;;  %v1805_v15 = vmul.f32 %v1802_v51, %v3341_v50  ;;  %v1852_v18 = vrot.slane %v1846_v7, 5 }
 0x4fc   : > { %v1790_v60 = vsel %vm592_vm10, %v1788_v56, %v1789_v53  ;;  %v1811_v5 = vsel %vm590_vm9, %v1809_v1, %v1810_v61  ;;  %v1771_v12 = vsel %vm594_vm11, %v1768_v45, %v1770_v2  ;;  %v1832_v16 = vsel %vm588_vm8, %v1830_v13, %v1831_v6 }
 0x4fd   : > { %1893 = vrot.lane.b32.xlu1 %v1888_v19, %s3067_s21  ;;  %v1867_v19 = vmul.f32 %v1865_v11, %v3292_v17  ;;  %v1868_v45 = vmul.f32 %v1865_v11, %v3341_v50  ;;  %v1942_v46 = vstv %s2848_s30  ;;  %s2793_s30 = sld [smem:[#allocation3 + $0x1d]] }
 0x4fe   : > { %v1944_v49 = vmul.f32 %v1942_v46, %v3292_v17 }
 0x4ff   : > { %v1875_v54 = vrot.slane %v1868_v45, 6 }
 0x500   : > { %v1950_v58 = vrot.slane %v1944_v49, 3 }
 0x501   : > { %2033 = vrot.lane.b32.xlu1 %v2028_v20, %s3068_s22  ;;  %v1866_v20 = vmul.f32 %v1865_v11, %v3283_v10 }
 0x513   : > { %v606_v21 = vpop.permute.xlu0 %605 }
 0x514   : > { %612 = vst.msk [vmem:[#allocation2 + $0x3] sm:$0xff] %vm611_vm13, %v606_v21  ;;  %v1900_v21 = vstv %s2846_s28  ;;  %s2791_s28 = sld [smem:[#allocation3 + $0xf]] }
 0x515   : > { %v1903_v56 = vmul.f32 %v1900_v21, %v3341_v50 }
 0x51b   : > { %v3303_v23 = vld [vmem:[#allocation2] sm:$0xff] }
 0x51c   : > { %v796_v24 = vmul.f32 %v795_v22, %v3303_v23  ;;  %v936_v27 = vmul.f32 %v935_v26, %v3303_v23  ;;  %v1076_v29 = vmul.f32 %v1075_v28, %v3303_v23  ;;  %v1216_v33 = vmul.f32 %v1215_v31, %v3303_v23 }
 0x51d   : > { %v608_v25 = vpop.permute.xlu1 %607  ;;  %v1356_v36 = vmul.f32 %v1355_v34, %v3303_v23  ;;  %v1496_v43 = vmul.f32 %v1495_v8, %v3303_v23 }
 0x51e   : > { %613 = vst.msk [vmem:[#allocation2 + $0xb] sm:$0xff] %vm611_vm13, %v608_v25  ;;  %800 = vrot.lane.b32.xlu0 %v796_v24, %s3057_s7  ;;  %v1851_v24 = vrot.slane %v1845_v9, 5  ;;  %v1812_v25 = vrot.slane %v1805_v15, 3 }
 0x522   : > { %940 = vrot.lane.b32.xlu0 %v936_v27, %s3067_s21  ;;  %v1853_v27 = vsel %vm586_vm7, %v1851_v24, %v1852_v18 }
 0x525   : > { %v3316_v30 = vld [vmem:[#allocation2 + $0x8] sm:$0xff] }
 0x526   : > { %1080 = vrot.lane.b32.xlu0 %v1076_v29, %s3068_s22  ;;  %v797_v32 = vmul.f32 %v795_v22, %v3316_v30  ;;  %v937_v35 = vmul.f32 %v935_v26, %v3316_v30  ;;  %v1077_v39 = vmul.f32 %v1075_v28, %v3316_v30  ;;  %v1217_v47 = vmul.f32 %v1215_v31, %v3316_v30 }
 0x527   : > { %v1357_v55 = vmul.f32 %v1355_v34, %v3316_v30  ;;  %v1497_v63 = vmul.f32 %v1495_v8, %v3316_v30  ;;  %v1792_v22 = vsel %vm592_vm10, %v1789_v53, %v1791_v14  ;;  %v1826_v26 = vmul.f32 %v1823_v59, %v3341_v50 }
 0x528   : > { %802 = vrot.lane.b32.xlu1 %v797_v32, %s3057_s7  ;;  %v1873_v28 = vrot.slane %v1867_v19, 6  ;;  %v1902_v29 = vmul.f32 %v1900_v21, %v3292_v17  ;;  %v1901_v31 = vmul.f32 %v1900_v21, %v3283_v10  ;;  %v1921_v32 = vstv %s2847_s29  ;;  %s2792_s29 = sld [smem:[#allocation3 + $0x16]] }
 0x529   : > { %v1872_v34 = vrot.slane %v1866_v20, 6  ;;  %v1923_v38 = vmul.f32 %v1921_v32, %v3292_v17  ;;  %v1924_v1 = vmul.f32 %v1921_v32, %v3341_v50 }
 0x52a   : > { %1220 = vrot.lane.b32.xlu0 %v1216_v33, %s3069_s17  ;;  %v1813_v33 = vsel %vm590_vm9, %v1810_v61, %v1812_v25  ;;  %v1908_v8 = vrot.slane %v1902_v29, 1  ;;  %v1984_v61 = vstv %s2850_s6  ;;  %v1876_v62 = vsel %vm385_vm4, %v1873_v28, %v1875_v54  ;;  %s2795_s6 = sld [smem:[#allocation3 + $0x2b]] }
 0x52b   : > { %v1874_v37 = vsel %vm385_vm4, %v1872_v34, %v1873_v28  ;;  %v1929_v48 = vrot.slane %v1923_v38, 2  ;;  %v1986_v4 = vmul.f32 %v1984_v61, %v3292_v17  ;;  %v1931_v11 = vrot.slane %v1924_v1, 2 }
 0x52c   : > { %942 = vrot.lane.b32.xlu1 %v937_v35, %s3067_s21  ;;  %v1833_v35 = vrot.slane %v1826_v26, 4  ;;  %v2061_v28 = vstv %s2854_s25  ;;  %s2799_s25 = sld [smem:[#allocation3 + $0x17]] }
 0x52d   : > { %v1992_v14 = vrot.slane %v1986_v4, 5  ;;  %v1932_v19 = vsel %vm592_vm10, %v1929_v48, %v1931_v11 }
 0x52e   : > { %1360 = vrot.lane.b32.xlu0 %v1356_v36, %s3070_s19  ;;  %v1847_v36 = vmul.f32 %v1844_v0, %v3341_v50  ;;  %v1834_v40 = vsel %vm588_vm8, %v1831_v6, %v1833_v35  ;;  %v1910_v0 = vrot.slane %v1903_v56, 1  ;;  %v2005_v6 = vstv %s2851_s18  ;;  %s2797_s18 = sld [smem:[#allocation3 + $0x9]] }
 0x52f   : > { %v2007_v15 = vmul.f32 %v2005_v6, %v3292_v17 }
 0x530   : > { %1082 = vrot.lane.b32.xlu1 %v1077_v39, %s3068_s22  ;;  %v1922_v39 = vmul.f32 %v1921_v32, %v3283_v10  ;;  %v1854_v44 = vrot.slane %v1847_v36, 5  ;;  %v1911_v7 = vsel %vm594_vm11, %v1908_v8, %v1910_v0  ;;  %v2063_v36 = vmul.f32 %v2061_v28, %v3292_v17 }
 0x531   : > { %v2013_v25 = vrot.slane %v2007_v15, 6 }
 0x532   : > { %1500 = vrot.lane.b32.xlu0 %v1496_v43, %s3071_s24  ;;  %v1907_v43 = vrot.slane %v1901_v31, 1  ;;  %v1928_v51 = vrot.slane %v1922_v39, 2  ;;  %v1855_v53 = vsel %vm586_vm7, %v1852_v18, %v1854_v44  ;;  %v2040_v18 = vstv %s2853_s20  ;;  %s2798_s20 = sld [smem:[#allocation3 + $0x10]] }
 0x533   : > { %v2042_v26 = vmul.f32 %v2040_v18, %v3292_v17  ;;  %v2069_v45 = vrot.slane %v2063_v36, 2  ;;  %v2043_v49 = vmul.f32 %v2040_v18, %v3341_v50 }
 0x534   : > { %1222 = vrot.lane.b32.xlu1 %v1217_v47, %s3069_s17  ;;  %v1909_v47 = vsel %vm594_vm11, %v1907_v43, %v1908_v8  ;;  %v1930_v57 = vsel %vm592_vm10, %v1928_v51, %v1929_v48  ;;  %v809_v43 = vstv %s2790_s27  ;;  %v830_v51 = vstv %s2791_s28  ;;  %s2800_s27 = sld [smem:[#allocation3 + $0x1e]]  ;;  %s2801_s28 = sld [smem:[#allocation3 + $0x25]] }
 0x535   : > { %v2048_v35 = vrot.slane %v2042_v26, 1  ;;  %v810_v48 = vmul.f32 %v809_v43, %v3303_v23  ;;  %v832_v54 = vmul.f32 %v830_v51, %v3316_v30 }
 0x536   : > { %1772 = vrot.lane.b32.xlu0 %v1769_v52, %s3057_s7  ;;  %v1963_v52 = vstv %s2849_s5  ;;  %s2794_s5 = sld [smem:[#allocation3 + $0x24]] }
 0x537   : > { %v1965_v59 = vmul.f32 %v1963_v52, %v3292_v17 }
 0x538   : > { %1362 = vrot.lane.b32.xlu1 %v1357_v55, %s3070_s19  ;;  %v1943_v55 = vmul.f32 %v1942_v46, %v3283_v10 }
 0x539   : > { %v1971_v3 = vrot.slane %v1965_v59, 4  ;;  %v831_v59 = vmul.f32 %v830_v51, %v3303_v23 }
 0x53a   : > { %1793 = vrot.lane.b32.xlu0 %v1790_v60, %s3057_s7  ;;  %v1964_v60 = vmul.f32 %v1963_v52, %v3283_v10 }
 0x53c   : > { %1502 = vrot.lane.b32.xlu1 %v1497_v63, %s3071_s24  ;;  %v1949_v63 = vrot.slane %v1943_v55, 3  ;;  %v1970_v9 = vrot.slane %v1964_v60, 4  ;;  %v2064_v55 = vmul.f32 %v2061_v28, %v3341_v50  ;;  %v3441_v60 = vld [vmem:[#allocation2 + $0x10] sm:$0x3f] }
 0x53d   : > { %v812_v4 = vmul.f32 %v809_v43, %v3441_v60 }
 0x53e   : > { %1814 = vrot.lane.b32.xlu0 %v1811_v5, %s3057_s7  ;;  %v1951_v2 = vsel %vm590_vm9, %v1949_v63, %v1950_v58  ;;  %v1985_v5 = vmul.f32 %v1984_v61, %v3283_v10  ;;  %v1972_v13 = vsel %vm588_vm8, %v1970_v9, %v1971_v3  ;;  %v838_v63 = vrot.slane %v832_v54, 2 }
 0x540   : > { %1774 = vrot.lane.b32.xlu1 %v1771_v12, %s3057_s7  ;;  %v1945_v12 = vmul.f32 %v1942_v46, %v3341_v50  ;;  %v1991_v20 = vrot.slane %v1985_v5, 5  ;;  %v811_v46 = vmul.f32 %v809_v43, %v3316_v30  ;;  %v872_v5 = vstv %s2793_s30  ;;  %s2804_s30 = sld [smem:[#allocation3 + $0xa]] }
 0x541   : > { %v874_v9 = vmul.f32 %v872_v5, %v3316_v30  ;;  %v873_v15 = vmul.f32 %v872_v5, %v3303_v23  ;;  %v970_v43 = vstv %s2798_s20  ;;  %s2809_s20 = sld [smem:[#allocation3 + $0x2d]] }
 0x542   : > { %1835 = vrot.lane.b32.xlu0 %v1832_v16, %s3057_s7  ;;  %v2006_v16 = vmul.f32 %v2005_v6, %v3283_v10  ;;  %v1952_v21 = vrot.slane %v1945_v12, 3  ;;  %v1993_v24 = vsel %vm586_vm7, %v1991_v20, %v1992_v14  ;;  %v893_v12 = vstv %s2794_s5  ;;  %s2806_s5 = sld [smem:[#allocation3 + $0x18]] }
 0x543   : > { %v895_v20 = vmul.f32 %v893_v12, %v3316_v30 }
 0x544   : > { %1795 = vrot.lane.b32.xlu1 %v1792_v22, %s3057_s7  ;;  %v1966_v22 = vmul.f32 %v1963_v52, %v3341_v50  ;;  %v1953_v29 = vsel %vm590_vm9, %v1950_v58, %v1952_v21  ;;  %v2012_v31 = vrot.slane %v2006_v16, 6  ;;  %v2050_v58 = vrot.slane %v2043_v49, 1 }
 0x545   : > { %v833_v16 = vmul.f32 %v830_v51, %v3441_v60  ;;  %v894_v21 = vmul.f32 %v893_v12, %v3303_v23  ;;  %v972_v49 = vmul.f32 %v970_v43, %v3316_v30  ;;  %v971_v51 = vmul.f32 %v970_v43, %v3303_v23 }
 0x546   : > { %1856 = vrot.lane.b32.xlu0 %v1853_v27, %s3057_s7  ;;  %v2041_v27 = vmul.f32 %v2040_v18, %v3283_v10  ;;  %v1973_v32 = vrot.slane %v1966_v22, 4  ;;  %v2014_v34 = vsel %vm385_vm4, %v2012_v31, %v2013_v25  ;;  %v2051_v1 = vsel %vm594_vm11, %v2048_v35, %v2050_v58 }
 0x547   : > { %v914_v22 = vstv %s2795_s6  ;;  %v840_v26 = vrot.slane %v833_v16, 2  ;;  %v978_v58 = vrot.slane %v972_v49, 2  ;;  %s2807_s6 = sld [smem:[#allocation3 + $0x1f]] }
 0x548   : > { %1816 = vrot.lane.b32.xlu1 %v1813_v33, %s3057_s7  ;;  %v1987_v33 = vmul.f32 %v1984_v61, %v3341_v50  ;;  %v1974_v8 = vsel %vm588_vm8, %v1971_v3, %v1973_v32  ;;  %v2047_v38 = vrot.slane %v2041_v27, 1  ;;  %v851_v61 = vstv %s2792_s29  ;;  %s2802_s29 = sld [smem:[#allocation3 + $0x2c]] }
 0x549   : > { %v853_v0 = vmul.f32 %v851_v61, %v3316_v30  ;;  %v852_v3 = vmul.f32 %v851_v61, %v3303_v23  ;;  %v854_v27 = vmul.f32 %v851_v61, %v3441_v60  ;;  %v916_v31 = vmul.f32 %v914_v22, %v3316_v30 }
 0x54a   : > { %1877 = vrot.lane.b32.xlu0 %v1874_v37, %s3057_s7  ;;  %v2062_v37 = vmul.f32 %v2061_v28, %v3283_v10  ;;  %v1994_v39 = vrot.slane %v1987_v33, 5  ;;  %v2049_v44 = vsel %vm594_vm11, %v2047_v38, %v2048_v35  ;;  %v915_v32 = vmul.f32 %v914_v22, %v3303_v23 }
 0x54b   : > { %v949_v33 = vstv %s2797_s18  ;;  %v900_v35 = vrot.slane %v894_v21, 5  ;;  %v861_v36 = vrot.slane %v854_v27, 3  ;;  %v922_v38 = vrot.slane %v916_v31, 6  ;;  %s2808_s18 = sld [smem:[#allocation3 + $0x26]] }
 0x54c   : > { %1837 = vrot.lane.b32.xlu1 %v1834_v40, %s3057_s7  ;;  %v2008_v40 = vmul.f32 %v2005_v6, %v3341_v50  ;;  %v2068_v17 = vrot.slane %v2062_v37, 2  ;;  %v1995_v10 = vsel %vm586_vm7, %v1992_v14, %v1994_v39  ;;  %v2071_v50 = vrot.slane %v2064_v55, 2 }
 0x54d   : > { %v819_v14 = vrot.slane %v812_v4, 1  ;;  %v875_v37 = vmul.f32 %v872_v5, %v3441_v60  ;;  %v951_v39 = vmul.f32 %v949_v33, %v3316_v30 }
 0x54e   : > { %1912 = vrot.lane.b32.xlu0 %v1909_v47, %s3067_s21  ;;  %v2015_v47 = vrot.slane %v2008_v40, 6  ;;  %v2070_v52 = vsel %vm592_vm10, %v2068_v17, %v2069_v45  ;;  %v2072_v11 = vsel %vm592_vm10, %v2069_v45, %v2071_v50  ;;  %v950_v40 = vmul.f32 %v949_v33, %v3303_v23 }
 0x54f   : > { %v921_v45 = vrot.slane %v915_v32, 6  ;;  %v896_v17 = vmul.f32 %v893_v12, %v3441_v60 }
 0x550   : > { %1858 = vrot.lane.b32.xlu1 %v1855_v53, %s3057_s7  ;;  %v817_v53 = vrot.slane %v811_v46, 1  ;;  %v2016_v56 = vsel %vm385_vm4, %v2013_v25, %v2015_v47  ;;  %v879_v25 = vrot.slane %v873_v15, 4  ;;  %v882_v46 = vrot.slane %v875_v37, 4 }
 0x551   : > { %v923_v47 = vsel %vm385_vm4, %v921_v45, %v922_v38  ;;  %v956_v54 = vrot.slane %v950_v40, 1  ;;  %v903_v55 = vrot.slane %v896_v17, 5 }
 0x552   : > { %1933 = vrot.lane.b32.xlu0 %v1930_v57, %s3067_s21  ;;  %v816_v57 = vrot.slane %v810_v48, 1  ;;  %v957_v48 = vrot.slane %v951_v39, 1 }
 0x554   : > { %1879 = vrot.lane.b32.xlu1 %v1876_v62, %s3057_s7  ;;  %v818_v62 = vsel %vm594_vm11, %v816_v57, %v817_v53  ;;  %v958_v57 = vsel %vm594_vm11, %v956_v54, %v957_v48 }
 0x556   : > { %1954 = vrot.lane.b32.xlu0 %v1951_v2, %s3067_s21  ;;  %v837_v2 = vrot.slane %v831_v59, 2 }
 0x558   : > { %1914 = vrot.lane.b32.xlu1 %v1911_v7, %s3067_s21  ;;  %v839_v6 = vsel %vm592_vm10, %v837_v2, %v838_v63  ;;  %v859_v7 = vrot.slane %v853_v0, 3  ;;  %v977_v0 = vrot.slane %v971_v51, 2  ;;  %v1012_v2 = vstv %s2800_s27  ;;  %s2813_s27 = sld [smem:[#allocation3 + $0x19]] }
 0x559   : > { %v3499_v5 = vmul.f32 %v1012_v2, %v3316_v30 }
 0x55a   : > { %1975 = vrot.lane.b32.xlu0 %v1972_v13, %s3067_s21  ;;  %v858_v13 = vrot.slane %v852_v3, 3  ;;  %v979_v3 = vsel %vm592_vm10, %v977_v0, %v978_v58 }
 0x55c   : > { %1935 = vrot.lane.b32.xlu1 %v1932_v19, %s3067_s21  ;;  %v860_v18 = vsel %vm590_vm9, %v858_v13, %v859_v7  ;;  %v880_v19 = vrot.slane %v874_v9, 4  ;;  %v1033_v9 = vstv %s2801_s28  ;;  %v1013_v13 = vmul.f32 %v1012_v2, %v3303_v23  ;;  %s2814_s28 = sld [smem:[#allocation3 + $0x20]] }
 0x55e   : > { %1996 = vrot.lane.b32.xlu0 %v1993_v24, %s3067_s21  ;;  %v820_v24 = vsel %vm594_vm11, %v817_v53, %v819_v14  ;;  %v881_v28 = vsel %vm588_vm8, %v879_v25, %v880_v19  ;;  %v883_v53 = vsel %vm588_vm8, %v880_v19, %v882_v46  ;;  %v973_v14 = vmul.f32 %v970_v43, %v3441_v60 }
 0x55f   : > { %v1035_v19 = vmul.f32 %v1033_v9, %v3316_v30 }
 0x560   : > { %1956 = vrot.lane.b32.xlu1 %v1953_v29, %s3067_s21  ;;  %v901_v29 = vrot.slane %v895_v20, 5  ;;  %v1034_v20 = vmul.f32 %v1033_v9, %v3303_v23 }
 0x561   : > { %v1041_v31 = vrot.slane %v1035_v19, 5 }
 0x562   : > { %2017 = vrot.lane.b32.xlu0 %v2014_v34, %s3067_s21  ;;  %v841_v34 = vsel %vm592_vm10, %v838_v63, %v840_v26  ;;  %v904_v63 = vsel %vm586_vm7, %v901_v29, %v903_v55 }
 0x564   : > { %1977 = vrot.lane.b32.xlu1 %v1974_v8, %s3067_s21  ;;  %v902_v8 = vsel %vm586_vm7, %v900_v35, %v901_v29 }
 0x566   : > { %2052 = vrot.lane.b32.xlu0 %v2049_v44, %s3068_s22  ;;  %v862_v44 = vsel %vm590_vm9, %v859_v7, %v861_v36 }
 0x568   : > { %1998 = vrot.lane.b32.xlu1 %v1995_v10, %s3067_s21  ;;  %v3478_v10 = vpop.permute.xlu0 %1751 }
 0x569   : > { %4724 = vst [vmem:[#allocation8_spill] sm:$0xff] %v3478_v10 }
 0x56a   : > { %2073 = vrot.lane.b32.xlu0 %v2070_v52, %s3068_s22  ;;  %v991_v52 = vstv %s2799_s25  ;;  %s2811_s25 = sld [smem:[#allocation3 + $0xb]] }
 0x56b   : > { %v993_v59 = vmul.f32 %v991_v52, %v3316_v30  ;;  %v994_v25 = vmul.f32 %v991_v52, %v3441_v60 }
 0x56c   : > { %2019 = vrot.lane.b32.xlu1 %v2016_v56, %s3067_s21  ;;  %v917_v56 = vmul.f32 %v914_v22, %v3441_v60  ;;  %v3490_v61 = vpop.permute.xlu0 %1891  ;;  %v1019_v22 = vrot.slane %v1013_v13, 4  ;;  %v1152_v13 = vstv %s2807_s6  ;;  %s2820_s6 = sld [smem:[#allocation3 + $0x1a]] }
 0x56d   : > { %4725 = vst [vmem:[#allocation9_spill] sm:$0xff] %v3490_v61  ;;  %v999_v4 = vrot.slane %v993_v59, 3  ;;  %v1001_v36 = vrot.slane %v994_v25, 3  ;;  %v1153_v25 = vmul.f32 %v1152_v13, %v3303_v23 }
 0x56e   : > { %821 = vrot.lane.b32.xlu0 %v818_v62, %s3057_s7  ;;  %v992_v62 = vmul.f32 %v991_v52, %v3303_v23  ;;  %v924_v50 = vrot.slane %v917_v56, 6 }
 0x56f   : > { %v1002_v46 = vsel %vm590_vm9, %v999_v4, %v1001_v36 }
 0x570   : > { %2054 = vrot.lane.b32.xlu1 %v2051_v1, %s3068_s22  ;;  %v952_v1 = vmul.f32 %v949_v33, %v3441_v60  ;;  %v998_v7 = vrot.slane %v992_v62, 3  ;;  %v3507_v15 = vpop.permute.xlu0 %2031  ;;  %v1040_v33 = vrot.slane %v1034_v20, 5 }
 0x571   : > { %4727 = vst [vmem:[#allocation11_spill] sm:$0xff] %v3507_v15 }
 0x572   : > { %842 = vrot.lane.b32.xlu0 %v839_v6, %s3057_s7  ;;  %v3501_v6 = vpop.permute.xlu1 %1753  ;;  %v959_v12 = vrot.slane %v952_v1, 1  ;;  %v1000_v16 = vsel %vm590_vm9, %v998_v7, %v999_v4  ;;  %v1042_v39 = vsel %vm586_vm7, %v1040_v33, %v1041_v31 }
 0x573   : > { %4726 = vst [vmem:[#allocation10_spill] sm:$0xff] %v3501_v6 }
 0x574   : > { %2075 = vrot.lane.b32.xlu1 %v2072_v11, %s3068_s22  ;;  %v925_v11 = vsel %vm385_vm4, %v922_v38, %v924_v50  ;;  %v960_v21 = vsel %vm594_vm11, %v957_v48, %v959_v12  ;;  %v1036_v48 = vmul.f32 %v1033_v9, %v3441_v60 }
 0x576   : > { %863 = vrot.lane.b32.xlu0 %v860_v18, %s3057_s7  ;;  %v1020_v18 = vrot.slane %v3499_v5, 4  ;;  %v3517_v26 = vpop.permute.xlu1 %1893  ;;  %v1043_v59 = vrot.slane %v1036_v48, 5 }
 0x577   : > { %4728 = vst [vmem:[#allocation12_spill] sm:$0xff] %v3517_v26 }
 0x578   : > { %823 = vrot.lane.b32.xlu1 %v820_v24, %s3057_s7  ;;  %v980_v24 = vrot.slane %v973_v14, 2  ;;  %v1021_v29 = vsel %vm588_vm8, %v1019_v22, %v1020_v18  ;;  %v1044_v5 = vsel %vm586_vm7, %v1041_v31, %v1043_v59 }
 0x57a   : > { %884 = vrot.lane.b32.xlu0 %v881_v28, %s3057_s7  ;;  %v1054_v28 = vstv %s2802_s29  ;;  %v981_v35 = vsel %vm592_vm10, %v978_v58, %v980_v24  ;;  %s2815_s29 = sld [smem:[#allocation3 + $0x27]] }
 0x57b   : > { %v3524_v32 = vmul.f32 %v1054_v28, %v3316_v30  ;;  %v1055_v37 = vmul.f32 %v1054_v28, %v3303_v23 }
 0x57c   : > { %844 = vrot.lane.b32.xlu1 %v841_v34, %s3057_s7  ;;  %v1089_v34 = vstv %s2804_s30  ;;  %s2816_s30 = sld [smem:[#allocation3 + $0x2e]] }
 0x57d   : > { %v1062_v40 = vrot.slane %v3524_v32, 6  ;;  %v1091_v43 = vmul.f32 %v1089_v34, %v3316_v30  ;;  %v1090_v45 = vmul.f32 %v1089_v34, %v3303_v23  ;;  %v1061_v17 = vrot.slane %v1055_v37, 6 }
 0x57e   : > { %905 = vrot.lane.b32.xlu0 %v902_v8, %s3057_s7  ;;  %v1015_v8 = vmul.f32 %v1012_v2, %v3441_v60  ;;  %v1159_v37 = vrot.slane %v1153_v25, 4 }
 0x57f   : > { %v1063_v52 = vsel %vm385_vm4, %v1061_v17, %v1062_v40  ;;  %v1096_v56 = vrot.slane %v1090_v45, 1 }
 0x580   : > { %865 = vrot.lane.b32.xlu1 %v862_v44, %s3057_s7  ;;  %v3536_v44 = vpop.permute.xlu1 %2033 }
 0x581   : > { %4729 = vst [vmem:[#allocation13_spill] sm:$0xff] %v3536_v44 }
 0x582   : > { %926 = vrot.lane.b32.xlu0 %v923_v47, %s3057_s7  ;;  %v1022_v47 = vrot.slane %v1015_v8, 4 }
 0x584   : > { %886 = vrot.lane.b32.xlu1 %v883_v53, %s3057_s7  ;;  %v1097_v53 = vrot.slane %v1091_v43, 1  ;;  %v1023_v58 = vsel %vm588_vm8, %v1020_v18, %v1022_v47  ;;  %v3572_v18 = vmul.f32 %v1152_v13, %v3316_v30  ;;  %v1194_v43 = vstv %s2809_s20  ;;  %s2822_s20 = sld [smem:[#allocation3 + $0x28]] }
 0x585   : > { %v3597_v17 = vmul.f32 %v1194_v43, %v3316_v30  ;;  %v1197_v25 = vmul.f32 %v1194_v43, %v3441_v60 }
 0x586   : > { %961 = vrot.lane.b32.xlu0 %v958_v57, %s3067_s21  ;;  %v1131_v57 = vstv %s2806_s5  ;;  %v1098_v50 = vsel %vm594_vm11, %v1096_v56, %v1097_v53  ;;  %v1160_v32 = vrot.slane %v3572_v18, 4  ;;  %v1155_v56 = vmul.f32 %v1152_v13, %v3441_v60  ;;  %s2819_s5 = sld [smem:[#allocation3 + $0x13]] }
 0x587   : > { %v1133_v2 = vmul.f32 %v1131_v57, %v3316_v30  ;;  %v1132_v4 = vmul.f32 %v1131_v57, %v3303_v23  ;;  %v1202_v59 = vrot.slane %v3597_v17, 6  ;;  %v1292_v17 = vstv %s2814_s28  ;;  %s3765_s28 = sld [smem:[#allocation3]] }
 0x588   : > { %907 = vrot.lane.b32.xlu1 %v904_v63, %s3057_s7  ;;  %v1057_v63 = vmul.f32 %v1054_v28, %v3441_v60  ;;  %v1161_v45 = vsel %vm588_vm8, %v1159_v37, %v1160_v32 }
 0x589   : > { %v1138_v20 = vrot.slane %v1132_v4, 3  ;;  %v1162_v4 = vrot.slane %v1155_v56, 4  ;;  %v1313_v56 = vstv %s2815_s29  ;;  %s3774_s29 = sld [smem:[#allocation3 + $0x7]] }
 0x58a   : > { %982 = vrot.lane.b32.xlu0 %v979_v3, %s3067_s21  ;;  %v1064_v9 = vrot.slane %v1057_v63, 6 }
 0x58c   : > { %928 = vrot.lane.b32.xlu1 %v925_v11, %s3057_s7  ;;  %s2805_s7 = sld [smem:[#allocation3 + $0x11]]  ;;  %v1092_v11 = vmul.f32 %v1089_v34, %v3441_v60  ;;  %v1065_v22 = vsel %vm385_vm4, %v1062_v40, %v1064_v9 }
 0x58e   : > { %1003 = vrot.lane.b32.xlu0 %v1000_v16, %s3067_s21  ;;  %v1139_v16 = vrot.slane %v1133_v2, 3  ;;  %v1099_v24 = vrot.slane %v1092_v11, 1 }
 0x590   : > { %v3519_v27 = vpop.permute.xlu0 %800  ;;  %963 = vrot.lane.b32.xlu1 %v960_v21, %s3067_s21  ;;  %v1173_v21 = vstv %s2808_s18  ;;  %v1140_v31 = vsel %vm590_vm9, %v1138_v20, %v1139_v16  ;;  %v1100_v36 = vsel %vm594_vm11, %v1097_v53, %v1099_v24  ;;  %v1271_v20 = vstv %s2813_s27  ;;  %s2821_s18 = sld [smem:[#allocation3 + $0x21]]  ;;  %s3763_s27 = sld [smem:[#allocation3 + $0x14]] }
 0x591   : > { %v1175_v33 = vmul.f32 %v1173_v21, %v3316_v30 }
 0x592   : > { %1024 = vrot.lane.b32.xlu0 %v1021_v29, %s3067_s21  ;;  %v1110_v51 = vstv %s2805_s7  ;;  %s2818_s7 = sld [smem:[#allocation3 + $0xc]] }
 0x593   : > { %v3547_v54 = vmul.f32 %v1110_v51, %v3316_v30  ;;  %v1111_v62 = vmul.f32 %v1110_v51, %v3303_v23  ;;  %v1113_v28 = vmul.f32 %v1110_v51, %v3441_v60  ;;  %v1229_v51 = vstv %s2811_s25  ;;  %s2823_s25 = sld [smem:[#allocation3 + $0x2f]] }
 0x594   : > { %v3530_v38 = vpop.permute.xlu0 %940  ;;  %984 = vrot.lane.b32.xlu1 %v981_v35, %s3067_s21  ;;  %v1174_v35 = vmul.f32 %v1173_v21, %v3303_v23 }
 0x595   : > { %v1118_v1 = vrot.slane %v3547_v54, 2  ;;  %v1117_v7 = vrot.slane %v1111_v62, 2  ;;  %v1120_v8 = vrot.slane %v1113_v28, 2  ;;  %v1195_v54 = vmul.f32 %v1194_v43, %v3303_v23 }
 0x596   : > { %1045 = vrot.lane.b32.xlu0 %v1042_v39, %s3067_s21  ;;  %v1134_v39 = vmul.f32 %v1131_v57, %v3441_v60  ;;  %v1180_v48 = vrot.slane %v1174_v35, 5  ;;  %v1231_v62 = vmul.f32 %v1229_v51, %v3316_v30  ;;  %v3636_v35 = vmul.f32 %v1271_v20, %v3316_v30 }
 0x597   : > { %v1119_v14 = vsel %vm592_vm10, %v1117_v7, %v1118_v1  ;;  %v1201_v2 = vrot.slane %v1195_v54, 6  ;;  %v1232_v43 = vmul.f32 %v1229_v51, %v3441_v60 }
 0x598   : > { %v3542_v49 = vpop.permute.xlu0 %1080  ;;  %1005 = vrot.lane.b32.xlu1 %v1002_v46, %s3067_s21  ;;  %v1181_v46 = vrot.slane %v1175_v33, 5  ;;  %v1141_v53 = vrot.slane %v1134_v39, 3  ;;  %v1237_v13 = vrot.slane %v1231_v62, 1  ;;  %v1204_v39 = vrot.slane %v1197_v25, 6 }
 0x599   : > { %v1203_v11 = vsel %vm385_vm4, %v1201_v2, %v1202_v59  ;;  %v1293_v62 = vmul.f32 %v1292_v17, %v3303_v23 }
 0x59a   : > { %1066 = vrot.lane.b32.xlu0 %v1063_v52, %s3067_s21  ;;  %v3550_v55 = vpop.permute.xlu1 %802  ;;  %v1121_v52 = vsel %vm592_vm10, %v1118_v1, %v1120_v8  ;;  %v1142_v1 = vsel %vm590_vm9, %v1139_v16, %v1141_v53  ;;  %v3650_v53 = vmul.f32 %v1292_v17, %v3316_v30 }
 0x59c   : > { %v3555_v0 = vpop.permute.xlu0 %1220  ;;  %1026 = vrot.lane.b32.xlu1 %v1023_v58, %s3067_s21  ;;  %v1182_v58 = vsel %vm586_vm7, %v1180_v48, %v1181_v46 }
 0x59d   : > { %4730 = vst [vmem:[#allocation14_spill] sm:$0xff] %v3555_v0 }
 0x59e   : > { %1101 = vrot.lane.b32.xlu0 %v1098_v50, %s3068_s22  ;;  %v3562_v3 = vpop.permute.xlu1 %942  ;;  %v1230_v50 = vmul.f32 %v1229_v51, %v3303_v23  ;;  %v1205_v51 = vsel %vm385_vm4, %v1202_v59, %v1204_v39  ;;  %v1314_v59 = vmul.f32 %v1313_v56, %v3303_v23 }
 0x5a0   : > { %v3567_v12 = vpop.permute.xlu0 %1360  ;;  %1047 = vrot.lane.b32.xlu1 %v1044_v5, %s3067_s21  ;;  %v1176_v5 = vmul.f32 %v1173_v21, %v3441_v60  ;;  %v1236_v16 = vrot.slane %v1230_v50, 1  ;;  %v1163_v21 = vsel %vm588_vm8, %v1160_v32, %v1162_v4  ;;  %v1272_v32 = vmul.f32 %v1271_v20, %v3303_v23 }
 0x5a1   : > { %4731 = vst [vmem:[#allocation15_spill] sm:$0xff] %v3567_v12  ;;  %v1300_v4 = vrot.slane %v3650_v53, 4 }
 0x5a2   : > { %1122 = vrot.lane.b32.xlu0 %v1119_v14, %s3068_s22  ;;  %v3575_v19 = vpop.permute.xlu1 %1082  ;;  %v1278_v54 = vrot.slane %v1272_v32, 3  ;;  %v1320_v32 = vrot.slane %v1314_v59, 5 }
 0x5a4   : > { %v3580_v29 = vpop.permute.xlu0 %1500  ;;  %1068 = vrot.lane.b32.xlu1 %v1065_v22, %s3067_s21  ;;  %s2812_s21 = sld [smem:[#allocation3 + $0x12]]  ;;  %v1183_v22 = vrot.slane %v1176_v5, 5  ;;  %v3664_v5 = vmul.f32 %v1313_v56, %v3316_v30 }
 0x5a5   : > { %4732 = vst [vmem:[#allocation16_spill] sm:$0xff] %v3580_v29 }
 0x5a6   : > { %1143 = vrot.lane.b32.xlu0 %v1140_v31, %s3068_s22  ;;  %v3587_v34 = vpop.permute.xlu1 %1222  ;;  %v1238_v31 = vsel %vm594_vm11, %v1236_v16, %v1237_v13  ;;  %v1184_v37 = vsel %vm586_vm7, %v1181_v46, %v1183_v22 }
 0x5a7   : > { %4733 = vst [vmem:[#allocation17_spill] sm:$0xff] %v3587_v34 }
 0x5a8   : > { %v3592_v40 = vpop.permute.xlu0 %1772  ;;  %1103 = vrot.lane.b32.xlu1 %v1100_v36, %s3068_s22 }
 0x5a9   : > { %4734 = vst [vmem:[#allocation18_spill] sm:$0xff] %v3592_v40 }
 0x5aa   : > { %1164 = vrot.lane.b32.xlu0 %v1161_v45, %s3068_s22  ;;  %v3600_v47 = vpop.permute.xlu1 %1362  ;;  %v1250_v9 = vstv %s2812_s21  ;;  %s2825_s21 = sld [smem:[#allocation3 + $0xd]] }
 0x5ab   : > { %4735 = vst [vmem:[#allocation19_spill] sm:$0xff] %v3600_v47  ;;  %v3622_v14 = vmul.f32 %v1250_v9, %v3316_v30  ;;  %v1251_v24 = vmul.f32 %v1250_v9, %v3303_v23  ;;  %v1253_v50 = vmul.f32 %v1250_v9, %v3441_v60  ;;  %v1299_v9 = vrot.slane %v1293_v62, 4 }
 0x5ac   : > { %v3605_v57 = vpop.permute.xlu0 %1793  ;;  %1124 = vrot.lane.b32.xlu1 %v1121_v52, %s3068_s22  ;;  %v1279_v52 = vrot.slane %v3636_v35, 3 }
 0x5ad   : > { %4736 = vst [vmem:[#allocation20_spill] sm:$0xff] %v3605_v57  ;;  %v1258_v33 = vrot.slane %v3622_v14, 2  ;;  %v1257_v8 = vrot.slane %v1251_v24, 2  ;;  %v1260_v16 = vrot.slane %v1253_v50, 2  ;;  %v1334_v24 = vstv %s2816_s30  ;;  %s3781_s30 = sld [smem:[#allocation3 + $0x1b]] }
 0x5ae   : > { %1185 = vrot.lane.b32.xlu0 %v1182_v58, %s3068_s22  ;;  %v3612_v63 = vpop.permute.xlu1 %1502  ;;  %v1239_v58 = vrot.slane %v1232_v43, 1  ;;  %v1280_v2 = vsel %vm590_vm9, %v1278_v54, %v1279_v52  ;;  %v1301_v25 = vsel %vm588_vm8, %v1299_v9, %v1300_v4  ;;  %v3678_v35 = vmul.f32 %v1334_v24, %v3316_v30  ;;  %v3707_v9 = vld [vmem:[#allocation2 + $0x8] sm:$0xff] }
 0x5af   : > { %4737 = vst [vmem:[#allocation21_spill] sm:$0xff] %v3612_v63  ;;  %v1259_v48 = vsel %vm592_vm10, %v1257_v8, %v1258_v33  ;;  %v1335_v39 = vmul.f32 %v1334_v24, %v3303_v23  ;;  %v1295_v43 = vmul.f32 %v1292_v17, %v3441_v60 }
 0x5b0   : > { %v3617_v7 = vpop.permute.xlu0 %1814  ;;  %1145 = vrot.lane.b32.xlu1 %v1142_v1, %s3068_s22  ;;  %v1240_v14 = vsel %vm594_vm11, %v1237_v13, %v1239_v58  ;;  %v1342_v54 = vrot.slane %v3678_v35, 6 }
 0x5b1   : > { %4738 = vst [vmem:[#allocation22_spill] sm:$0xff] %v3617_v7  ;;  %v1341_v62 = vrot.slane %v1335_v39, 6  ;;  %v1302_v50 = vrot.slane %v1295_v43, 4 }
 0x5b2   : > { %1206 = vrot.lane.b32.xlu0 %v1203_v11, %s3068_s22  ;;  %v3625_v18 = vpop.permute.xlu1 %1774 }
 0x5b3   : > { %4739 = vst [vmem:[#allocation23_spill] sm:$0xff] %v3625_v18  ;;  %v1343_v59 = vsel %vm385_vm4, %v1341_v62, %v1342_v54 }
 0x5b4   : > { %v3630_v28 = vpop.permute.xlu0 %1835  ;;  %1166 = vrot.lane.b32.xlu1 %v1163_v21, %s3068_s22  ;;  %v1274_v21 = vmul.f32 %v1271_v20, %v3441_v60  ;;  %v1261_v20 = vsel %vm592_vm10, %v1258_v33, %v1260_v16  ;;  %v3697_v33 = vld [vmem:[#allocation2] sm:$0xff] }
 0x5b5   : > { %4740 = vst [vmem:[#allocation24_spill] sm:$0xff] %v3630_v28 }
 0x5b6   : > { %1241 = vrot.lane.b32.xlu0 %v1238_v31, %s3069_s17  ;;  %v3639_v36 = vpop.permute.xlu1 %1795  ;;  %v1321_v31 = vrot.slane %v3664_v5, 5  ;;  %v1281_v8 = vrot.slane %v1274_v21, 3  ;;  %v1411_v21 = vstv %s2820_s6  ;;  %s3790_s6 = sld [smem:[#allocation3 + $0x1c]] }
 0x5b7   : > { %4741 = vst [vmem:[#allocation25_spill] sm:$0xff] %v3639_v36  ;;  %v1414_v42 = vmul.f32 %v1411_v21, %v3441_v60  ;;  %v4771_v36 = vstv %s3765_s28 }
 0x5b8   : > { %v3644_v45 = vpop.permute.xlu0 %1856  ;;  %1187 = vrot.lane.b32.xlu1 %v1184_v37, %s3068_s22  ;;  %v1369_v37 = vstv %s2818_s7  ;;  %v1322_v53 = vsel %vm586_vm7, %v1320_v32, %v1321_v31  ;;  %v1282_v17 = vsel %vm590_vm9, %v1279_v52, %v1281_v8  ;;  %s3783_s7 = sld [smem:[#allocation3 + $0xe]]  ;;  %v688_v61 = vmul.f32 %v3697_v33, %v4771_v36 }
 0x5b9   : > { %4742 = vst [vmem:[#allocation26_spill] sm:$0xff] %v3644_v45  ;;  %v1370_v23 = vmul.f32 %v3697_v33, %v1369_v37  ;;  %v1372_v62 = vmul.f32 %v1369_v37, %v3441_v60 }
 0x5ba   : > { %1262 = vrot.lane.b32.xlu0 %v1259_v48, %s3069_s17  ;;  %v3653_v46 = vpop.permute.xlu1 %1816 }
 0x5bb   : > { %4743 = vst [vmem:[#allocation27_spill] sm:$0xff] %v3653_v46 }
 0x5bc   : > { %v3658_v1 = vpop.permute.xlu0 %1877  ;;  %1208 = vrot.lane.b32.xlu1 %v1205_v51, %s3068_s22  ;;  %v3692_v51 = vmul.f32 %v1369_v37, %v3316_v30  ;;  %v1390_v30 = vstv %s2819_s5  ;;  %s3788_s5 = sld [smem:[#allocation3 + $0x15]] }
 0x5bd   : > { %4744 = vst [vmem:[#allocation28_spill] sm:$0xff] %v3658_v1  ;;  %v3710_v16 = vmul.f32 %v3707_v9, %v1390_v30  ;;  %v1391_v32 = vmul.f32 %v3697_v33, %v1390_v30 }
 0x5be   : > { %1283 = vrot.lane.b32.xlu0 %v1280_v2, %s3069_s17  ;;  %v3667_v11 = vpop.permute.xlu1 %1837  ;;  %v1316_v2 = vmul.f32 %v1313_v56, %v3441_v60  ;;  %v1376_v56 = vrot.slane %v1370_v23, 1 }
 0x5bf   : > { %4745 = vst [vmem:[#allocation29_spill] sm:$0xff] %v3667_v11  ;;  %v1398_v43 = vrot.slane %v3710_v16, 2  ;;  %v3927_v11 = vstv %s3847_s11  ;;  %s4181_s11 = sld [smem:[#allocation3 + $0x4a]] }
 0x5c0   : > { %v3672_v22 = vpop.permute.xlu0 %1912  ;;  %1243 = vrot.lane.b32.xlu1 %v1240_v14, %s3069_s17  ;;  %v1377_v14 = vrot.slane %v3692_v51, 1  ;;  %v1323_v35 = vrot.slane %v1316_v2, 5  ;;  %v1432_v2 = vstv %s2821_s18  ;;  %s3795_s18 = sld [smem:[#allocation3 + $0x23]] }
 0x5c1   : > { %4746 = vst [vmem:[#allocation30_spill] sm:$0xff] %v3672_v22  ;;  %v3941_v22 = vld [vmem:[#allocation2 + $0x18] sm:$0xff] }
 0x5c2   : > { %1304 = vrot.lane.b32.xlu0 %v1301_v25, %s3069_s17  ;;  %v3681_v13 = vpop.permute.xlu1 %1858  ;;  %v1303_v25 = vsel %vm588_vm8, %v1300_v4, %v1302_v50  ;;  %v1378_v39 = vsel %vm594_vm11, %v1376_v56, %v1377_v14  ;;  %v1412_v4 = vmul.f32 %v3697_v33, %v1411_v21  ;;  %v1324_v23 = vsel %vm586_vm7, %v1321_v31, %v1323_v35 }
 0x5c3   : > { %4747 = vst [vmem:[#allocation31_spill] sm:$0xff] %v3681_v13  ;;  %v3738_v56 = vmul.f32 %v3707_v9, %v1432_v2  ;;  %v1453_v35 = vstv %s2822_s20  ;;  %s3805_s20 = sld [smem:[#allocation3 + $0x2a]] }
 0x5c4   : > { %v3686_v48 = vpop.permute.xlu0 %1933  ;;  %1264 = vrot.lane.b32.xlu1 %v1261_v20, %s3069_s17  ;;  %v1337_v20 = vmul.f32 %v1334_v24, %v3441_v60  ;;  %v1397_v24 = vrot.slane %v1391_v32, 2  ;;  %v1379_v32 = vrot.slane %v1372_v62, 1 }
 0x5c5   : > { %4748 = vst [vmem:[#allocation32_spill] sm:$0xff] %v3686_v48 }
 0x5c6   : > { %1325 = vrot.lane.b32.xlu0 %v1322_v53, %s3069_s17  ;;  %v3695_v58 = vpop.permute.xlu1 %1879  ;;  %v3724_v53 = vmul.f32 %v3707_v9, %v1411_v21 }
 0x5c7   : > { %4749 = vst [vmem:[#allocation33_spill] sm:$0xff] %v3695_v58 }
 0x5c8   : > { %v3702_v5 = vpop.permute.xlu0 %1954  ;;  %1285 = vrot.lane.b32.xlu1 %v1282_v17, %s3069_s17  ;;  %v1344_v17 = vrot.slane %v1337_v20, 6  ;;  %v1419_v16 = vrot.slane %v3724_v53, 3  ;;  %v1433_v20 = vmul.f32 %v3697_v33, %v1432_v2 }
 0x5c9   : > { %4750 = vst [vmem:[#allocation34_spill] sm:$0xff] %v3702_v5 }
 0x5ca   : > { %1346 = vrot.lane.b32.xlu0 %v1343_v59, %s3069_s17  ;;  %v3713_v52 = vpop.permute.xlu1 %1914  ;;  %v1399_v59 = vsel %vm592_vm10, %v1397_v24, %v1398_v43  ;;  %v1345_v37 = vsel %vm385_vm4, %v1342_v54, %v1344_v17  ;;  %v4712_v24 = vrot.slane %v3738_v56, 4  ;;  %v1454_v54 = vmul.f32 %v3697_v33, %v1453_v35 }
 0x5cb   : > { %4751 = vst [vmem:[#allocation35_spill] sm:$0xff] %v3713_v52  ;;  %v1380_v17 = vsel %vm594_vm11, %v1377_v14, %v1379_v32 }
 0x5cc   : > { %v3718_v8 = vpop.permute.xlu0 %1975  ;;  %1306 = vrot.lane.b32.xlu1 %v1303_v25, %s3069_s17  ;;  %v1418_v25 = vrot.slane %v1412_v4, 3  ;;  %v1460_v32 = vrot.slane %v1454_v54, 5 }
 0x5cd   : > { %4752 = vst [vmem:[#allocation36_spill] sm:$0xff] %v3718_v8 }
 0x5ce   : > { %1381 = vrot.lane.b32.xlu0 %v1378_v39, %s3070_s19  ;;  %v3727_v51 = vpop.permute.xlu1 %1935  ;;  %v1393_v39 = vmul.f32 %v1390_v30, %v3441_v60  ;;  %v1420_v53 = vsel %vm590_vm9, %v1418_v25, %v1419_v16  ;;  %v1439_v30 = vrot.slane %v1433_v20, 4  ;;  %v1474_v25 = vstv %s2823_s25  ;;  %s3812_s25 = sld [smem:[#allocation3 + $0x49]] }
 0x5cf   : > { %4753 = vst [vmem:[#allocation37_spill] sm:$0xff] %v3727_v51  ;;  %v3772_v14 = vmul.f32 %v3707_v9, %v1474_v25  ;;  %v3779_v20 = vstv %s2825_s21  ;;  %s3816_s21 = sld [smem:[#allocation3 + $0x50]] }
 0x5d0   : > { %v3732_v50 = vpop.permute.xlu0 %1996  ;;  %1327 = vrot.lane.b32.xlu1 %v1324_v23, %s3069_s17  ;;  %v1400_v62 = vrot.slane %v1393_v39, 2  ;;  %v1512_v26 = vmul.f32 %v3779_v20, %v3441_v60 }
 0x5d1   : > { %4754 = vst [vmem:[#allocation38_spill] sm:$0xff] %v3732_v50  ;;  %v1572_v50 = vstv %s3822_s23  ;;  %s4102_s23 = sld [smem:[#allocation3 + $0x3c]] }
 0x5d2   : > { %1402 = vrot.lane.b32.xlu0 %v1399_v59, %s3070_s19  ;;  %v3741_v31 = vpop.permute.xlu1 %1956  ;;  %v3752_v59 = vmul.f32 %v3707_v9, %v1453_v35  ;;  %v1401_v39 = vsel %vm592_vm10, %v1398_v43, %v1400_v62  ;;  %v1510_v62 = vmul.f32 %v3697_v33, %v3779_v20  ;;  %v1573_v48 = vmul.f32 %v3697_v33, %v1572_v50 }
 0x5d3   : > { %4755 = vst [vmem:[#allocation39_spill] sm:$0xff] %v3741_v31  ;;  %v1575_v40 = vmul.f32 %v1572_v50, %v3441_v60 }
 0x5d4   : > { %v3746_v23 = vpop.permute.xlu0 %2017  ;;  %1348 = vrot.lane.b32.xlu1 %v1345_v37, %s3069_s17  ;;  %v4713_v41 = vrot.slane %v3752_v59, 5  ;;  %v1579_v28 = vrot.slane %v1573_v48, 4 }
 0x5d5   : > { %4756 = vst [vmem:[#allocation40_spill] sm:$0xff] %v3746_v23  ;;  %v3904_v58 = vstv %s3816_s21  ;;  %s4433_s21 = sld [smem:[#allocation3 + $0x3e]] }
 0x5d6   : > { %1423 = vrot.lane.b32.xlu0 %v1420_v53, %s3070_s19  ;;  %v3755_v4 = vpop.permute.xlu1 %1977  ;;  %v1441_v53 = vsel %vm588_vm8, %v1439_v30, %v4712_v24  ;;  %v1475_v30 = vmul.f32 %v3697_v33, %v1474_v25  ;;  %v1435_v24 = vmul.f32 %v1432_v2, %v3441_v60  ;;  %v1462_v43 = vsel %vm586_vm7, %v1460_v32, %v4713_v41 }
 0x5d7   : > { %4757 = vst [vmem:[#allocation41_spill] sm:$0xff] %v3755_v4  ;;  %v3803_v2 = vmul.f32 %v3707_v9, %v3779_v20  ;;  %v3914_v20 = vmul.f32 %v3707_v9, %v1572_v50  ;;  %v1582_v50 = vrot.slane %v1575_v40, 4 }
 0x5d8   : > { %v3760_v37 = vpop.permute.xlu0 %2052  ;;  %1383 = vrot.lane.b32.xlu1 %v1380_v17, %s3070_s19  ;;  %v1421_v17 = vrot.slane %v1414_v42, 3  ;;  %v1442_v41 = vrot.slane %v1435_v24, 4  ;;  %v1456_v42 = vmul.f32 %v1453_v35, %v3441_v60 }
 0x5d9   : > { %4758 = vst [vmem:[#allocation42_spill] sm:$0xff] %v3760_v37  ;;  %v3867_v37 = vstv %s3795_s18  ;;  %v4773_v6 = vrot.slane %v3803_v2, 1  ;;  %s4357_s18 = sld [smem:[#allocation3 + $0x52]] }
 0x5da   : > { %1444 = vrot.lane.b32.xlu0 %v1441_v53, %s3070_s19  ;;  %v3777_v21 = vpop.permute.xlu1 %1998  ;;  %v1422_v32 = vsel %vm590_vm9, %v1419_v16, %v1421_v17  ;;  %v1463_v17 = vrot.slane %v1456_v42, 5  ;;  %v4767_v42 = vrot.slane %v3752_v59, 5  ;;  %v3907_v59 = vstv %s3824_s9  ;;  %s4143_s9 = sld [smem:[#allocation3 + $0x43]] }
 0x5db   : > { %4759 = vst [vmem:[#allocation43_spill] sm:$0xff] %v3777_v21  ;;  %v1516_v21 = vrot.slane %v1510_v62, 1  ;;  %v3858_v62 = vstv %s3788_s5  ;;  %v4060_v12 = vmul.f32 %v3707_v9, %v3867_v37  ;;  %s4319_s5 = sld [smem:[#allocation3 + $0x44]] }
 0x5dc   : > { %v3792_v53 = vpop.permute.xlu0 %2073  ;;  %1404 = vrot.lane.b32.xlu1 %v1401_v39, %s3070_s19  ;;  %v1481_v39 = vrot.slane %v1475_v30, 6  ;;  %v3837_v30 = vstv %s3774_s29  ;;  %v1464_v15 = vsel %vm586_vm7, %v4767_v42, %v1463_v17  ;;  %v3917_v42 = vstv %s3833_s8  ;;  %s4134_s8 = sld [smem:[#allocation3 + $0x35]]  ;;  %s4230_s29 = sld [smem:[#allocation3 + $0x58]] }
 0x5dd   : > { %4760 = vst [vmem:[#allocation44_spill] sm:$0xff] %v3792_v53  ;;  %v3855_v53 = vstv %s3783_s7  ;;  %s4307_s7 = sld [smem:[#allocation3 + $0x36]] }
 0x5de   : > { %1465 = vrot.lane.b32.xlu0 %v1462_v43, %s3070_s19  ;;  %v3808_v54 = vpop.permute.xlu1 %2019  ;;  %v1530_v43 = vstv %s3763_s27  ;;  %s3845_s27 = sld [smem:[#allocation3 + $0x29]]  ;;  %v711_v18 = vmul.f32 %v3697_v33, %v3855_v53 }
 0x5df   : > { %4761 = vst [vmem:[#allocation45_spill] sm:$0xff] %v3808_v54  ;;  %v4762_v54 = vrot.slane %v3772_v14, 6  ;;  %v3831_v35 = vmul.f32 %v3707_v9, %v1530_v43  ;;  %v1531_v4 = vmul.f32 %v3697_v33, %v1530_v43  ;;  %v1533_v46 = vmul.f32 %v1530_v43, %v3441_v60 }
 0x5e0   : > { %v3818_v44 = vpop.permute.xlu0 %821  ;;  %1425 = vrot.lane.b32.xlu1 %v1422_v32, %s3070_s19  ;;  %v717_v57 = vrot.slane %v711_v18, 2  ;;  %v1615_v18 = vmul.f32 %v3697_v33, %v3927_v11 }
 0x5e1   : > { %v1483_v16 = vsel %vm385_vm4, %v1481_v39, %v4762_v54  ;;  %v3843_v54 = vstv %s3781_s30  ;;  %v4764_v39 = vrot.slane %v3738_v56, 4  ;;  %v1537_v52 = vrot.slane %v1531_v4, 2  ;;  %s4252_s30 = sld [smem:[#allocation3 + $0x5f]] }
 0x5e2   : > { %1486 = vrot.lane.b32.xlu0 %v1483_v16, %s3070_s19  ;;  %v3840_v32 = vpop.permute.xlu1 %2054  ;;  %v1477_v16 = vmul.f32 %v1474_v25, %v3441_v60  ;;  %v3875_v25 = vmul.f32 %v3707_v9, %v3843_v54  ;;  %v4768_v4 = vrot.slane %v3831_v35, 2  ;;  %v1540_v36 = vrot.slane %v1533_v46, 2 }
 0x5e3   : > { %4763 = vst [vmem:[#allocation46_spill] sm:$0xff] %v3840_v32  ;;  %v1443_v24 = vsel %vm588_vm8, %v4764_v39, %v1442_v41  ;;  %v3861_v32 = vstv %s3790_s6  ;;  %v4765_v41 = vrot.slane %v3803_v2, 1  ;;  %v3878_v39 = vstv %s3805_s20  ;;  %s4332_s6 = sld [smem:[#allocation3 + $0x4b]]  ;;  %s4375_s20 = sld [smem:[#allocation3 + $0x59]] }
 0x5e4   : > { %v3863_v31 = vpop.permute.xlu0 %842  ;;  %1446 = vrot.lane.b32.xlu1 %v1443_v24, %s3070_s19  ;;  %v3882_v24 = vmul.f32 %v3707_v9, %v3837_v30  ;;  %v1484_v23 = vrot.slane %v1477_v16, 6  ;;  %v1539_v17 = vsel %vm592_vm10, %v1537_v52, %v4768_v4  ;;  %v3924_v5 = vstv %s3845_s27  ;;  %s4450_s27 = sld [smem:[#allocation3 + $0x45]] }
 0x5e5   : > { %v1518_v56 = vsel %vm594_vm11, %v1516_v21, %v4765_v41  ;;  %v1552_v21 = vmul.f32 %v3697_v33, %v3843_v54  ;;  %v3890_v41 = vstv %s3812_s25  ;;  %v4769_v52 = vrot.slane %v3772_v14, 6  ;;  %s4395_s25 = sld [smem:[#allocation3 + $0x60]] }
 0x5e6   : > { %1521 = vrot.lane.b32.xlu0 %v1518_v56, %s3071_s24  ;;  %v3885_v51 = vpop.permute.xlu1 %2075  ;;  %v694_v56 = vmul.f32 %v3697_v33, %v3837_v30  ;;  %v1519_v16 = vrot.slane %v1512_v26, 1  ;;  %v3945_v14 = vmul.f32 %v3941_v22, %v3890_v41  ;;  %v3949_v26 = vmul.f32 %v3941_v22, %v3904_v58 }
 0x5e7   : > { %4766 = vst [vmem:[#allocation47_spill] sm:$0xff] %v3885_v51  ;;  %v1558_v13 = vrot.slane %v1552_v21, 3  ;;  %v1485_v4 = vsel %vm385_vm4, %v4769_v52, %v1484_v23  ;;  %v4770_v23 = vrot.slane %v3875_v25, 3  ;;  %v3957_v52 = vmul.f32 %v3707_v9, %v3924_v5 }
 0x5e8   : > { %v3899_v51 = vpop.permute.xlu0 %863  ;;  %1467 = vrot.lane.b32.xlu1 %v1464_v15, %s3070_s19  ;;  %v700_v8 = vrot.slane %v694_v56, 1  ;;  %v4772_v1 = vrot.slane %v3882_v24, 1  ;;  %v1594_v56 = vmul.f32 %v3697_v33, %v3924_v5  ;;  %v1520_v45 = vsel %vm594_vm11, %v4773_v6, %v1519_v16 }
 0x5e9   : > { %v1560_v43 = vsel %vm590_vm9, %v1558_v13, %v4770_v23  ;;  %v1554_v7 = vmul.f32 %v3843_v54, %v3441_v60  ;;  %v4774_v46 = vrot.slane %v3914_v20, 4  ;;  %v3998_v16 = vmul.f32 %v3707_v9, %v3927_v11 }
 0x5ea   : > { %1542 = vrot.lane.b32.xlu0 %v1539_v17, %s3071_s24  ;;  %v3921_v15 = vpop.permute.xlu1 %823  ;;  %v3936_v17 = vmul.f32 %v3707_v9, %v3855_v53  ;;  %v702_v13 = vsel %vm594_vm11, %v700_v8, %v4772_v1  ;;  %v3984_v1 = vmul.f32 %v3707_v9, %v3858_v62  ;;  %v696_v8 = vmul.f32 %v3837_v30, %v3441_v60 }
 0x5eb   : > { %v707_v48 = vadd.f32 %v702_v13, %v688_v61  ;;  %v1581_v2 = vsel %vm588_vm8, %v1579_v28, %v4774_v46  ;;  %v728_v30 = vmul.f32 %v3697_v33, %v3858_v62  ;;  %v1600_v6 = vrot.slane %v1594_v56, 5  ;;  %v4005_v61 = vld [vmem:[#allocation2 + $0x20] sm:$0xff] }
 0x5ec   : > { %v3938_v21 = vpop.permute.xlu0 %884  ;;  %1488 = vrot.lane.b32.xlu1 %v1485_v4, %s3070_s19  ;;  %v3961_v4 = vmul.f32 %v3941_v22, %v3907_v59  ;;  %v4009_v28 = vmul.f32 %v4005_v61, %v3890_v41  ;;  %v4775_v13 = vrot.slane %v3831_v35, 2  ;;  %v1561_v54 = vrot.slane %v1554_v7, 3 }
 0x5ed   : > { %v4023_v63 = vmul.f32 %v3707_v9, %v3861_v32  ;;  %v703_v29 = vrot.slane %v696_v8, 1  ;;  %v4038_v8 = vld [vmem:[#allocation2 + $0x10] sm:$0x3f]  ;;  %v4779_v47 = vrot.slane %v3984_v1, 3  ;;  %v4780_v34 = vrot.slane %v3882_v24, 1 }
 0x5ee   : > { %1563 = vrot.lane.b32.xlu0 %v1560_v43, %s3071_s24  ;;  %v3972_v23 = vpop.permute.xlu1 %844  ;;  %v1541_v46 = vsel %vm592_vm10, %v4775_v13, %v1540_v36  ;;  %v4777_v36 = vrot.slane %v3957_v52, 5  ;;  %v734_v13 = vrot.slane %v728_v30, 3  ;;  %v1596_v10 = vmul.f32 %v4038_v8, %v3924_v5 }
 0x5ef   : > { %v4781_v5 = vstv %s3765_s28  ;;  %v762_v24 = vmul.f32 %v3697_v33, %v3867_v37  ;;  %s4207_s28 = sld [smem:[#allocation3 + $0x51]] }
 0x5f0   : > { %v3988_v43 = vpop.permute.xlu0 %905  ;;  %1523 = vrot.lane.b32.xlu1 %v1520_v45, %s3071_s24  ;;  %v1602_v60 = vsel %vm586_vm7, %v1600_v6, %v4777_v36  ;;  %v4047_v6 = vmul.f32 %v4005_v61, %v3907_v59  ;;  %v1621_v36 = vrot.slane %v1615_v18, 6  ;;  %v689_v18 = vmul.f32 %v3707_v9, %v4781_v5 }
 0x5f1   : > { %v4784_v5 = vrot.slane %v4023_v63, 4 }
 0x5f2   : > { %1584 = vrot.lane.b32.xlu0 %v1581_v2, %s3071_s24  ;;  %v4003_v45 = vpop.permute.xlu1 %865  ;;  %v4776_v2 = vrot.slane %v3936_v17, 2 }
 0x5f4   : > { %v719_v56 = vsel %vm592_vm10, %v717_v57, %v4776_v2  ;;  %v4025_v35 = vpop.permute.xlu0 %926  ;;  %1544 = vrot.lane.b32.xlu1 %v1541_v46, %s3071_s24  ;;  %v4034_v57 = vmul.f32 %v4005_v61, %v3904_v58  ;;  %v745_v2 = vmul.f32 %v3697_v33, %v3861_v32 }
 0x5f5   : > { %v724_v7 = vadd.f32 %v719_v56, %v707_v48  ;;  %v713_v48 = vmul.f32 %v4038_v8, %v3855_v53  ;;  %v4778_v56 = vrot.slane %v3875_v25, 3  ;;  %v736_v53 = vsel %vm590_vm9, %v734_v13, %v4779_v47 }
 0x5f6   : > { %1605 = vrot.lane.b32.xlu0 %v1602_v60, %s3071_s24  ;;  %v4043_v46 = vpop.permute.xlu1 %886  ;;  %v704_v25 = vsel %vm594_vm11, %v4780_v34, %v703_v29  ;;  %v4782_v47 = vrot.slane %v3998_v16, 6  ;;  %v751_v60 = vrot.slane %v745_v2, 4  ;;  %v730_v29 = vmul.f32 %v4038_v8, %v3858_v62 }
 0x5f7   : > { %v1562_v30 = vsel %vm590_vm9, %v4778_v56, %v1561_v54  ;;  %v741_v40 = vadd.f32 %v736_v53, %v724_v7  ;;  %v2090_v56 = vrot.slane %v4009_v28, 3  ;;  %v720_v0 = vrot.slane %v713_v48, 2 }
 0x5f8   : > { %v4065_v54 = vpop.permute.xlu0 %961  ;;  %1565 = vrot.lane.b32.xlu1 %v1562_v30, %s3071_s24  ;;  %v1623_v13 = vsel %vm385_vm4, %v1621_v36, %v4782_v47  ;;  %v708_v7 = vadd.f32 %v704_v25, %v689_v18  ;;  %v4783_v30 = vrot.slane %v3914_v20, 4  ;;  %v1603_v36 = vrot.slane %v1596_v10, 5  ;;  %v4098_v20 = vld [vmem:[#allocation2 + $0x28] sm:$0x3f] }
 0x5f9   : > { %v1617_v2 = vmul.f32 %v4038_v8, %v3927_v11  ;;  %v753_v48 = vsel %vm588_vm8, %v751_v60, %v4784_v5  ;;  %v769_v47 = vrot.slane %v4060_v12, 5  ;;  %v4093_v62 = vmul.f32 %v3707_v9, %v3878_v39 }
 0x5fa   : > { %1626 = vrot.lane.b32.xlu0 %v1623_v13, %s3071_s24  ;;  %v4080_v34 = vpop.permute.xlu1 %907  ;;  %v1583_v53 = vsel %vm588_vm8, %v4783_v30, %v1582_v50  ;;  %v2085_v10 = vmul.f32 %v4098_v20, %v3890_v41  ;;  %v779_v11 = vmul.f32 %v3697_v33, %v3878_v39  ;;  %v758_v50 = vadd.f32 %v753_v48, %v741_v40 }
 0x5fb   : > { %v4785_v9 = vrot.slane %v3945_v14, 3  ;;  %v2111_v25 = vrot.slane %v4034_v57, 4  ;;  %v768_v18 = vrot.slane %v762_v24, 5  ;;  %v4786_v30 = vrot.slane %v3936_v17, 2 }
 0x5fc   : > { %v4095_v13 = vpop.permute.xlu0 %982  ;;  %1586 = vrot.lane.b32.xlu1 %v1583_v53, %s3071_s24  ;;  %v737_v41 = vrot.slane %v730_v29, 3  ;;  %v747_v5 = vmul.f32 %v4038_v8, %v3861_v32  ;;  %v4787_v14 = vrot.slane %v3957_v52, 5  ;;  %v1624_v24 = vrot.slane %v1617_v2, 6 }
 0x5fd   : > { %v2091_v60 = vsel %vm590_vm9, %v4785_v9, %v2090_v56  ;;  %v721_v53 = vsel %vm592_vm10, %v4786_v30, %v720_v0  ;;  %v2110_v9 = vrot.slane %v3949_v26, 4  ;;  %v770_v0 = vsel %vm586_vm7, %v768_v18, %v769_v47 }
 0x5fe   : > { %2094 = vrot.lane.b32.xlu0 %v2091_v60, %s3068_s22  ;;  %v4118_v33 = vpop.permute.xlu1 %928  ;;  %v725_v40 = vadd.f32 %v721_v53, %v708_v7  ;;  %v1604_v48 = vsel %vm586_vm7, %v4787_v14, %v1603_v36  ;;  %v786_v17 = vrot.slane %v4093_v62, 6  ;;  %v2132_v32 = vrot.slane %v4047_v6, 5 }
 0x5ff   : > { %v2146_v52 = vmul.f32 %v3941_v22, %v3917_v42  ;;  %v775_v7 = vadd.f32 %v770_v0, %v758_v50  ;;  %v2112_v26 = vsel %vm588_vm8, %v2110_v9, %v2111_v25  ;;  %v2092_v36 = vrot.slane %v2085_v10, 3 }
 0x600   : > { %v4128_v29 = vpop.permute.xlu0 %1003  ;;  %1607 = vrot.lane.b32.xlu1 %v1604_v48, %s3071_s24  ;;  %v4141_v2 = vmul.f32 %v4005_v61, %v3917_v42  ;;  %v785_v60 = vrot.slane %v779_v11, 6  ;;  %v4788_v18 = vrot.slane %v3984_v1, 3  ;;  %v754_v53 = vrot.slane %v747_v5, 4 }
 0x601   : > { %v764_v50 = vmul.f32 %v4038_v8, %v3867_v37  ;;  %v4789_v48 = vrot.slane %v3998_v16, 6  ;;  %v2131_v0 = vrot.slane %v3961_v4, 5  ;;  %v2106_v1 = vmul.f32 %v4098_v20, %v3904_v58 }
 0x602   : > { %v738_v30 = vsel %vm590_vm9, %v4788_v18, %v737_v41  ;;  %2115 = vrot.lane.b32.xlu0 %v2112_v26, %s3068_s22  ;;  %v4151_v14 = vpop.permute.xlu1 %963  ;;  %v787_v11 = vsel %vm385_vm4, %v785_v60, %v786_v17  ;;  %v2180_v37 = vstv %s4102_s23  ;;  %v2153_v4 = vrot.slane %v4141_v2, 6  ;;  %s4462_s23 = sld [smem:[#allocation3 + $0x4c]] }
 0x603   : > { %v742_v10 = vadd.f32 %v738_v30, %v725_v40  ;;  %v1625_v9 = vsel %vm385_vm4, %v4789_v48, %v1624_v24  ;;  %v792_v5 = vadd.f32 %v787_v11, %v775_v7  ;;  %v2133_v16 = vsel %vm586_vm7, %v2131_v0, %v2132_v32 }
 0x604   : > { %v4162_v41 = vpop.permute.xlu0 %1024  ;;  %1628 = vrot.lane.b32.xlu1 %v1625_v9, %s3071_s24  ;;  %v2152_v40 = vrot.slane %v2146_v52, 6  ;;  %v4790_v58 = vrot.slane %v4023_v63, 4  ;;  %v771_v26 = vrot.slane %v764_v50, 5  ;;  %v781_v60 = vmul.f32 %v4038_v8, %v3878_v39 }
 0x605   : > { %v2093_v18 = vsel %vm590_vm9, %v2090_v56, %v2092_v36  ;;  %v806_v52 = vadd.f32 %v3519_v27, %v792_v5  ;;  %v2113_v30 = vrot.slane %v2106_v1, 4  ;;  %v2166_v39 = vstv %s4134_s8  ;;  %s4483_s8 = sld [smem:[#allocation3 + $0x53]] }
 0x606   : > { %v755_v24 = vsel %vm588_vm8, %v4790_v58, %v754_v53  ;;  %2136 = vrot.lane.b32.xlu0 %v2133_v16, %s3068_s22  ;;  %v4176_v7 = vpop.permute.xlu1 %984  ;;  %v2127_v53 = vmul.f32 %v4098_v20, %v3907_v59  ;;  %v2154_v28 = vsel %vm385_vm4, %v2152_v40, %v2153_v4  ;;  %v4195_v56 = vmul.f32 %v4005_v61, %v2180_v37 }
 0x607   : > { %v759_v63 = vadd.f32 %v755_v24, %v742_v10  ;;  %v827_v8 = vadd.f32 %v3818_v44, %v806_v52  ;;  %v2201_v27 = vstv %s4143_s9  ;;  %v772_v36 = vsel %vm586_vm7, %v769_v47, %v771_v26  ;;  %s4495_s9 = sld [smem:[#allocation3 + $0x5a]] }
 0x608   : > { %v4186_v50 = vpop.permute.xlu0 %1045  ;;  %2096 = vrot.lane.b32.xlu1 %v2093_v18, %s3068_s22  ;;  %v788_v59 = vrot.slane %v781_v60, 6  ;;  %v2181_v48 = vmul.f32 %v3941_v22, %v2180_v37  ;;  %v2148_v44 = vmul.f32 %v4098_v20, %v3917_v42  ;;  %v2114_v12 = vsel %vm588_vm8, %v2111_v25, %v2113_v30 }
 0x609   : > { %v776_v9 = vadd.f32 %v772_v36, %v759_v63  ;;  %v848_v0 = vadd.f32 %v3863_v31, %v827_v8  ;;  %v2134_v47 = vrot.slane %v2127_v53, 5  ;;  %v2167_v11 = vmul.f32 %v3941_v22, %v2166_v39 }
 0x60a   : > { %2157 = vrot.lane.b32.xlu0 %v2154_v28, %s3068_s22  ;;  %v4202_v10 = vpop.permute.xlu1 %1005  ;;  %v2188_v42 = vrot.slane %v4195_v56, 1  ;;  %v4220_v16 = vmul.f32 %v4005_v61, %v2201_v27  ;;  %v789_v31 = vsel %vm385_vm4, %v786_v17, %v788_v59  ;;  %v2187_v25 = vrot.slane %v2181_v48, 1 }
 0x60b   : > { %v869_v5 = vadd.f32 %v3899_v51, %v848_v0  ;;  %v2202_v40 = vmul.f32 %v3941_v22, %v2201_v27  ;;  %v2222_v58 = vstv %s4181_s11  ;;  %v793_v51 = vadd.f32 %v789_v31, %v776_v9  ;;  %s4514_s11 = sld [smem:[#allocation3 + $0x61]] }
 0x60c   : > { %v4213_v1 = vpop.permute.xlu0 %1066  ;;  %2117 = vrot.lane.b32.xlu1 %v2114_v12, %s3068_s22  ;;  %v2135_v62 = vsel %vm586_vm7, %v2132_v32, %v2134_v47  ;;  %v2155_v26 = vrot.slane %v2148_v44, 6  ;;  %v4240_v60 = vmul.f32 %v4005_v61, %v2222_v58  ;;  %v2189_v63 = vsel %vm594_vm11, %v2187_v25, %v2188_v42 }
 0x60d   : > { %v890_v24 = vadd.f32 %v3938_v21, %v869_v5  ;;  %v807_v18 = vadd.f32 %v3550_v55, %v793_v51  ;;  %v2209_v21 = vrot.slane %v4220_v16, 2  ;;  %v2223_v32 = vmul.f32 %v3941_v22, %v2222_v58 }
 0x60e   : > { %2171 = vrot.lane.b32.xlu0 %v2167_v11, %s3069_s17  ;;  %v4226_v57 = vpop.permute.xlu1 %1026  ;;  %v2183_v30 = vmul.f32 %v4098_v20, %v2180_v37  ;;  %v2243_v53 = vstv %s4207_s28  ;;  %v2156_v8 = vsel %vm385_vm4, %v2153_v4, %v2155_v26  ;;  %v2208_v28 = vrot.slane %v2202_v40, 2  ;;  %s2833_s28 = sld [smem:[#allocation3 + $0x3f]] }
 0x60f   : > { %v911_v52 = vadd.f32 %v3988_v43, %v890_v24  ;;  %v828_v55 = vadd.f32 %v3921_v15, %v807_v18  ;;  %v2230_v59 = vrot.slane %v4240_v60, 3  ;;  %v4266_v48 = vmul.f32 %v4005_v61, %v2243_v53 }
 0x610   : > { %v4236_v17 = vpop.permute.xlu0 %1101  ;;  %2138 = vrot.lane.b32.xlu1 %v2135_v62, %s3068_s22  ;;  %v2210_v37 = vsel %vm592_vm10, %v2208_v28, %v2209_v21  ;;  %v2190_v2 = vrot.slane %v2183_v30, 1  ;;  %v2244_v4 = vmul.f32 %v3941_v22, %v2243_v53  ;;  %v2264_v44 = vstv %s4230_s29  ;;  %s2834_s29 = sld [smem:[#allocation3 + $0x46]] }
 0x611   : > { %v932_v43 = vadd.f32 %v4025_v35, %v911_v52  ;;  %v849_v36 = vadd.f32 %v3972_v23, %v828_v55  ;;  %v2168_v35 = vmul.f32 %v4005_v61, %v2166_v39  ;;  %v2229_v0 = vrot.slane %v2223_v32, 3 }
 0x612   : > { %2192 = vrot.lane.b32.xlu0 %v2189_v63, %s3069_s17  ;;  %v4247_v6 = vpop.permute.xlu1 %1047  ;;  %v2204_v12 = vmul.f32 %v4098_v20, %v2201_v27  ;;  %v2251_v5 = vrot.slane %v4266_v48, 4  ;;  %v4284_v16 = vmul.f32 %v4005_v61, %v2264_v44  ;;  %v2250_v27 = vrot.slane %v2244_v4, 4 }
 0x613   : > { %v870_v23 = vadd.f32 %v4003_v45, %v849_v36  ;;  %v946_v9 = vadd.f32 %v3530_v38, %v932_v43  ;;  %v2231_v39 = vsel %vm590_vm9, %v2229_v0, %v2230_v59  ;;  %v2191_v38 = vsel %vm594_vm11, %v2188_v42, %v2190_v2 }
 0x614   : > { %v4259_v56 = vpop.permute.xlu0 %1122  ;;  %2159 = vrot.lane.b32.xlu1 %v2156_v8, %s3068_s22  ;;  %v2265_v31 = vmul.f32 %v3941_v22, %v2264_v44  ;;  %v2285_v25 = vstv %s4252_s30  ;;  %s4292_s22 = sld [smem:[#allocation3 + $0x3d]]  ;;  %v2211_v51 = vrot.slane %v2204_v12, 2  ;;  %v2225_v24 = vmul.f32 %v4098_v20, %v2222_v58  ;;  %s4559_s30 = sld [smem:[#allocation3 + $0x31]] }
 0x615   : > { %v891_v11 = vadd.f32 %v4043_v46, %v870_v23  ;;  %v967_v46 = vadd.f32 %v4065_v54, %v946_v9  ;;  %v4301_v26 = vmul.f32 %v4005_v61, %v2285_v25  ;;  %v2252_v18 = vsel %vm588_vm8, %v2250_v27, %v2251_v5 }
 0x616   : > { %2213 = vrot.lane.b32.xlu0 %v2210_v37, %s3069_s17  ;;  %v4269_v15 = vpop.permute.xlu1 %1068  ;;  %v2272_v54 = vrot.slane %v4284_v16, 5  ;;  %v2271_v58 = vrot.slane %v2265_v31, 5  ;;  %v2286_v52 = vmul.f32 %v3941_v22, %v2285_v25  ;;  %v2232_v32 = vrot.slane %v2225_v24, 3 }
 0x617   : > { %v912_v40 = vadd.f32 %v4080_v34, %v891_v11  ;;  %v988_v42 = vadd.f32 %v4095_v13, %v967_v46  ;;  %v2212_v13 = vsel %vm592_vm10, %v2209_v21, %v2211_v51  ;;  %v2293_v28 = vrot.slane %v4301_v26, 6 }
 0x618   : > { %v4277_v47 = vpop.permute.xlu0 %1143  ;;  %2173 = vrot.lane.b32.xlu1 %v2168_v35, %s3069_s17  ;;  %v2273_v8 = vsel %vm586_vm7, %v2271_v58, %v2272_v54  ;;  %v2267_v21 = vmul.f32 %v4098_v20, %v2264_v44  ;;  %v2233_v37 = vsel %vm590_vm9, %v2230_v59, %v2232_v32  ;;  %v2292_v48 = vrot.slane %v2286_v52, 6 }
 0x619   : > { %v933_v60 = vadd.f32 %v4118_v33, %v912_v40  ;;  %v1009_v63 = vadd.f32 %v4128_v29, %v988_v42  ;;  %v2246_v33 = vmul.f32 %v4098_v20, %v2243_v53  ;;  %v2306_v44 = vstv %s4307_s7  ;;  %s2836_s7 = sld [smem:[#allocation3 + $0x54]] }
 0x61a   : > { %2234 = vrot.lane.b32.xlu0 %v2231_v39, %s3069_s17  ;;  %v4287_v45 = vpop.permute.xlu1 %1103  ;;  %v2320_v53 = vstv %s4292_s22  ;;  %v2274_v23 = vrot.slane %v2267_v21, 5  ;;  %v2288_v11 = vmul.f32 %v4098_v20, %v2285_v25  ;;  %v2341_v16 = vstv %s4319_s5  ;;  %s2835_s22 = sld [smem:[#allocation3 + $0x4d]]  ;;  %s4569_s5 = sld [smem:[#allocation3 + $0x5b]] }
 0x61b   : > { %v947_v55 = vadd.f32 %v3562_v3, %v933_v60  ;;  %v1030_v43 = vadd.f32 %v4162_v41, %v1009_v63  ;;  %v2253_v3 = vrot.slane %v2246_v33, 4  ;;  %v4338_v35 = vmul.f32 %v4005_v61, %v2320_v53 }
 0x61c   : > { %v4297_v62 = vpop.permute.xlu0 %1164  ;;  %2194 = vrot.lane.b32.xlu1 %v2191_v38, %s3069_s17  ;;  %v2321_v9 = vmul.f32 %v3941_v22, %v2320_v53  ;;  %v2275_v31 = vsel %vm586_vm7, %v2272_v54, %v2274_v23  ;;  %v2295_v40 = vrot.slane %v2288_v11, 6  ;;  %v2342_v51 = vmul.f32 %v3941_v22, %v2341_v16 }
 0x61d   : > { %v1051_v36 = vadd.f32 %v4186_v50, %v1030_v43  ;;  %v968_v2 = vadd.f32 %v4151_v14, %v947_v55  ;;  %v2294_v50 = vsel %vm385_vm4, %v2292_v48, %v2293_v28  ;;  %v2254_v12 = vsel %vm588_vm8, %v2251_v5, %v2253_v3 }
 0x61e   : > { %2255 = vrot.lane.b32.xlu0 %v2252_v18, %s3069_s17  ;;  %v4310_v34 = vpop.permute.xlu1 %1124  ;;  %v2307_v14 = vmul.f32 %v3941_v22, %v2306_v44  ;;  %v4362_v5 = vmul.f32 %v4005_v61, %v2341_v16  ;;  %v2327_v25 = vrot.slane %v2321_v9, 1  ;;  %v2362_v24 = vstv %s4332_s6  ;;  %s4832_s6 = smov 96  }
 0x61f   : > { %v1072_v4 = vadd.f32 %v4213_v1, %v1051_v36  ;;  %v989_v0 = vadd.f32 %v4176_v7, %v968_v2  ;;  %v2328_v1 = vrot.slane %v4338_v35, 1  ;;  %v2363_v54 = vmul.f32 %v3941_v22, %v2362_v24 }
 0x620   : > { %v4316_v30 = vpop.permute.xlu0 %1185  ;;  %2215 = vrot.lane.b32.xlu1 %v2212_v13, %s3069_s17  ;;  %v2349_v60 = vrot.slane %v4362_v5, 2  ;;  %v2323_v58 = vmul.f32 %v4098_v20, %v2320_v53  ;;  %v2383_v32 = vstv %s4357_s18  ;;  %v2344_v21 = vmul.f32 %v4098_v20, %v2341_v16 }
 0x621   : > { %v1010_v38 = vadd.f32 %v4202_v10, %v989_v0  ;;  %v1086_v7 = vadd.f32 %v3542_v49, %v1072_v4  ;;  %v2329_v49 = vsel %vm594_vm11, %v2327_v25, %v2328_v1  ;;  %v2369_v36 = vrot.slane %v2363_v54, 3 }
 0x622   : > { %2276 = vrot.lane.b32.xlu0 %v2273_v8, %s3069_s17  ;;  %v4326_v29 = vpop.permute.xlu1 %1145  ;;  %v2308_v8 = vmul.f32 %v4005_v61, %v2306_v44  ;;  %v2404_v3 = vstv %s4375_s20  ;;  %v2351_v44 = vrot.slane %v2344_v21, 2  ;;  %v2365_v23 = vmul.f32 %v4098_v20, %v2362_v24 }
 0x623   : > { %v1031_v46 = vadd.f32 %v4226_v57, %v1010_v38  ;;  %v1107_v10 = vadd.f32 %v4236_v17, %v1086_v7  ;;  %v4381_v57 = vmul.f32 %v4005_v61, %v2362_v24  ;;  %v2296_v17 = vsel %vm385_vm4, %v2293_v28, %v2295_v40 }
 0x624   : > { %v4334_v41 = vpop.permute.xlu0 %1206  ;;  %2236 = vrot.lane.b32.xlu1 %v2233_v37, %s3069_s17  ;;  %v2330_v28 = vrot.slane %v2323_v58, 1  ;;  %v2384_v37 = vmul.f32 %v3941_v22, %v2383_v32  ;;  %v2352_v7 = vsel %vm592_vm10, %v2349_v60, %v2351_v44  ;;  %v2372_v5 = vrot.slane %v2365_v23, 3 }
 0x625   : > { %v1052_v42 = vadd.f32 %v4247_v6, %v1031_v46  ;;  %v1128_v52 = vadd.f32 %v4259_v56, %v1107_v10  ;;  %v2348_v6 = vrot.slane %v2342_v51, 2  ;;  %v2370_v43 = vrot.slane %v4381_v57, 3  ;;  %v4791_v46 = vld [vmem:[#allocation14_spill] sm:$0xff] }
 0x626   : > { %2297 = vrot.lane.b32.xlu0 %v2294_v50, %s3069_s17  ;;  %v4345_v59 = vpop.permute.xlu1 %1166  ;;  %v4401_v56 = vmul.f32 %v4005_v61, %v2383_v32  ;;  %v4419_v50 = vmul.f32 %v4005_v61, %v2404_v3  ;;  %v2390_v0 = vrot.slane %v2384_v37, 4  ;;  %v2407_v57 = vmul.f32 %v4098_v20, %v2404_v3 }
 0x627   : > { %v1073_v63 = vadd.f32 %v4269_v15, %v1052_v42  ;;  %v1149_v33 = vadd.f32 %v4277_v47, %v1128_v52  ;;  %v2350_v55 = vsel %vm592_vm10, %v2348_v6, %v2349_v60  ;;  %v2371_v2 = vsel %vm590_vm9, %v2369_v36, %v2370_v43 }
 0x628   : > { %v4351_v39 = vpop.permute.xlu0 %1241  ;;  %2257 = vrot.lane.b32.xlu1 %v2254_v12, %s3069_s17  ;;  %v2391_v4 = vrot.slane %v4401_v56, 4  ;;  %v2405_v12 = vmul.f32 %v3941_v22, %v2404_v3  ;;  %v2412_v38 = vrot.slane %v4419_v50, 5  ;;  %v2373_v60 = vsel %vm590_vm9, %v2370_v43, %v2372_v5 }
 0x629   : > { %v1087_v53 = vadd.f32 %v3575_v19, %v1073_v63  ;;  %v1170_v47 = vadd.f32 %v4297_v62, %v1149_v33  ;;  %v2331_v62 = vsel %vm594_vm11, %v2328_v1, %v2330_v28  ;;  %v2460_v6 = vstv %s4433_s21 }
 0x62a   : > { %2311 = vrot.lane.b32.xlu0 %v2307_v14, %s3070_s19  ;;  %v4365_v27 = vpop.permute.xlu1 %1187  ;;  %v2425_v14 = vstv %s4395_s25  ;;  %v2392_v16 = vsel %vm588_vm8, %v2390_v0, %v2391_v4  ;;  %v2411_v40 = vrot.slane %v2405_v12, 5  ;;  %v2414_v43 = vrot.slane %v2407_v57, 5 }
 0x62b   : > { %v1191_v35 = vadd.f32 %v4316_v30, %v1170_v47  ;;  %v1108_v9 = vadd.f32 %v4287_v45, %v1087_v53  ;;  %v4439_v45 = vmul.f32 %v4005_v61, %v2425_v14  ;;  %v2426_v51 = vmul.f32 %v3941_v22, %v2425_v14  ;;  %v4792_v47 = vld [vmem:[#allocation17_spill] sm:$0xff] }
 0x62c   : > { %v4371_v26 = vpop.permute.xlu0 %1262  ;;  %2278 = vrot.lane.b32.xlu1 %v2275_v31, %s3069_s17  ;;  %v2386_v31 = vmul.f32 %v4098_v20, %v2383_v32  ;;  %v2413_v10 = vsel %vm586_vm7, %v2411_v40, %v2412_v38  ;;  %v2428_v56 = vmul.f32 %v4098_v20, %v2425_v14  ;;  %v2461_v21 = vmul.f32 %v3941_v22, %v2460_v6 }
 0x62d   : > { %v1212_v30 = vadd.f32 %v4334_v41, %v1191_v35  ;;  %v1129_v1 = vadd.f32 %v4310_v34, %v1108_v9  ;;  %v2433_v42 = vrot.slane %v4439_v45, 6  ;;  %v2432_v52 = vrot.slane %v2426_v51, 6 }
 0x62e   : > { %2332 = vrot.lane.b32.xlu0 %v2329_v49, %s3070_s19  ;;  %v4384_v18 = vpop.permute.xlu1 %1208  ;;  %v2393_v63 = vrot.slane %v2386_v31, 4  ;;  %v2481_v53 = vstv %s4450_s27  ;;  %v2502_v23 = vstv %s4462_s23  ;;  %v2523_v31 = vstv %s4483_s8 }
 0x62f   : > { %v1150_v25 = vadd.f32 %v4326_v29, %v1129_v1  ;;  %v1226_v34 = vadd.f32 %v4791_v46, %v1212_v30  ;;  %v2482_v44 = vmul.f32 %v3941_v22, %v2481_v53  ;;  %v2503_v1 = vmul.f32 %v3941_v22, %v2502_v23  ;;  %v4793_v46 = vld [vmem:[#allocation15_spill] sm:$0xff] }
 0x630   : > { %v4391_v13 = vpop.permute.xlu0 %1283  ;;  %2299 = vrot.lane.b32.xlu1 %v2296_v17, %s3069_s17  ;;  %s4431_s17 = sld [smem:[#allocation3 + $0x37]]  ;;  %v2394_v28 = vsel %vm588_vm8, %v2391_v4, %v2393_v63  ;;  %v2435_v4 = vrot.slane %v2428_v56, 6  ;;  %v2544_v57 = vstv %s4495_s9 }
 0x631   : > { %v1171_v49 = vadd.f32 %v4345_v59, %v1150_v25  ;;  %v1247_v54 = vadd.f32 %v4351_v39, %v1226_v34  ;;  %v4473_v39 = vmul.f32 %v4005_v61, %v2460_v6 }
 0x632   : > { %2353 = vrot.lane.b32.xlu0 %v2350_v55, %s3070_s19  ;;  %v4404_v15 = vpop.permute.xlu1 %1243  ;;  %v2434_v55 = vsel %vm385_vm4, %v2432_v52, %v2433_v42  ;;  %v2436_v45 = vsel %vm385_vm4, %v2433_v42, %v2435_v4  ;;  %v2484_v42 = vmul.f32 %v4098_v20, %v2481_v53 }
 0x633   : > { %v1192_v58 = vadd.f32 %v4365_v27, %v1171_v49  ;;  %v1268_v32 = vadd.f32 %v4371_v26, %v1247_v54  ;;  %v2468_v3 = vrot.slane %v4473_v39, 1  ;;  %v2509_v49 = vrot.slane %v2503_v1, 3 }
 0x634   : > { %v4411_v48 = vpop.permute.xlu0 %1304  ;;  %2313 = vrot.lane.b32.xlu1 %v2308_v8, %s3070_s19 }
 0x635   : > { %v1213_v33 = vadd.f32 %v4384_v18, %v1192_v58  ;;  %v1289_v8 = vadd.f32 %v4391_v13, %v1268_v32  ;;  %v4489_v13 = vmul.f32 %v4005_v61, %v2481_v53 }
 0x636   : > { %2374 = vrot.lane.b32.xlu0 %v2371_v2, %s3070_s19  ;;  %v4422_v19 = vpop.permute.xlu1 %1264  ;;  %v2446_v17 = vstv %s4431_s17  ;;  %v2415_v2 = vsel %vm586_vm7, %v2412_v38, %v2414_v43 }
 0x637   : > { %v2447_v18 = vmul.f32 %v3941_v22, %v2446_v17  ;;  %v1227_v36 = vadd.f32 %v4792_v47, %v1213_v33  ;;  %v1310_v37 = vadd.f32 %v4411_v48, %v1289_v8  ;;  %v4499_v48 = vmul.f32 %v4005_v61, %v2502_v23 }
 0x638   : > { %v1326_v11 = vpop.permute.xlu0 %1325  ;;  %2334 = vrot.lane.b32.xlu1 %v2331_v62, %s3070_s19  ;;  %v2467_v62 = vrot.slane %v2461_v21, 1  ;;  %v2491_v33 = vrot.slane %v2484_v42, 2  ;;  %v2505_v8 = vmul.f32 %v4098_v20, %v2502_v23 }
 0x639   : > { %v1331_v50 = vadd.f32 %v1326_v11, %v1310_v37  ;;  %v1248_v30 = vadd.f32 %v4404_v15, %v1227_v36  ;;  %v2489_v11 = vrot.slane %v4489_v13, 2  ;;  %v2510_v15 = vrot.slane %v4499_v48, 3 }
 0x63a   : > { %2395 = vrot.lane.b32.xlu0 %v2392_v16, %s3070_s19  ;;  %v4442_v41 = vpop.permute.xlu1 %1285  ;;  %v2469_v12 = vsel %vm594_vm11, %v2467_v62, %v2468_v3  ;;  %v2463_v16 = vmul.f32 %v4098_v20, %v2460_v6  ;;  %v2546_v6 = vmul.f32 %v4005_v61, %v2544_v57  ;;  %v2526_v37 = vmul.f32 %v4098_v20, %v2523_v31 }
 0x63b   : > { %v1269_v38 = vadd.f32 %v4422_v19, %v1248_v30  ;;  %v4520_v19 = vmul.f32 %v4005_v61, %v2523_v31  ;;  %v2511_v58 = vsel %vm590_vm9, %v2509_v49, %v2510_v15  ;;  %v2492_v36 = vsel %vm592_vm10, %v2489_v11, %v2491_v33 }
 0x63c   : > { %v1347_v24 = vpop.permute.xlu0 %1346  ;;  %2355 = vrot.lane.b32.xlu1 %v2352_v7, %s3070_s19  ;;  %v2488_v7 = vrot.slane %v2482_v44, 2  ;;  %v2533_v48 = vrot.slane %v2526_v37, 4  ;;  %v2547_v30 = vmul.f32 %v4098_v20, %v2544_v57  ;;  %v1678_v33 = vstv %s2834_s29 }
 0x63d   : > { %v1352_v0 = vadd.f32 %v1347_v24, %v1331_v50  ;;  %v1290_v25 = vadd.f32 %v4442_v41, %v1269_v38  ;;  %v2448_v24 = vmul.f32 %v4005_v61, %v2446_v17  ;;  %v2524_v41 = vmul.f32 %v3941_v22, %v2523_v31  ;;  %v4795_v31 = vld [vmem:[#allocation16_spill] sm:$0xff] }
 0x63e   : > { %2416 = vrot.lane.b32.xlu0 %v2413_v10, %s3070_s19  ;;  %v4456_v29 = vpop.permute.xlu1 %1306  ;;  %v2490_v40 = vsel %vm592_vm10, %v2488_v7, %v2489_v11  ;;  %v2470_v10 = vrot.slane %v2463_v16, 1  ;;  %v2531_v17 = vrot.slane %v4520_v19, 4  ;;  %v2554_v7 = vrot.slane %v2547_v30, 5 }
 0x63f   : > { %v1366_v34 = vadd.f32 %v4793_v46, %v1352_v0  ;;  %v2530_v56 = vrot.slane %v2524_v41, 4 }
 0x640   : > { %v4464_v59 = vpop.permute.xlu0 %1381  ;;  %2376 = vrot.lane.b32.xlu1 %v2373_v60, %s3070_s19  ;;  %v1311_v60 = vadd.f32 %v4456_v29, %v1290_v25  ;;  %v2471_v29 = vsel %vm594_vm11, %v2468_v3, %v2470_v10  ;;  %v4794_v3 = vld [vmem:[#allocation19_spill] sm:$0xff]  ;;  %v2534_v46 = vsel %vm588_vm8, %v2531_v17, %v2533_v48 }
 0x641   : > { %v1387_v52 = vadd.f32 %v4464_v59, %v1366_v34  ;;  %v2565_v59 = vstv %s4514_s11  ;;  %v2532_v21 = vsel %vm588_vm8, %v2530_v56, %v2531_v17  ;;  %v1661_v17 = vstv %s2833_s28 }
 0x642   : > { %2437 = vrot.lane.b32.xlu0 %v2434_v55, %s3070_s19  ;;  %v1328_v27 = vpop.permute.xlu1 %1327  ;;  %v2545_v55 = vmul.f32 %v3941_v22, %v2544_v57  ;;  %v2567_v53 = vmul.f32 %v4005_v61, %v2565_v59  ;;  %v2566_v4 = vmul.f32 %v3941_v22, %v2565_v59 }
 0x643   : > { %v1332_v63 = vadd.f32 %v1328_v27, %v1311_v60 }
 0x644   : > { %v1403_v26 = vpop.permute.xlu0 %1402  ;;  %2397 = vrot.lane.b32.xlu1 %v2394_v28, %s3070_s19  ;;  %v2573_v23 = vrot.slane %v2567_v53, 6  ;;  %v2572_v1 = vrot.slane %v2566_v4, 6 }
 0x645   : > { %v1408_v39 = vadd.f32 %v1403_v26, %v1387_v52  ;;  %v2551_v26 = vrot.slane %v2545_v55, 5 }
 0x646   : > { %2451 = vrot.lane.b32.xlu0 %v2447_v18, %s3071_s24  ;;  %v1349_v35 = vpop.permute.xlu1 %1348  ;;  %v2552_v18 = vrot.slane %v2546_v6, 5  ;;  %v2574_v38 = vsel %vm385_vm4, %v2572_v1, %v2573_v23  ;;  %v4796_v6 = vld [vmem:[#allocation21_spill] sm:$0xff] }
 0x647   : > { %v1353_v43 = vadd.f32 %v1349_v35, %v1332_v63 }
 0x648   : > { %v1424_v9 = vpop.permute.xlu0 %1423  ;;  %2418 = vrot.lane.b32.xlu1 %v2415_v2, %s3070_s19  ;;  %v2512_v2 = vrot.slane %v2505_v8, 3  ;;  %v2553_v44 = vsel %vm586_vm7, %v2551_v26, %v2552_v18  ;;  %v4573_v8 = vmul.f32 %v4005_v61, %v1661_v17  ;;  %v1695_v26 = vstv %s2835_s22 }
 0x649   : > { %v1429_v27 = vadd.f32 %v1424_v9, %v1408_v39  ;;  %v1367_v13 = vadd.f32 %v4794_v3, %v1353_v43  ;;  %v1638_v39 = vstv %s4559_s30  ;;  %v3023_v43 = vld [vmem:[#allocation2 + $0x18] sm:$0xff] }
 0x64a   : > { %2472 = vrot.lane.b32.xlu0 %v2469_v12, %s3071_s24  ;;  %v4505_v14 = vpop.permute.xlu1 %1383  ;;  %v2513_v11 = vsel %vm590_vm9, %v2510_v15, %v2512_v2  ;;  %v1712_v2 = vstv %s2836_s7  ;;  %v1696_v30 = vmul.f32 %v3023_v43, %v1695_v26 }
 0x64b   : > { %v1388_v0 = vadd.f32 %v4505_v14, %v1367_v13  ;;  %v2568_v14 = vmul.f32 %v4098_v20, %v2565_v59  ;;  %v1662_v59 = vmul.f32 %v3023_v43, %v1661_v17  ;;  %v1669_v13 = vrot.slane %v4573_v8, 2 }
 0x64c   : > { %v1445_v5 = vpop.permute.xlu0 %1444  ;;  %2439 = vrot.lane.b32.xlu1 %v2436_v45, %s3070_s19  ;;  %s2832_s19 = sld [smem:[#allocation3 + $0x38]] }
 0x64d   : > { %v1450_v35 = vadd.f32 %v1445_v5, %v1429_v27  ;;  %v2575_v49 = vrot.slane %v2568_v14, 6  ;;  %v4576_v27 = vmul.f32 %v4005_v61, %v1678_v33 }
 0x64e   : > { %2493 = vrot.lane.b32.xlu0 %v2490_v40, %s3071_s24  ;;  %v1405_v51 = vpop.permute.xlu1 %1404 }
 0x64f   : > { %v1409_v16 = vadd.f32 %v1405_v51, %v1388_v0  ;;  %v3024_v0 = vld [vmem:[#allocation2 + $0x20] sm:$0xff] }
 0x650   : > { %v1466_v54 = vpop.permute.xlu0 %1465  ;;  %2453 = vrot.lane.b32.xlu1 %v2448_v24, %s3071_s24  ;;  %v2555_v24 = vsel %vm586_vm7, %v2552_v18, %v2554_v7  ;;  %v1679_v18 = vmul.f32 %v3023_v43, %v1678_v33 }
 0x651   : > { %v1471_v62 = vadd.f32 %v1466_v54, %v1450_v35  ;;  %v2576_v54 = vsel %vm385_vm4, %v2573_v23, %v2575_v49  ;;  %v4581_v35 = vmul.f32 %v4005_v61, %v1695_v26 }
 0x652   : > { %2514 = vrot.lane.b32.xlu0 %v2511_v58, %s3071_s24  ;;  %v1426_v32 = vpop.permute.xlu1 %1425  ;;  %v1644_v58 = vstv %s2832_s19  ;;  %v1685_v48 = vrot.slane %v1679_v18, 3 }
 0x653   : > { %v1430_v5 = vadd.f32 %v1426_v32, %v1409_v16  ;;  %v4566_v63 = vmul.f32 %v4005_v61, %v1644_v58  ;;  %v1645_v56 = vmul.f32 %v3023_v43, %v1644_v58  ;;  %v1729_v16 = vstv %s4569_s5 }
 0x654   : > { %v1487_v28 = vpop.permute.xlu0 %1486  ;;  %2474 = vrot.lane.b32.xlu1 %v2471_v29, %s3071_s24  ;;  %v1731_v7 = vmul.f32 %v3024_v0, %v1729_v16 }
 0x655   : > { %v1492_v12 = vadd.f32 %v1487_v28, %v1471_v62  ;;  %v1651_v3 = vrot.slane %v1645_v56, 1  ;;  %v1668_v62 = vrot.slane %v1662_v59, 2 }
 0x656   : > { %2535 = vrot.lane.b32.xlu0 %v2532_v21, %s3071_s24  ;;  %v1447_v47 = vpop.permute.xlu1 %1446  ;;  %v1652_v21 = vrot.slane %v4566_v63, 1 }
 0x657   : > { %v1506_v25 = vadd.f32 %v4795_v31, %v1492_v12  ;;  %v1451_v34 = vadd.f32 %v1447_v47, %v1430_v5  ;;  %v1714_v12 = vmul.f32 %v3024_v0, %v1712_v2  ;;  %v1647_v31 = vmul.f32 %v4098_v20, %v1644_v58 }
 0x658   : > { %v1522_v50 = vpop.permute.xlu0 %1521  ;;  %2495 = vrot.lane.b32.xlu1 %v2492_v36, %s3071_s24  ;;  %v1639_v36 = vmul.f32 %v3023_v43, %v1638_v39 }
 0x659   : > { %v1527_v19 = vadd.f32 %v1522_v50, %v1506_v25 }
 0x65a   : > { %2556 = vrot.lane.b32.xlu0 %v2553_v44, %s3071_s24  ;;  %v1468_v9 = vpop.permute.xlu1 %1467  ;;  %v1686_v44 = vrot.slane %v4576_v27, 3 }
 0x65b   : > { %v1472_v51 = vadd.f32 %v1468_v9, %v1451_v34  ;;  %v1653_v9 = vsel %vm594_vm11, %v1651_v3, %v1652_v21  ;;  %v1720_v34 = vrot.slane %v1714_v12, 5 }
 0x65c   : > { %v1543_v22 = vpop.permute.xlu0 %1542  ;;  %2516 = vrot.lane.b32.xlu1 %v2513_v11, %s3071_s24  ;;  %v1687_v25 = vsel %vm590_vm9, %v1685_v48, %v1686_v44 }
 0x65d   : > { %v1548_v42 = vadd.f32 %v1543_v22, %v1527_v19  ;;  %v1713_v22 = vmul.f32 %v3023_v43, %v1712_v2 }
 0x65e   : > { %2577 = vrot.lane.b32.xlu0 %v2574_v38, %s3071_s24  ;;  %v1489_v45 = vpop.permute.xlu1 %1488  ;;  %v1670_v38 = vsel %vm592_vm10, %v1668_v62, %v1669_v13 }
 0x65f   : > { %v1493_v60 = vadd.f32 %v1489_v45, %v1472_v51  ;;  %v1703_v45 = vrot.slane %v4581_v35, 4  ;;  %v1664_v51 = vmul.f32 %v4098_v20, %v1661_v17 }
 0x660   : > { %v1564_v15 = vpop.permute.xlu0 %1563  ;;  %2537 = vrot.lane.b32.xlu1 %v2534_v46, %s3071_s24 }
 0x661   : > { %v1569_v57 = vadd.f32 %v1564_v15, %v1548_v42  ;;  %v1507_v32 = vadd.f32 %v4796_v6, %v1493_v60  ;;  %v1702_v15 = vrot.slane %v1696_v30, 4  ;;  %v1737_v60 = vrot.slane %v1731_v7, 6  ;;  %v4799_v30 = vld [vmem:[#allocation20_spill] sm:$0xff] }
 0x662   : > { %v1524_v40 = vpop.permute.xlu1 %1523  ;;  %v4801_v7 = vld [vmem:[#allocation24_spill] sm:$0xff] }
 0x663   : > { %v1528_v47 = vadd.f32 %v1524_v40, %v1507_v32  ;;  %v1730_v40 = vmul.f32 %v3023_v43, %v1729_v16  ;;  %v1704_v42 = vsel %vm588_vm8, %v1702_v15, %v1703_v45 }
 0x664   : > { %v1585_v10 = vpop.permute.xlu0 %1584  ;;  %2558 = vrot.lane.b32.xlu1 %v2555_v24, %s3071_s24  ;;  %v1719_v24 = vrot.slane %v1713_v22, 5  ;;  %v4800_v22 = vld [vmem:[#allocation22_spill] sm:$0xff] }
 0x665   : > { %v1590_v29 = vadd.f32 %v1585_v10, %v1569_v57  ;;  %v1681_v57 = vmul.f32 %v4098_v20, %v1678_v33  ;;  %v1736_v32 = vrot.slane %v1730_v40, 6  ;;  %v1715_v33 = vmul.f32 %v4098_v20, %v1712_v2  ;;  %v4798_v2 = vld [vmem:[#allocation18_spill] sm:$0xff] }
 0x666   : > { %v1545_v41 = vpop.permute.xlu1 %1544  ;;  %v1721_v6 = vsel %vm586_vm7, %v1719_v24, %v1720_v34 }
 0x667   : > { %v1549_v50 = vadd.f32 %v1545_v41, %v1528_v47  ;;  %v1654_v41 = vrot.slane %v1647_v31, 1  ;;  %v1738_v8 = vsel %vm385_vm4, %v1736_v32, %v1737_v60  ;;  %v1688_v59 = vrot.slane %v1681_v57, 3  ;;  %v4807_v57 = vld [vmem:[#allocation25_spill] sm:$0xff] }
 0x668   : > { %v1606_v52 = vpop.permute.xlu0 %1605  ;;  %2579 = vrot.lane.b32.xlu1 %v2576_v54, %s3071_s24  ;;  %s4831_s24 = smov 80  }
 0x669   : > { %v1611_v28 = vadd.f32 %v1606_v52, %v1590_v29  ;;  %v1640_v52 = vmul.f32 %v3024_v0, %v1638_v39  ;;  %v1671_v29 = vrot.slane %v1664_v51, 2  ;;  %v4804_v51 = vld [vmem:[#allocation28_spill] sm:$0xff] }
 0x66a   : > { %v1566_v55 = vpop.permute.xlu1 %1565 }
 0x66b   : > { %v1570_v1 = vadd.f32 %v1566_v55, %v1549_v50  ;;  %v1698_v55 = vmul.f32 %v4098_v20, %v1695_v26 }
 0x66c   : > { %v1627_v53 = vpop.permute.xlu0 %1626 }
 0x66d   : > { %v1632_v37 = vadd.f32 %v1627_v53, %v1611_v28  ;;  %v1655_v28 = vsel %vm594_vm11, %v1652_v21, %v1654_v41  ;;  %v1672_v53 = vsel %vm592_vm10, %v1669_v13, %v1671_v29  ;;  %v1705_v47 = vrot.slane %v1698_v55, 4  ;;  %v4810_v29 = vld [vmem:[#allocation32_spill] sm:$0xff] }
 0x66e   : > { %v1587_v4 = vpop.permute.xlu1 %1586  ;;  %v1722_v21 = vrot.slane %v1715_v33, 5  ;;  %v4813_v33 = vld [vmem:[#allocation31_spill] sm:$0xff] }
 0x66f   : > { %v1641_v23 = vadd.f32 %v1639_v36, %v1632_v37  ;;  %v1591_v14 = vadd.f32 %v1587_v4, %v1570_v1  ;;  %v1732_v36 = vmul.f32 %v4098_v20, %v1729_v16  ;;  %v4797_v37 = vld [vmem:[#allocation8_spill] sm:$0xff]  ;;  %v1689_v4 = vsel %vm590_vm9, %v1686_v44, %v1688_v59 }
 0x670   : > { %v4585_v11 = vpop.permute.xlu0 %2094  ;;  %v1723_v12 = vsel %vm586_vm7, %v1720_v34, %v1722_v21  ;;  %v4805_v34 = vld [vmem:[#allocation23_spill] sm:$0xff]  ;;  %v4817_v21 = vld [vmem:[#allocation12_spill] sm:$0xff] }
 0x671   : > { %v1658_v61 = vadd.f32 %v1653_v9, %v1641_v23  ;;  %v1706_v9 = vsel %vm588_vm8, %v1703_v45, %v1705_v47  ;;  %v1739_v48 = vrot.slane %v1732_v36, 6  ;;  %v4802_v45 = vld [vmem:[#allocation26_spill] sm:$0xff]  ;;  %v4815_v36 = vld [vmem:[#allocation33_spill] sm:$0xff] }
 0x672   : > { %v1608_v5 = vpop.permute.xlu1 %1607 }
 0x673   : > { %v1675_v46 = vadd.f32 %v1670_v38, %v1658_v61  ;;  %v1612_v10 = vadd.f32 %v1608_v5, %v1591_v14  ;;  %v1740_v61 = vsel %vm385_vm4, %v1737_v60, %v1739_v48  ;;  %v4803_v14 = vld [vmem:[#allocation10_spill] sm:$0xff]  ;;  %v4819_v48 = vld [vmem:[#allocation35_spill] sm:$0xff]  ;;  %vm2666_vm4 = vcmask 916480  }
 0x674   : > { %v4592_v19 = vpop.permute.xlu0 %2115 }
 0x675   : > { %v1692_v49 = vadd.f32 %v1687_v25, %v1675_v46 }
 0x676   : > { %v1629_v54 = vpop.permute.xlu1 %1628 }
 0x677   : > { %v1709_v58 = vadd.f32 %v1704_v42, %v1692_v49  ;;  %v1633_v63 = vadd.f32 %v1629_v54, %v1612_v10  ;;  %v4806_v42 = vld [vmem:[#allocation9_spill] sm:$0xff] }
 0x678   : > { %v4599_v17 = vpop.permute.xlu0 %2136 }
 0x679   : > { %v1726_v43 = vadd.f32 %v1721_v6, %v1709_v58  ;;  %v1642_v56 = vadd.f32 %v1640_v52, %v1633_v63  ;;  %v4808_v58 = vld [vmem:[#allocation30_spill] sm:$0xff]  ;;  %v4809_v63 = vld [vmem:[#allocation27_spill] sm:$0xff] }
 0x67a   : > { %v4604_v27 = vpop.permute.xlu1 %2096 }
 0x67b   : > { %v1743_v39 = vadd.f32 %v1738_v8, %v1726_v43  ;;  %v1659_v18 = vadd.f32 %v1655_v28, %v1642_v56  ;;  %v4811_v43 = vld [vmem:[#allocation29_spill] sm:$0xff]  ;;  %v4812_v28 = vld [vmem:[#allocation34_spill] sm:$0xff] }
 0x67c   : > { %v4608_v26 = vpop.permute.xlu0 %2157 }
 0x67d   : > { %v1757_v3 = vadd.f32 %v4797_v37, %v1743_v39  ;;  %v1676_v35 = vadd.f32 %v1672_v53, %v1659_v18  ;;  %v4814_v53 = vld [vmem:[#allocation36_spill] sm:$0xff] }
 0x67e   : > { %v4612_v50 = vpop.permute.xlu1 %2117 }
 0x67f   : > { %v1778_v62 = vadd.f32 %v4798_v2, %v1757_v3  ;;  %v1693_v23 = vadd.f32 %v1689_v4, %v1676_v35  ;;  %v4816_v35 = vld [vmem:[#allocation38_spill] sm:$0xff] }
 0x680   : > { %v2172_v13 = vpop.permute.xlu0 %2171 }
 0x681   : > { %v1799_v0 = vadd.f32 %v4799_v30, %v1778_v62  ;;  %v1710_v20 = vadd.f32 %v1706_v9, %v1693_v23  ;;  %v4818_v23 = vld [vmem:[#allocation40_spill] sm:$0xff] }
 0x682   : > { %v4618_v1 = vpop.permute.xlu1 %2138 }
 0x683   : > { %v1820_v16 = vadd.f32 %v4800_v22, %v1799_v0  ;;  %v1727_v44 = vadd.f32 %v1723_v12, %v1710_v20  ;;  %v4820_v20 = vld [vmem:[#allocation11_spill] sm:$0xff]  ;;  %v4821_v22 = vld [vmem:[#allocation37_spill] sm:$0xff] }
 0x684   : > { %v2193_v38 = vpop.permute.xlu0 %2192 }
 0x685   : > { %v1841_v5 = vadd.f32 %v4801_v7, %v1820_v16  ;;  %v1744_v31 = vadd.f32 %v1740_v61, %v1727_v44  ;;  %v4822_v61 = vld [vmem:[#allocation42_spill] sm:$0xff] }
 0x686   : > { %v2160_v25 = vpop.permute.xlu1 %2159 }
 0x687   : > { %v1862_v46 = vadd.f32 %v4802_v45, %v1841_v5  ;;  %v1758_v15 = vadd.f32 %v4803_v14, %v1744_v31  ;;  %v4823_v5 = vld [vmem:[#allocation39_spill] sm:$0xff] }
 0x688   : > { %v2214_v40 = vpop.permute.xlu0 %2213 }
 0x689   : > { %v1883_v24 = vadd.f32 %v4804_v51, %v1862_v46  ;;  %v1779_v49 = vadd.f32 %v4805_v34, %v1758_v15  ;;  %v4824_v46 = vld [vmem:[#allocation44_spill] sm:$0xff]  ;;  %v4825_v15 = vld [vmem:[#allocation41_spill] sm:$0xff] }
 0x68a   : > { %v2174_v10 = vpop.permute.xlu1 %2173 }
 0x68b   : > { %v1897_v41 = vadd.f32 %v4806_v42, %v1883_v24  ;;  %v1800_v54 = vadd.f32 %v4807_v57, %v1779_v49  ;;  %v4826_v49 = vld [vmem:[#allocation43_spill] sm:$0xff] }
 0x68c   : > { %v2235_v60 = vpop.permute.xlu0 %2234 }
 0x68d   : > { %v1918_v52 = vadd.f32 %v4808_v58, %v1897_v41  ;;  %v1821_v6 = vadd.f32 %v4809_v63, %v1800_v54  ;;  %v4827_v54 = vld [vmem:[#allocation45_spill] sm:$0xff] }
 0x68e   : > { %v2195_v32 = vpop.permute.xlu1 %2194 }
 0x68f   : > { %v1939_v55 = vadd.f32 %v4810_v29, %v1918_v52  ;;  %v1842_v56 = vadd.f32 %v4811_v43, %v1821_v6  ;;  %v4828_v6 = vld [vmem:[#allocation13_spill] sm:$0xff]  ;;  %v4829_v43 = vld [vmem:[#allocation46_spill] sm:$0xff] }
 0x690   : > { %v2256_v8 = vpop.permute.xlu0 %2255 }
 0x691   : > { %v1960_v59 = vadd.f32 %v4812_v28, %v1939_v55  ;;  %v1863_v39 = vadd.f32 %v4813_v33, %v1842_v56  ;;  %v4830_v33 = vld [vmem:[#allocation47_spill] sm:$0xff] }
 0x692   : > { %v2216_v18 = vpop.permute.xlu1 %2215 }
 0x693   : > { %v1981_v47 = vadd.f32 %v4814_v53, %v1960_v59  ;;  %v1884_v37 = vadd.f32 %v4815_v36, %v1863_v39 }
 0x694   : > { %v2277_v3 = vpop.permute.xlu0 %2276 }
 0x695   : > { %v2002_v4 = vadd.f32 %v4816_v35, %v1981_v47  ;;  %v1898_v2 = vadd.f32 %v4817_v21, %v1884_v37 }
 0x696   : > { %v2237_v62 = vpop.permute.xlu1 %2236 }
 0x697   : > { %v2023_v9 = vadd.f32 %v4818_v23, %v2002_v4  ;;  %v1919_v30 = vadd.f32 %v4819_v48, %v1898_v2 }
 0x698   : > { %v2298_v0 = vpop.permute.xlu0 %2297 }
 0x699   : > { %v2037_v12 = vadd.f32 %v4820_v20, %v2023_v9  ;;  %v1940_v16 = vadd.f32 %v4821_v22, %v1919_v30 }
 0x69a   : > { %v2258_v44 = vpop.permute.xlu1 %2257 }
 0x69b   : > { %v2058_v7 = vadd.f32 %v4822_v61, %v2037_v12  ;;  %v1961_v31 = vadd.f32 %v4823_v5, %v1940_v16 }
 0x69c   : > { %v2312_v45 = vpop.permute.xlu0 %2311 }
 0x69d   : > { %v2079_v14 = vadd.f32 %v4824_v46, %v2058_v7  ;;  %v1982_v51 = vadd.f32 %v4825_v15, %v1961_v31 }
 0x69e   : > { %v2279_v24 = vpop.permute.xlu1 %2278 }
 0x69f   : > { %v2100_v34 = vadd.f32 %v4585_v11, %v2079_v14  ;;  %v2003_v42 = vadd.f32 %v4826_v49, %v1982_v51 }
 0x6a0   : > { %v2333_v41 = vpop.permute.xlu0 %2332 }
 0x6a1   : > { %v2121_v57 = vadd.f32 %v4592_v19, %v2100_v34  ;;  %v2024_v58 = vadd.f32 %v4827_v54, %v2003_v42 }
 0x6a2   : > { %v2300_v52 = vpop.permute.xlu1 %2299 }
 0x6a3   : > { %v2142_v63 = vadd.f32 %v4599_v17, %v2121_v57  ;;  %v2038_v29 = vadd.f32 %v4828_v6, %v2024_v58 }
 0x6a4   : > { %v2354_v55 = vpop.permute.xlu0 %2353 }
 0x6a5   : > { %v2059_v56 = vadd.f32 %v4829_v43, %v2038_v29  ;;  %v2163_v28 = vadd.f32 %v4608_v26, %v2142_v63 }
 0x6a6   : > { %v2314_v59 = vpop.permute.xlu1 %2313 }
 0x6a7   : > { %v2080_v11 = vadd.f32 %v4830_v33, %v2059_v56  ;;  %v2177_v39 = vadd.f32 %v2172_v13, %v2163_v28 }
 0x6a8   : > { %v2375_v53 = vpop.permute.xlu0 %2374 }
 0x6a9   : > { %v2101_v47 = vadd.f32 %v4604_v27, %v2080_v11  ;;  %v2198_v19 = vadd.f32 %v2193_v38, %v2177_v39 }
 0x6aa   : > { %v2335_v36 = vpop.permute.xlu1 %2334 }
 0x6ab   : > { %v2122_v37 = vadd.f32 %v4612_v50, %v2101_v47  ;;  %v2219_v35 = vadd.f32 %v2214_v40, %v2198_v19 }
 0x6ac   : > { %v2396_v17 = vpop.permute.xlu0 %2395 }
 0x6ad   : > { %v2143_v4 = vadd.f32 %v4618_v1, %v2122_v37  ;;  %v2240_v21 = vadd.f32 %v2235_v60, %v2219_v35 }
 0x6ae   : > { %v2356_v2 = vpop.permute.xlu1 %2355 }
 0x6af   : > { %v2164_v23 = vadd.f32 %v2160_v25, %v2143_v4  ;;  %v2261_v9 = vadd.f32 %v2256_v8, %v2240_v21 }
 0x6b0   : > { %v2417_v26 = vpop.permute.xlu0 %2416 }
 0x6b1   : > { %v2178_v48 = vadd.f32 %v2174_v10, %v2164_v23  ;;  %v2282_v30 = vadd.f32 %v2277_v3, %v2261_v9 }
 0x6b2   : > { %v2377_v20 = vpop.permute.xlu1 %2376 }
 0x6b3   : > { %v2199_v13 = vadd.f32 %v2195_v32, %v2178_v48  ;;  %v2303_v12 = vadd.f32 %v2298_v0, %v2282_v30 }
 0x6b4   : > { %v2438_v22 = vpop.permute.xlu0 %2437 }
 0x6b5   : > { %v2220_v27 = vadd.f32 %v2216_v18, %v2199_v13  ;;  %v2317_v38 = vadd.f32 %v2312_v45, %v2303_v12 }
 0x6b6   : > { %v2398_v16 = vpop.permute.xlu1 %2397 }
 0x6b7   : > { %v2241_v61 = vadd.f32 %v2237_v62, %v2220_v27  ;;  %v2338_v50 = vadd.f32 %v2333_v41, %v2317_v38 }
 0x6b8   : > { %v2452_v40 = vpop.permute.xlu0 %2451 }
 0x6b9   : > { %v2262_v7 = vadd.f32 %v2258_v44, %v2241_v61  ;;  %v2359_v5 = vadd.f32 %v2354_v55, %v2338_v50 }
 0x6ba   : > { %v2419_v1 = vpop.permute.xlu1 %2418 }
 0x6bb   : > { %v2283_v60 = vadd.f32 %v2279_v24, %v2262_v7  ;;  %v2380_v31 = vadd.f32 %v2375_v53, %v2359_v5 }
 0x6bc   : > { %v2473_v25 = vpop.permute.xlu0 %2472 }
 0x6bd   : > { %v2304_v8 = vadd.f32 %v2300_v52, %v2283_v60  ;;  %v2401_v46 = vadd.f32 %v2396_v17, %v2380_v31 }
 0x6be   : > { %v2440_v10 = vpop.permute.xlu1 %2439 }
 0x6bf   : > { %v2318_v3 = vadd.f32 %v2314_v59, %v2304_v8  ;;  %v2422_v14 = vadd.f32 %v2417_v26, %v2401_v46 }
 0x6c0   : > { %v2494_v32 = vpop.permute.xlu0 %2493 }
 0x6c1   : > { %v2339_v0 = vadd.f32 %v2335_v36, %v2318_v3  ;;  %v2443_v15 = vadd.f32 %v2438_v22, %v2422_v14 }
 0x6c2   : > { %v2454_v18 = vpop.permute.xlu1 %2453 }
 0x6c3   : > { %v2360_v45 = vadd.f32 %v2356_v2, %v2339_v0  ;;  %v2457_v51 = vadd.f32 %v2452_v40, %v2443_v15 }
 0x6c4   : > { %v2515_v62 = vpop.permute.xlu0 %2514 }
 0x6c5   : > { %v2381_v34 = vadd.f32 %v2377_v20, %v2360_v45  ;;  %v2478_v49 = vadd.f32 %v2473_v25, %v2457_v51 }
 0x6c6   : > { %v2475_v44 = vpop.permute.xlu1 %2474 }
 0x6c7   : > { %v2402_v42 = vadd.f32 %v2398_v16, %v2381_v34  ;;  %v2499_v41 = vadd.f32 %v2494_v32, %v2478_v49 }
 0x6c8   : > { %v2536_v24 = vpop.permute.xlu0 %2535 }
 0x6c9   : > { %v2423_v57 = vadd.f32 %v2419_v1, %v2402_v42  ;;  %v2520_v54 = vadd.f32 %v2515_v62, %v2499_v41  ;;  %v2677_v42 = vld [vmem:[%s3127_s26 + $0x10] sm:$0xff] }
 0x6ca   : > { %v2496_v58 = vpop.permute.xlu1 %2495 }
 0x6cb   : > { %v2444_v52 = vadd.f32 %v2440_v10, %v2423_v57  ;;  %v2541_v63 = vadd.f32 %v2536_v24, %v2520_v54  ;;  %v2683_v10 = vlaneseq  ;;  %v4834_v54 = vld [vmem:[#allocation6_spill] sm:$0xff] }
 0x6cc   : > { %v2557_v6 = vpop.permute.xlu0 %2556 }
 0x6cd   : > { %v2458_v29 = vadd.f32 %v2454_v18, %v2444_v52  ;;  %v2562_v56 = vadd.f32 %v2557_v6, %v2541_v63  ;;  %v2684_v32 = vshrl.u32 %v2683_v10, 7  ;;  %v4835_v52 = vld [vmem:[#allocation7_spill] sm:$0xff] }
 0x6ce   : > { %v2517_v55 = vpop.permute.xlu1 %2516  ;;  %v2681_v63 = vmul.f32 %v2677_v42, %v4835_v52 }
 0x6cf   : > { %v2479_v43 = vadd.f32 %v2475_v44, %v2458_v29  ;;  %v2685_v34 = vsub.s32 0, %v2684_v32  ;;  %v2675_v44 = vld [vmem:[%s3127_s26] sm:$0xff] }
 0x6d0   : > { %v2578_v28 = vpop.permute.xlu0 %2577 }
 0x6d1   : > { %v2500_v59 = vadd.f32 %v2496_v58, %v2479_v43  ;;  %v2583_v33 = vadd.f32 %v2578_v28, %v2562_v56  ;;  %v2679_v58 = vmul.f32 %v2675_v44, %v4834_v54 }
 0x6d2   : > { %v2538_v11 = vpop.permute.xlu1 %2537 }
 0x6d3   : > { %v2521_v39 = vadd.f32 %v2517_v55, %v2500_v59  ;;  %v2880_v53 = vmul.f32 -1.442695, %v2583_v33 }
 0x6d5   : > { %3009 = vpow2.f32 %v2880_v53  ;;  %v2542_v47 = vadd.f32 %v2538_v11, %v2521_v39  ;;  %v2676_v53 = vld [vmem:[%s3127_s26 + $0x8] sm:$0xff] }
 0x6d6   : > { %v2559_v19 = vpop.permute.xlu1 %2558 }
 0x6d7   : > { %v2563_v36 = vadd.f32 %v2559_v19, %v2542_v47  ;;  %v2678_v47 = vld [vmem:[%s3127_s26 + $0x18] sm:$0xff] }
 0x6da   : > { %v2580_v37 = vpop.permute.xlu1 %2579 }
 0x6db   : > { %v2584_v35 = vadd.f32 %v2580_v37, %v2563_v36 }
 0x6dd   : > { %v2881_v17 = vmul.f32 -1.442695, %v2584_v35  ;;  %v2680_v35 = vmul.f32 %v2676_v53, %v4834_v54 }
 0x6df   : > { %v3010_v4 = vpop.eup %3009  ;;  %3011 = vpow2.f32 %v2881_v17  ;;  %v2682_v17 = vmul.f32 %v2678_v47, %v4835_v52 }
 0x6e0   : > { %v2591_v21 = vadd.f32 1.0, %v3010_v4 }
 0x6e2   : > { %3013 = vrcp.f32 %v2591_v21 }
 0x6e9   : > { %v3012_v2 = vpop.eup %3011 }
 0x6ea   : > { %v2592_v23 = vadd.f32 1.0, %v3012_v2 }
 0x6ec   : > { %v3014_v9 = vpop.eup %3013  ;;  %3015 = vrcp.f32 %v2592_v23 }
 0x6ed   : > { %v2598_v26 = vrot.slane %v3014_v9, 1  ;;  %v2602_v48 = vrot.slane %v3014_v9, 2  ;;  %v2606_v30 = vrot.slane %v3014_v9, 3  ;;  %v2610_v12 = vrot.slane %v3014_v9, 4 }
 0x6ee   : > { %v2614_v27 = vrot.slane %v3014_v9, 5  ;;  %v2618_v16 = vrot.slane %v3014_v9, 6  ;;  %v2622_v50 = vrot.slane %v3014_v9, 7 }
 0x6ef   : > { %2599 = vrot.lane.b32.xlu0 %v2598_v26, %s3065_s14 }
 0x6f3   : > { %2603 = vrot.lane.b32.xlu0 %v2602_v48, %s3063_s12 }
 0x6f6   : > { %v3016_v20 = vpop.eup %3015 }
 0x6f7   : > { %2607 = vrot.lane.b32.xlu0 %v2606_v30, %s3064_s13  ;;  %v2627_v13 = vrot.slane %v3016_v20, 1  ;;  %v2631_v22 = vrot.slane %v3016_v20, 2  ;;  %v2635_v38 = vrot.slane %v3016_v20, 3  ;;  %v2639_v61 = vrot.slane %v3016_v20, 4 }
 0x6f8   : > { %v2643_v40 = vrot.slane %v3016_v20, 5  ;;  %v2647_v7 = vrot.slane %v3016_v20, 6  ;;  %v2651_v5 = vrot.slane %v3016_v20, 7 }
 0x6f9   : > { %2628 = vrot.lane.b32.xlu1 %v2627_v13, %s3065_s14  ;;  %s4833_s14 = smov 112  }
 0x6fb   : > { %2611 = vrot.lane.b32.xlu0 %v2610_v12, %s3061_s10 }
 0x6fd   : > { %2632 = vrot.lane.b32.xlu1 %v2631_v22, %s3063_s12 }
 0x6ff   : > { %2615 = vrot.lane.b32.xlu0 %v2614_v27, %s4831_s24 }
 0x701   : > { %2636 = vrot.lane.b32.xlu1 %v2635_v38, %s3064_s13 }
 0x703   : > { %2619 = vrot.lane.b32.xlu0 %v2618_v16, %s4832_s6 }
 0x705   : > { %2640 = vrot.lane.b32.xlu1 %v2639_v61, %s3061_s10  ;;  %s4836_s10 = sshll.u32 %s4838_s16, 5 }
 0x706   : > { %s211_s18 = scalar_lea.vmem %s4707_s4, %s4836_s10 }
 0x707   : > { %2623 = vrot.lane.b32.xlu0 %v2622_v50, %s4833_s14 }
 0x709   : > { %2644 = vrot.lane.b32.xlu1 %v2643_v40, %s4831_s24 }
 0x70d   : > { %2648 = vrot.lane.b32.xlu1 %v2647_v7, %s4832_s6 }
 0x711   : > { %2652 = vrot.lane.b32.xlu1 %v2651_v5, %s4833_s14 }
 0x761   : > { %v2600_v1 = vpop.permute.xlu0 %2599 }
 0x762   : > { %v2655_v0 = vsel %vm301_vm2, %v3014_v9, %v2600_v1 }
 0x765   : > { %v2604_v60 = vpop.permute.xlu0 %2603 }
 0x766   : > { %v2657_v15 = vsel %vm2656_vm14, %v2655_v0, %v2604_v60 }
 0x769   : > { %v2608_v31 = vpop.permute.xlu0 %2607 }
 0x76a   : > { %v2659_v45 = vsel %vm2658_vm15, %v2657_v15, %v2608_v31 }
 0x76b   : > { %v2629_v25 = vpop.permute.xlu1 %2628 }
 0x76c   : > { %v2668_v56 = vsel %vm301_vm2, %v3016_v20, %v2629_v25 }
 0x76d   : > { %v2612_v8 = vpop.permute.xlu0 %2611 }
 0x76e   : > { %v2661_v51 = vsel %vm2660_vm0, %v2659_v45, %v2612_v8 }
 0x76f   : > { %v2633_v46 = vpop.permute.xlu1 %2632 }
 0x770   : > { %v2669_v28 = vsel %vm2656_vm14, %v2668_v56, %v2633_v46 }
 0x771   : > { %v2616_v3 = vpop.permute.xlu0 %2615 }
 0x772   : > { %v2663_v49 = vsel %vm2662_vm1, %v2661_v51, %v2616_v3 }
 0x773   : > { %v2637_v14 = vpop.permute.xlu1 %2636 }
 0x774   : > { %v2670_v33 = vsel %vm2658_vm15, %v2669_v28, %v2637_v14 }
 0x775   : > { %v2620_v18 = vpop.permute.xlu0 %2619 }
 0x776   : > { %v2665_v41 = vsel %vm2664_vm3, %v2663_v49, %v2620_v18 }
 0x777   : > { %v2641_v62 = vpop.permute.xlu1 %2640 }
 0x778   : > { %v2671_v11 = vsel %vm2660_vm0, %v2670_v33, %v2641_v62 }
 0x779   : > { %v2624_v24 = vpop.permute.xlu0 %2623 }
 0x77a   : > { %v2667_v57 = vsel %vm2666_vm4, %v2665_v41, %v2624_v24 }
 0x77b   : > { %v2686_v6 = vrot.slane %v2667_v57, %v2685_v34  ;;  %v2645_v29 = vpop.permute.xlu1 %2644 }
 0x77c   : > { %v2672_v39 = vsel %vm2662_vm1, %v2671_v11, %v2645_v29 }
 0x77d   : > { %v2691_v55 = vmul.f32 %v2686_v6, %v2679_v58  ;;  %v2693_v43 = vmul.f32 %v2686_v6, %v2681_v63 }
 0x77f   : > { %2695 = vst [vmem:[%s211_s18] sm:$0xff] %v2691_v55  ;;  %2697 = vst [vmem:[%s211_s18 + $0x10] sm:$0xff] %v2693_v43  ;;  %v2649_v59 = vpop.permute.xlu1 %2648 }
 0x780   : > { %v2673_v19 = vsel %vm2664_vm3, %v2672_v39, %v2649_v59 }
 0x783   : > { %v2653_v36 = vpop.permute.xlu1 %2652 }
 0x784   : > { %v2674_v37 = vsel %vm2666_vm4, %v2673_v19, %v2653_v36 }
 0x785   : > { %v2690_v4 = vrot.slane %v2674_v37, %v2685_v34 }
 0x787   : > { %v2692_v21 = vmul.f32 %v2690_v4, %v2680_v35  ;;  %v2694_v2 = vmul.f32 %v2690_v4, %v2682_v17 }
 0x789   : > { %2696 = vst [vmem:[%s211_s18 + $0x8] sm:$0xff] %v2692_v21  ;;  %2698 = vst [vmem:[%s211_s18 + $0x18] sm:$0xff] %v2694_v2 }
 0x78a PF: > { %s15_s15 = sadd.s32 1, %s3050_s15  }
 0x78b   : > { %p12_p1 = scmp.ge.s32.totalorder %s15_s15, 4  }
 0x78d   :  { %14 = sbr.rel (!%p12_p1) target bundleno = 1 (0x1), region = 72 }
 0x794   :  { %2720 = vsyncpa [#allocation4], 1 }
 0x795   :  { %2722 = vsyncpa [#allocation4 + $0x1], 1 }

</bundles_post_ra>
